<compile_context>
chip_gen: v6e
topology: v6e:2x2x1
jax: 0.10.0
libtpu: 0.0.40
codegen_flags: <defaults>
</compile_context>

<pallas_src>
import math
from functools import partial

import jax
import jax.numpy as jnp
from jax.experimental import pallas as pl
from jax.experimental.pallas import tpu as pltpu


# ----------------------------- Fused kernel --------------------------------

def _fused_forward_kernel(x_ref, in_w, in_b, pe, conv_w, conv_b,
                          qkv_w, qkv_b, out_w, out_b, ln1_g, ln1_b,
                          w1, b1, w2, b2, ln2_g, ln2_b,
                          norm_g, norm_b, fc_w, fc_b, o_ref,
                          *, nhead, num_layers, dilations, ksize):
    Bt, S, Fin = x_ref.shape
    D = in_w.shape[1]
    Dh = D // nhead
    M = Bt * S                         # stacked (batch*seq) rows fill the MXU M axis
    scale = 1.0 / math.sqrt(Dh)

    def mm(a, w_bf16):
        # (f32 activation) @ (bf16 weight) on the MXU, f32 accumulation.
        return jax.lax.dot_general(
            a.astype(jnp.bfloat16), w_bf16,
            (((a.ndim - 1,), (0,)), ((), ())),
            preferred_element_type=jnp.float32)

    def layernorm(v, g, b):
        mu = jnp.mean(v, axis=-1, keepdims=True)
        vc = v - mu
        var = jnp.mean(vc * vc, axis=-1, keepdims=True)
        return vc * jax.lax.rsqrt(var + 1e-5) * g + b

    # ---- input projection + positional encoding (f32 activations) ----
    h = mm(x_ref[...].reshape(M, Fin), in_w[...]) + in_b[...]          # (M, D)
    h = (h.reshape(Bt, S, D) + pe[...]).reshape(M, D)

    # ---- dilated conv blocks: Conv1d('same') + BN(eval, folded) + ReLU ----
    # Tap shift = pltpu.roll on the stacked rows (XLU slot, bit-exact) + a
    # per-row zero-padding mask built from the within-sample position index.
    s_idx = jax.lax.broadcasted_iota(jnp.int32, (Bt, S, 1), 1).reshape(M, 1)
    for blk, dil in enumerate(dilations):
        pad = (ksize - 1) * dil // 2
        taps = []
        for t in range(ksize):
            off = t * dil - pad
            if off == 0:
                taps.append(h)
            else:
                shifted = pltpu.roll(h, shift=(-off) % M, axis=0)      # rows: h[i+off]
                valid = jnp.logical_and(s_idx + off >= 0, s_idx + off < S)
                taps.append(jnp.where(valid, shifted, 0.0))
        im2col = jnp.concatenate(taps, axis=-1)                        # (M, ksize*D)
        h = jnp.maximum(mm(im2col, conv_w[blk]) + conv_b[blk], 0.0)

    # ---- transformer encoder layers (post-norm, ReLU FFN, eval mode) ----
    for l in range(num_layers):
        qkv = mm(h, qkv_w[l]) + qkv_b[l]                               # (M, 3D) fused QKV
        ow_l = out_w[l]                                                # (nhead, Dh, D)
        attn = None
        for hd in range(nhead):
            q = qkv[:, hd * Dh:(hd + 1) * Dh].reshape(Bt, S, Dh).astype(jnp.bfloat16)
            k = qkv[:, D + hd * Dh:D + (hd + 1) * Dh].reshape(Bt, S, Dh).astype(jnp.bfloat16)
            v = qkv[:, 2 * D + hd * Dh:2 * D + (hd + 1) * Dh].reshape(Bt, S, Dh).astype(jnp.bfloat16)
            s = jax.lax.dot_general(                                   # q @ k^T, batched over Bt
                q, k, (((2,), (2,)), ((0,), (0,))),
                preferred_element_type=jnp.float32) * scale            # (Bt, S, S) f32
            mx = jnp.max(s, axis=-1, keepdims=True)
            e = jnp.exp(s - mx)
            p = e * pl.reciprocal(jnp.sum(e, axis=-1, keepdims=True), approx=True)
            ctx = jax.lax.dot_general(                                 # P @ V, batched over Bt
                p.astype(jnp.bfloat16), v, (((2,), (1,)), ((0,), (0,))),
                preferred_element_type=jnp.float32)                    # (Bt, S, Dh)
            # per-head slice of the output projection -> no lane concat needed
            part = mm(ctx.reshape(M, Dh), ow_l[hd])                    # (M, D)
            attn = part if attn is None else attn + part
        attn = attn + out_b[l]
        h = layernorm(h + attn, ln1_g[l], ln1_b[l])
        ff = jnp.maximum(mm(h, w1[l]) + b1[l], 0.0)
        ff = mm(ff, w2[l]) + b2[l]
        h = layernorm(h + ff, ln2_g[l], ln2_b[l])

    # ---- mean over sequence + LayerNorm + final fc (lane-dense padded out) ----
    pooled = jnp.mean(h.reshape(Bt, S, D), axis=1)                     # (Bt, D)
    pooled = layernorm(pooled, norm_g[...], norm_b[...])
    o_ref[0] = mm(pooled, fc_w[...]) + fc_b[...]                       # (Bt, OUT_PAD)


# ----------------------------- Wrapper --------------------------------------

def enhanced_transformer_forward(x, packed, *, output_length, dilations=(1, 2),
                                 num_blocks=1):
    """num_blocks=1 is best on v5e/v6e (single TC); use num_blocks=2 on v7x so
    the 'parallel' grid axis shards the batch across its two TensorCores."""
    B, S, Fin = x.shape
    D = packed["in_w"].shape[1]
    Dff = packed["w1"].shape[2]
    OUT_PAD = packed["fc_w"].shape[1]
    num_layers = packed["qkv_w"].shape[0]
    nhead = packed["out_w"].shape[1]
    n_conv = packed["conv_w"].shape[0]
    ksize = packed["conv_w"].shape[1] // D
    assert len(dilations) == n_conv and D % nhead == 0
    assert B % num_blocks == 0
    Bt = B // num_blocks

    pe = packed["pe"][:S]                                              # (S, D)

    weights = [
        packed["in_w"], packed["in_b"], pe,
        packed["conv_w"], packed["conv_b"],
        packed["qkv_w"], packed["qkv_b"], packed["out_w"], packed["out_b"],
        packed["ln1_g"], packed["ln1_b"],
        packed["w1"], packed["b1"], packed["w2"], packed["b2"],
        packed["ln2_g"], packed["ln2_b"],
        packed["norm_g"], packed["norm_b"], packed["fc_w"], packed["fc_b"],
    ]

    def bcast_spec(a):
        zeros = (0,) * a.ndim
        return pl.BlockSpec(a.shape, lambda b, z=zeros: z)

    # Advisory cost estimate for XLA scheduling of surrounding glue.
    flops = B * (
        2 * S * Fin * D
        + n_conv * 2 * S * ksize * D * D
        + num_layers * (2 * S * D * 3 * D                 # fused QKV
                        + 4 * S * S * D                   # scores + PV
                        + 2 * S * D * D                   # out-proj (summed per head)
                        + 4 * S * D * Dff)                # FFN
        + 2 * D * OUT_PAD)
    transcendentals = B * (num_layers * (nhead * S * S + 2 * S) + S + 1)
    bytes_accessed = int(x.size * x.dtype.itemsize
                         + sum(w.size * w.dtype.itemsize for w in weights)
                         + B * OUT_PAD * 4)

    kern = partial(_fused_forward_kernel, nhead=nhead, num_layers=num_layers,
                   dilations=tuple(dilations), ksize=ksize)
    out = pl.pallas_call(
        kern,
        grid=(num_blocks,),
        in_specs=[pl.BlockSpec((Bt, S, Fin), lambda b: (b, 0, 0))]
                 + [bcast_spec(w) for w in weights],
        out_specs=pl.BlockSpec((1, Bt, OUT_PAD), lambda b: (b, 0, 0)),
        out_shape=jax.ShapeDtypeStruct((num_blocks, Bt, OUT_PAD), jnp.float32),
        compiler_params=pltpu.CompilerParams(
            dimension_semantics=("parallel",)),
        cost_estimate=pl.CostEstimate(flops=int(flops),
                                      transcendentals=int(transcendentals),
                                      bytes_accessed=bytes_accessed),
    )(x, *weights)
    # un-pad the lane-dense output outside the kernel
    return out.reshape(B, OUT_PAD)[:, :output_length]


# ------------------------ Parameter packing (host-side) ---------------------

def pack_params(params, nhead, eps=1e-5, lane=128):
    """Fold eval-mode BN into conv weights, concat QKV, head-block the out-proj
    weight, zero-pad the fc output dim to a full 128-lane width, stack layers,
    cast matmul weights to bf16 (biases / LN / PE stay f32)."""
    f32, bf16 = jnp.float32, jnp.bfloat16
    D = params["in_w"].shape[1]
    Dh = D // nhead
    OUT = params["fc_w"].shape[1]
    OUT_PAD = -(-OUT // lane) * lane

    conv_w, conv_b = [], []
    for cp in params["conv_blocks"]:
        a = cp["gamma"] * jax.lax.rsqrt(cp["rvar"] + eps)               # (D,)
        wk = jnp.transpose(cp["w"], (2, 1, 0)) * a[None, None, :]       # (k, Cin, Cout)
        k = wk.shape[0]
        conv_w.append(wk.reshape(k * D, D))
        conv_b.append(((cp["b"] - cp["rmean"]) * a + cp["beta"]).reshape(1, D))

    fc_w = jnp.zeros((D, OUT_PAD), f32).at[:, :OUT].set(params["fc_w"])
    fc_b = jnp.zeros((OUT_PAD,), f32).at[:OUT].set(params["fc_b"])

    L = params["layers"]
    return {
        "in_w": params["in_w"].astype(bf16),
        "in_b": params["in_b"].reshape(1, -1).astype(f32),
        "pe": params["pe"].astype(f32),
        "conv_w": jnp.stack(conv_w).astype(bf16),                        # (2, k*D, D)
        "conv_b": jnp.stack(conv_b).astype(f32),                         # (2, 1, D)
        "qkv_w": jnp.stack([jnp.concatenate([lp["wq"], lp["wk"], lp["wv"]], axis=1)
                            for lp in L]).astype(bf16),                  # (L, D, 3D)
        "qkv_b": jnp.stack([jnp.concatenate([lp["bq"], lp["bk"], lp["bv"]])[None, :]
                            for lp in L]).astype(f32),                   # (L, 1, 3D)
        "out_w": jnp.stack([lp["wo"].reshape(nhead, Dh, D)
                            for lp in L]).astype(bf16),                  # (L, nhead, Dh, D)
        "out_b": jnp.stack([lp["bo"][None, :] for lp in L]).astype(f32),
        "ln1_g": jnp.stack([lp["ln1_g"][None, :] for lp in L]).astype(f32),
        "ln1_b": jnp.stack([lp["ln1_b"][None, :] for lp in L]).astype(f32),
        "w1": jnp.stack([lp["w1"] for lp in L]).astype(bf16),
        "b1": jnp.stack([lp["b1"][None, :] for lp in L]).astype(f32),
        "w2": jnp.stack([lp["w2"] for lp in L]).astype(bf16),
        "b2": jnp.stack([lp["b2"][None, :] for lp in L]).astype(f32),
        "ln2_g": jnp.stack([lp["ln2_g"][None, :] for lp in L]).astype(f32),
        "ln2_b": jnp.stack([lp["ln2_b"][None, :] for lp in L]).astype(f32),
        "norm_g": params["norm_g"].reshape(1, -1).astype(f32),
        "norm_b": params["norm_b"].reshape(1, -1).astype(f32),
        "fc_w": fc_w.astype(bf16),                                       # (D, OUT_PAD)
        "fc_b": fc_b.reshape(1, -1).astype(f32),                         # (1, OUT_PAD)
    }


# --------------------------- Parameter init ---------------------------------

def make_positional_encoding(max_len, d_model):
    position = jnp.arange(max_len, dtype=jnp.float32)[:, None]
    div_term = jnp.exp(jnp.arange(0, d_model, 2, dtype=jnp.float32)
                       * (-math.log(10000.0) / d_model))
    ang = position * div_term
    pe = jnp.zeros((max_len, d_model), jnp.float32)
    pe = pe.at[:, 0::2].set(jnp.sin(ang))
    pe = pe.at[:, 1::2].set(jnp.cos(ang))
    return pe


def init_params(key, input_size, output_length, d_model, nhead, num_layers,
                dim_feedforward, max_len=64):
    keys = iter(jax.random.split(key, 128))

    def w(shape, scale=0.05):
        return scale * jax.random.normal(next(keys), shape, jnp.float32)

    params = {
        "in_w": w((input_size, d_model)),
        "in_b": w((d_model,)),
        "pe": make_positional_encoding(max_len, d_model),
        "norm_g": jnp.ones((d_model,), jnp.float32),
        "norm_b": jnp.zeros((d_model,), jnp.float32),
        "fc_w": w((d_model, output_length)),
        "fc_b": w((output_length,)),
    }
    conv_blocks = []
    for _ in range(2):
        conv_blocks.append(dict(
            w=w((d_model, d_model, 3), scale=0.02),  # PyTorch Conv1d layout (Cout, Cin, k)
            b=w((d_model,)),
            gamma=jnp.ones((d_model,), jnp.float32),
            beta=jnp.zeros((d_model,), jnp.float32),
            rmean=jnp.zeros((d_model,), jnp.float32),
            rvar=jnp.ones((d_model,), jnp.float32),
        ))
    params["conv_blocks"] = conv_blocks

    layers = []
    for _ in range(num_layers):
        layers.append(dict(
            wq=w((d_model, d_model)), bq=w((d_model,)),
            wk=w((d_model, d_model)), bk=w((d_model,)),
            wv=w((d_model, d_model)), bv=w((d_model,)),
            wo=w((d_model, d_model)), bo=w((d_model,)),
            ln1_g=jnp.ones((d_model,), jnp.float32),
            ln1_b=jnp.zeros((d_model,), jnp.float32),
            w1=w((d_model, dim_feedforward)), b1=w((dim_feedforward,)),
            w2=w((dim_feedforward, d_model)), b2=w((d_model,)),
            ln2_g=jnp.ones((d_model,), jnp.float32),
            ln2_b=jnp.zeros((d_model,), jnp.float32),
        ))
    params["layers"] = layers
    return params


# -------------------------------- Main ---------------------------------------

if __name__ == "__main__":
    # small, TPU-friendly shapes consistent with the module's forward
    B, S = 2, 16
    input_size, output_length = 16, 8
    d_model, nhead, num_layers, dim_feedforward = 128, 4, 2, 256

    key = jax.random.PRNGKey(0)
    xkey, pkey = jax.random.split(key)
    x = jax.random.normal(xkey, (B, S, input_size), jnp.float32)
    params = init_params(pkey, input_size, output_length, d_model, nhead,
                         num_layers, dim_feedforward, max_len=64)
    packed = pack_params(params, nhead=nhead)   # one-time host-side fold/concat/pad/bf16

    # num_blocks=1 -> one grid step with all B samples stacked (best on v5e/v6e);
    # pass num_blocks=2 on v7x to shard the batch across its two TensorCores.
    fwd = jax.jit(partial(enhanced_transformer_forward,
                          output_length=output_length, num_blocks=1))
    out = fwd(x, packed)
    jax.block_until_ready(out)
    assert out.shape == (B, output_length) and out.dtype == jnp.float32
    print("KERNEL_OK")
</pallas_src>

<mosaic_0001>
module attributes {stable_mosaic.version = 11 : i64} {
  func.func @_fused_forward_kernel(%arg0: i32, %arg1: memref<2x16x16xf32, #tpu.memory_space<vmem>>, %arg2: memref<16x128xbf16, #tpu.memory_space<vmem>>, %arg3: memref<1x128xf32, #tpu.memory_space<vmem>>, %arg4: memref<16x128xf32, #tpu.memory_space<vmem>>, %arg5: memref<2x384x128xbf16, #tpu.memory_space<vmem>>, %arg6: memref<2x1x128xf32, #tpu.memory_space<vmem>>, %arg7: memref<2x128x384xbf16, #tpu.memory_space<vmem>>, %arg8: memref<2x1x384xf32, #tpu.memory_space<vmem>>, %arg9: memref<2x4x32x128xbf16, #tpu.memory_space<vmem>>, %arg10: memref<2x1x128xf32, #tpu.memory_space<vmem>>, %arg11: memref<2x1x128xf32, #tpu.memory_space<vmem>>, %arg12: memref<2x1x128xf32, #tpu.memory_space<vmem>>, %arg13: memref<2x128x256xbf16, #tpu.memory_space<vmem>>, %arg14: memref<2x1x256xf32, #tpu.memory_space<vmem>>, %arg15: memref<2x256x128xbf16, #tpu.memory_space<vmem>>, %arg16: memref<2x1x128xf32, #tpu.memory_space<vmem>>, %arg17: memref<2x1x128xf32, #tpu.memory_space<vmem>>, %arg18: memref<2x1x128xf32, #tpu.memory_space<vmem>>, %arg19: memref<1x128xf32, #tpu.memory_space<vmem>>, %arg20: memref<1x128xf32, #tpu.memory_space<vmem>>, %arg21: memref<128x128xbf16, #tpu.memory_space<vmem>>, %arg22: memref<1x128xf32, #tpu.memory_space<vmem>>, %arg23: memref<1x2x128xf32, #tpu.memory_space<vmem>>) attributes {dimension_semantics = [#tpu.dimension_semantics<parallel>], iteration_bounds = array<i64: 1>, scalar_prefetch = 0 : i64, scratch_operands = 0 : i64, tpu.core_type = #tpu.core_type<tc>, window_params = [{transform_indices = @transform_0, window_bounds = array<i64: 2, 16, 16>}, {pipeline_mode = #tpu.pipeline_mode<synchronous>, transform_indices = @transform_1, window_bounds = array<i64: 16, 128>}, {pipeline_mode = #tpu.pipeline_mode<synchronous>, transform_indices = @transform_2, window_bounds = array<i64: 1, 128>}, {pipeline_mode = #tpu.pipeline_mode<synchronous>, transform_indices = @transform_3, window_bounds = array<i64: 16, 128>}, {pipeline_mode = #tpu.pipeline_mode<synchronous>, transform_indices = @transform_4, window_bounds = array<i64: 2, 384, 128>}, {pipeline_mode = #tpu.pipeline_mode<synchronous>, transform_indices = @transform_5, window_bounds = array<i64: 2, 1, 128>}, {pipeline_mode = #tpu.pipeline_mode<synchronous>, transform_indices = @transform_6, window_bounds = array<i64: 2, 128, 384>}, {pipeline_mode = #tpu.pipeline_mode<synchronous>, transform_indices = @transform_7, window_bounds = array<i64: 2, 1, 384>}, {pipeline_mode = #tpu.pipeline_mode<synchronous>, transform_indices = @transform_8, window_bounds = array<i64: 2, 4, 32, 128>}, {pipeline_mode = #tpu.pipeline_mode<synchronous>, transform_indices = @transform_9, window_bounds = array<i64: 2, 1, 128>}, {pipeline_mode = #tpu.pipeline_mode<synchronous>, transform_indices = @transform_10, window_bounds = array<i64: 2, 1, 128>}, {pipeline_mode = #tpu.pipeline_mode<synchronous>, transform_indices = @transform_11, window_bounds = array<i64: 2, 1, 128>}, {pipeline_mode = #tpu.pipeline_mode<synchronous>, transform_indices = @transform_12, window_bounds = array<i64: 2, 128, 256>}, {pipeline_mode = #tpu.pipeline_mode<synchronous>, transform_indices = @transform_13, window_bounds = array<i64: 2, 1, 256>}, {pipeline_mode = #tpu.pipeline_mode<synchronous>, transform_indices = @transform_14, window_bounds = array<i64: 2, 256, 128>}, {pipeline_mode = #tpu.pipeline_mode<synchronous>, transform_indices = @transform_15, window_bounds = array<i64: 2, 1, 128>}, {pipeline_mode = #tpu.pipeline_mode<synchronous>, transform_indices = @transform_16, window_bounds = array<i64: 2, 1, 128>}, {pipeline_mode = #tpu.pipeline_mode<synchronous>, transform_indices = @transform_17, window_bounds = array<i64: 2, 1, 128>}, {pipeline_mode = #tpu.pipeline_mode<synchronous>, transform_indices = @transform_18, window_bounds = array<i64: 1, 128>}, {pipeline_mode = #tpu.pipeline_mode<synchronous>, transform_indices = @transform_19, window_bounds = array<i64: 1, 128>}, {pipeline_mode = #tpu.pipeline_mode<synchronous>, transform_indices = @transform_20, window_bounds = array<i64: 128, 128>}, {pipeline_mode = #tpu.pipeline_mode<synchronous>, transform_indices = @transform_21, window_bounds = array<i64: 1, 128>}, {transform_indices = @transform_22, window_bounds = array<i64: 1, 2, 128>}]} {
    %c0 = arith.constant 0 : index
    %c0_0 = arith.constant 0 : index
    %c0_1 = arith.constant 0 : index
    %0 = vector.load %arg1[%c0, %c0_0, %c0_1] : memref<2x16x16xf32, #tpu.memory_space<vmem>>, vector<2x16x16xf32>
    %1 = vector.shape_cast %0 : vector<2x16x16xf32> to vector<32x16xf32>
    %c0_2 = arith.constant 0 : index
    %c0_3 = arith.constant 0 : index
    %2 = vector.load %arg2[%c0_2, %c0_3] : memref<16x128xbf16, #tpu.memory_space<vmem>>, vector<16x128xbf16>
    %3 = arith.truncf %1 : vector<32x16xf32> to vector<32x16xbf16>
    %cst = arith.constant dense<0.000000e+00> : vector<32x128xf32>
    %4 = tpu.matmul %3, %2, %cst {dimension_numbers = #tpu.dot_dimension_numbers<[1], [0], [0], [1], [0, 0, 1, 1], [], []>} : vector<32x16xbf16>, vector<16x128xbf16>, vector<32x128xf32> -> vector<32x128xf32>
    %c0_4 = arith.constant 0 : index
    %c0_5 = arith.constant 0 : index
    %5 = vector.load %arg3[%c0_4, %c0_5] : memref<1x128xf32, #tpu.memory_space<vmem>>, vector<1x128xf32>
    %6 = vector.broadcast %5 : vector<1x128xf32> to vector<32x128xf32>
    %7 = arith.addf %4, %6 : vector<32x128xf32>
    %8 = vector.shape_cast %7 : vector<32x128xf32> to vector<2x16x128xf32>
    %c0_6 = arith.constant 0 : index
    %c0_7 = arith.constant 0 : index
    %9 = vector.load %arg4[%c0_6, %c0_7] : memref<16x128xf32, #tpu.memory_space<vmem>>, vector<16x128xf32>
    %10 = vector.shape_cast %9 : vector<16x128xf32> to vector<1x16x128xf32>
    %11 = vector.broadcast %10 : vector<1x16x128xf32> to vector<2x16x128xf32>
    %12 = arith.addf %8, %11 : vector<2x16x128xf32>
    %13 = vector.shape_cast %12 : vector<2x16x128xf32> to vector<32x128xf32>
    %14 = tpu.iota {dimensions = array<i32: 1>} : vector<2x16x1xi32>
    %15 = vector.shape_cast %14 : vector<2x16x1xi32> to vector<32x1xi32>
    %c1_i32 = arith.constant 1 : i32
    %16 = tpu.dynamic_rotate %13 by %c1_i32 dim 0 : vector<32x128xf32>, i32 -> vector<32x128xf32>
    %c-1_i32 = arith.constant -1 : i32
    %17 = vector.broadcast %c-1_i32 : i32 to vector<32x1xi32>
    %18 = arith.addi %15, %17 : vector<32x1xi32>
    %c0_i32 = arith.constant 0 : i32
    %19 = vector.broadcast %c0_i32 : i32 to vector<32x1xi32>
    %20 = arith.cmpi sge, %18, %19 : vector<32x1xi32>
    %c-1_i32_8 = arith.constant -1 : i32
    %21 = vector.broadcast %c-1_i32_8 : i32 to vector<32x1xi32>
    %22 = arith.addi %15, %21 : vector<32x1xi32>
    %c16_i32 = arith.constant 16 : i32
    %23 = vector.broadcast %c16_i32 : i32 to vector<32x1xi32>
    %24 = arith.cmpi slt, %22, %23 : vector<32x1xi32>
    %25 = arith.andi %20, %24 : vector<32x1xi1>
    %cst_9 = arith.constant 0.000000e+00 : f32
    %26 = vector.shape_cast %25 : vector<32x1xi1> to vector<32x1xi1>
    %27 = vector.broadcast %26 : vector<32x1xi1> to vector<32x128xi1>
    %28 = vector.broadcast %cst_9 : f32 to vector<32x128xf32>
    %29 = arith.select %27, %16, %28 : vector<32x128xi1>, vector<32x128xf32>
    %c31_i32 = arith.constant 31 : i32
    %30 = tpu.dynamic_rotate %13 by %c31_i32 dim 0 : vector<32x128xf32>, i32 -> vector<32x128xf32>
    %c1_i32_10 = arith.constant 1 : i32
    %31 = vector.broadcast %c1_i32_10 : i32 to vector<32x1xi32>
    %32 = arith.addi %15, %31 : vector<32x1xi32>
    %c0_i32_11 = arith.constant 0 : i32
    %33 = vector.broadcast %c0_i32_11 : i32 to vector<32x1xi32>
    %34 = arith.cmpi sge, %32, %33 : vector<32x1xi32>
    %c1_i32_12 = arith.constant 1 : i32
    %35 = vector.broadcast %c1_i32_12 : i32 to vector<32x1xi32>
    %36 = arith.addi %15, %35 : vector<32x1xi32>
    %c16_i32_13 = arith.constant 16 : i32
    %37 = vector.broadcast %c16_i32_13 : i32 to vector<32x1xi32>
    %38 = arith.cmpi slt, %36, %37 : vector<32x1xi32>
    %39 = arith.andi %34, %38 : vector<32x1xi1>
    %cst_14 = arith.constant 0.000000e+00 : f32
    %40 = vector.shape_cast %39 : vector<32x1xi1> to vector<32x1xi1>
    %41 = vector.broadcast %40 : vector<32x1xi1> to vector<32x128xi1>
    %42 = vector.broadcast %cst_14 : f32 to vector<32x128xf32>
    %43 = arith.select %41, %30, %42 : vector<32x128xi1>, vector<32x128xf32>
    %44 = tpu.concatenate %29, %13, %43 in 1 : vector<32x128xf32>, vector<32x128xf32>, vector<32x128xf32> -> vector<32x384xf32>
    %c0_15 = arith.constant 0 : index
    %c0_16 = arith.constant 0 : index
    %c0_17 = arith.constant 0 : index
    %45 = vector.load %arg5[%c0_15, %c0_16, %c0_17] : memref<2x384x128xbf16, #tpu.memory_space<vmem>>, vector<1x384x128xbf16>
    %46 = vector.shape_cast %45 : vector<1x384x128xbf16> to vector<384x128xbf16>
    %47 = arith.truncf %44 : vector<32x384xf32> to vector<32x384xbf16>
    %cst_18 = arith.constant dense<0.000000e+00> : vector<32x128xf32>
    %48 = tpu.matmul %47, %46, %cst_18 {dimension_numbers = #tpu.dot_dimension_numbers<[1], [0], [0], [1], [0, 0, 1, 1], [], []>} : vector<32x384xbf16>, vector<384x128xbf16>, vector<32x128xf32> -> vector<32x128xf32>
    %c0_19 = arith.constant 0 : index
    %c0_20 = arith.constant 0 : index
    %c0_21 = arith.constant 0 : index
    %49 = vector.load %arg6[%c0_19, %c0_20, %c0_21] : memref<2x1x128xf32, #tpu.memory_space<vmem>>, vector<1x1x128xf32>
    %50 = vector.shape_cast %49 : vector<1x1x128xf32> to vector<1x128xf32>
    %51 = vector.broadcast %50 : vector<1x128xf32> to vector<32x128xf32>
    %52 = arith.addf %48, %51 : vector<32x128xf32>
    %cst_22 = arith.constant 0.000000e+00 : f32
    %53 = vector.broadcast %cst_22 : f32 to vector<32x128xf32>
    %54 = arith.maximumf %52, %53 : vector<32x128xf32>
    %c2_i32 = arith.constant 2 : i32
    %55 = tpu.dynamic_rotate %54 by %c2_i32 dim 0 : vector<32x128xf32>, i32 -> vector<32x128xf32>
    %c-2_i32 = arith.constant -2 : i32
    %56 = vector.broadcast %c-2_i32 : i32 to vector<32x1xi32>
    %57 = arith.addi %15, %56 : vector<32x1xi32>
    %c0_i32_23 = arith.constant 0 : i32
    %58 = vector.broadcast %c0_i32_23 : i32 to vector<32x1xi32>
    %59 = arith.cmpi sge, %57, %58 : vector<32x1xi32>
    %c-2_i32_24 = arith.constant -2 : i32
    %60 = vector.broadcast %c-2_i32_24 : i32 to vector<32x1xi32>
    %61 = arith.addi %15, %60 : vector<32x1xi32>
    %c16_i32_25 = arith.constant 16 : i32
    %62 = vector.broadcast %c16_i32_25 : i32 to vector<32x1xi32>
    %63 = arith.cmpi slt, %61, %62 : vector<32x1xi32>
    %64 = arith.andi %59, %63 : vector<32x1xi1>
    %cst_26 = arith.constant 0.000000e+00 : f32
    %65 = vector.shape_cast %64 : vector<32x1xi1> to vector<32x1xi1>
    %66 = vector.broadcast %65 : vector<32x1xi1> to vector<32x128xi1>
    %67 = vector.broadcast %cst_26 : f32 to vector<32x128xf32>
    %68 = arith.select %66, %55, %67 : vector<32x128xi1>, vector<32x128xf32>
    %c30_i32 = arith.constant 30 : i32
    %69 = tpu.dynamic_rotate %54 by %c30_i32 dim 0 : vector<32x128xf32>, i32 -> vector<32x128xf32>
    %c2_i32_27 = arith.constant 2 : i32
    %70 = vector.broadcast %c2_i32_27 : i32 to vector<32x1xi32>
    %71 = arith.addi %15, %70 : vector<32x1xi32>
    %c0_i32_28 = arith.constant 0 : i32
    %72 = vector.broadcast %c0_i32_28 : i32 to vector<32x1xi32>
    %73 = arith.cmpi sge, %71, %72 : vector<32x1xi32>
    %c2_i32_29 = arith.constant 2 : i32
    %74 = vector.broadcast %c2_i32_29 : i32 to vector<32x1xi32>
    %75 = arith.addi %15, %74 : vector<32x1xi32>
    %c16_i32_30 = arith.constant 16 : i32
    %76 = vector.broadcast %c16_i32_30 : i32 to vector<32x1xi32>
    %77 = arith.cmpi slt, %75, %76 : vector<32x1xi32>
    %78 = arith.andi %73, %77 : vector<32x1xi1>
    %cst_31 = arith.constant 0.000000e+00 : f32
    %79 = vector.shape_cast %78 : vector<32x1xi1> to vector<32x1xi1>
    %80 = vector.broadcast %79 : vector<32x1xi1> to vector<32x128xi1>
    %81 = vector.broadcast %cst_31 : f32 to vector<32x128xf32>
    %82 = arith.select %80, %69, %81 : vector<32x128xi1>, vector<32x128xf32>
    %83 = tpu.concatenate %68, %54, %82 in 1 : vector<32x128xf32>, vector<32x128xf32>, vector<32x128xf32> -> vector<32x384xf32>
    %c1 = arith.constant 1 : index
    %c0_32 = arith.constant 0 : index
    %c0_33 = arith.constant 0 : index
    %84 = vector.load %arg5[%c1, %c0_32, %c0_33] : memref<2x384x128xbf16, #tpu.memory_space<vmem>>, vector<1x384x128xbf16>
    %85 = vector.shape_cast %84 : vector<1x384x128xbf16> to vector<384x128xbf16>
    %86 = arith.truncf %83 : vector<32x384xf32> to vector<32x384xbf16>
    %cst_34 = arith.constant dense<0.000000e+00> : vector<32x128xf32>
    %87 = tpu.matmul %86, %85, %cst_34 {dimension_numbers = #tpu.dot_dimension_numbers<[1], [0], [0], [1], [0, 0, 1, 1], [], []>} : vector<32x384xbf16>, vector<384x128xbf16>, vector<32x128xf32> -> vector<32x128xf32>
    %c1_35 = arith.constant 1 : index
    %c0_36 = arith.constant 0 : index
    %c0_37 = arith.constant 0 : index
    %88 = vector.load %arg6[%c1_35, %c0_36, %c0_37] : memref<2x1x128xf32, #tpu.memory_space<vmem>>, vector<1x1x128xf32>
    %89 = vector.shape_cast %88 : vector<1x1x128xf32> to vector<1x128xf32>
    %90 = vector.broadcast %89 : vector<1x128xf32> to vector<32x128xf32>
    %91 = arith.addf %87, %90 : vector<32x128xf32>
    %cst_38 = arith.constant 0.000000e+00 : f32
    %92 = vector.broadcast %cst_38 : f32 to vector<32x128xf32>
    %93 = arith.maximumf %91, %92 : vector<32x128xf32>
    %c0_39 = arith.constant 0 : index
    %c0_40 = arith.constant 0 : index
    %c0_41 = arith.constant 0 : index
    %94 = vector.load %arg7[%c0_39, %c0_40, %c0_41] : memref<2x128x384xbf16, #tpu.memory_space<vmem>>, vector<1x128x384xbf16>
    %95 = vector.shape_cast %94 : vector<1x128x384xbf16> to vector<128x384xbf16>
    %96 = arith.truncf %93 : vector<32x128xf32> to vector<32x128xbf16>
    %cst_42 = arith.constant dense<0.000000e+00> : vector<32x384xf32>
    %97 = tpu.matmul %96, %95, %cst_42 {dimension_numbers = #tpu.dot_dimension_numbers<[1], [0], [0], [1], [0, 0, 1, 1], [], []>} : vector<32x128xbf16>, vector<128x384xbf16>, vector<32x384xf32> -> vector<32x384xf32>
    %c0_43 = arith.constant 0 : index
    %c0_44 = arith.constant 0 : index
    %c0_45 = arith.constant 0 : index
    %98 = vector.load %arg8[%c0_43, %c0_44, %c0_45] : memref<2x1x384xf32, #tpu.memory_space<vmem>>, vector<1x1x384xf32>
    %99 = vector.shape_cast %98 : vector<1x1x384xf32> to vector<1x384xf32>
    %100 = vector.broadcast %99 : vector<1x384xf32> to vector<32x384xf32>
    %101 = arith.addf %97, %100 : vector<32x384xf32>
    %c0_46 = arith.constant 0 : index
    %c0_47 = arith.constant 0 : index
    %c0_48 = arith.constant 0 : index
    %c0_49 = arith.constant 0 : index
    %102 = vector.load %arg9[%c0_46, %c0_47, %c0_48, %c0_49] : memref<2x4x32x128xbf16, #tpu.memory_space<vmem>>, vector<1x4x32x128xbf16>
    %103 = vector.shape_cast %102 : vector<1x4x32x128xbf16> to vector<4x32x128xbf16>
    %104 = vector.extract_strided_slice %101 {offsets = [0, 0], sizes = [32, 32], strides = [1, 1]} : vector<32x384xf32> to vector<32x32xf32>
    %105 = vector.shape_cast %104 : vector<32x32xf32> to vector<2x16x32xf32>
    %106 = arith.truncf %105 : vector<2x16x32xf32> to vector<2x16x32xbf16>
    %107 = vector.extract_strided_slice %101 {offsets = [0, 128], sizes = [32, 32], strides = [1, 1]} : vector<32x384xf32> to vector<32x32xf32>
    %108 = vector.shape_cast %107 : vector<32x32xf32> to vector<2x16x32xf32>
    %109 = arith.truncf %108 : vector<2x16x32xf32> to vector<2x16x32xbf16>
    %110 = vector.extract_strided_slice %101 {offsets = [0, 256], sizes = [32, 32], strides = [1, 1]} : vector<32x384xf32> to vector<32x32xf32>
    %111 = vector.shape_cast %110 : vector<32x32xf32> to vector<2x16x32xf32>
    %112 = arith.truncf %111 : vector<2x16x32xf32> to vector<2x16x32xbf16>
    %cst_50 = arith.constant dense<0.000000e+00> : vector<2x16x16xf32>
    %113 = tpu.matmul %106, %109, %cst_50 {dimension_numbers = #tpu.dot_dimension_numbers<[2], [2], [1], [1], [0, 0, 0, 1, 1, 1], [0], [0]>} : vector<2x16x32xbf16>, vector<2x16x32xbf16>, vector<2x16x16xf32> -> vector<2x16x16xf32>
    %cst_51 = arith.constant 0.176776692 : f32
    %114 = vector.broadcast %cst_51 : f32 to vector<2x16x16xf32>
    %115 = arith.mulf %113, %114 : vector<2x16x16xf32>
    %cst_52 = arith.constant dense<0xFF800000> : vector<2x16xf32>
    %116 = vector.multi_reduction <maximumf>, %115, %cst_52 [2] : vector<2x16x16xf32> to vector<2x16xf32>
    %117 = vector.shape_cast %116 : vector<2x16xf32> to vector<2x16x1xf32>
    %118 = vector.broadcast %117 : vector<2x16x1xf32> to vector<2x16x16xf32>
    %119 = arith.subf %115, %118 : vector<2x16x16xf32>
    %120 = math.exp %119 : vector<2x16x16xf32>
    %cst_53 = arith.constant dense<0.000000e+00> : vector<2x16xf32>
    %121 = vector.multi_reduction <add>, %120, %cst_53 [2] : vector<2x16x16xf32> to vector<2x16xf32>
    %122 = vector.shape_cast %121 : vector<2x16xf32> to vector<2x16x1xf32>
    %123 = tpu.reciprocal %122 {approx = true} : vector<2x16x1xf32> -> vector<2x16x1xf32>
    %124 = vector.broadcast %123 : vector<2x16x1xf32> to vector<2x16x16xf32>
    %125 = arith.mulf %120, %124 : vector<2x16x16xf32>
    %126 = arith.truncf %125 : vector<2x16x16xf32> to vector<2x16x16xbf16>
    %cst_54 = arith.constant dense<0.000000e+00> : vector<2x16x32xf32>
    %127 = tpu.matmul %126, %112, %cst_54 {dimension_numbers = #tpu.dot_dimension_numbers<[2], [1], [1], [2], [0, 0, 0, 1, 1, 2], [0], [0]>} : vector<2x16x16xbf16>, vector<2x16x32xbf16>, vector<2x16x32xf32> -> vector<2x16x32xf32>
    %128 = vector.shape_cast %127 : vector<2x16x32xf32> to vector<32x32xf32>
    %129 = vector.extract_strided_slice %103 {offsets = [0, 0, 0], sizes = [1, 32, 128], strides = [1, 1, 1]} : vector<4x32x128xbf16> to vector<1x32x128xbf16>
    %130 = vector.shape_cast %129 : vector<1x32x128xbf16> to vector<32x128xbf16>
    %131 = arith.truncf %128 : vector<32x32xf32> to vector<32x32xbf16>
    %cst_55 = arith.constant dense<0.000000e+00> : vector<32x128xf32>
    %132 = tpu.matmul %131, %130, %cst_55 {dimension_numbers = #tpu.dot_dimension_numbers<[1], [0], [0], [1], [0, 0, 1, 1], [], []>} : vector<32x32xbf16>, vector<32x128xbf16>, vector<32x128xf32> -> vector<32x128xf32>
    %133 = vector.extract_strided_slice %101 {offsets = [0, 32], sizes = [32, 32], strides = [1, 1]} : vector<32x384xf32> to vector<32x32xf32>
    %134 = vector.shape_cast %133 : vector<32x32xf32> to vector<2x16x32xf32>
    %135 = arith.truncf %134 : vector<2x16x32xf32> to vector<2x16x32xbf16>
    %136 = vector.extract_strided_slice %101 {offsets = [0, 160], sizes = [32, 32], strides = [1, 1]} : vector<32x384xf32> to vector<32x32xf32>
    %137 = vector.shape_cast %136 : vector<32x32xf32> to vector<2x16x32xf32>
    %138 = arith.truncf %137 : vector<2x16x32xf32> to vector<2x16x32xbf16>
    %139 = vector.extract_strided_slice %101 {offsets = [0, 288], sizes = [32, 32], strides = [1, 1]} : vector<32x384xf32> to vector<32x32xf32>
    %140 = vector.shape_cast %139 : vector<32x32xf32> to vector<2x16x32xf32>
    %141 = arith.truncf %140 : vector<2x16x32xf32> to vector<2x16x32xbf16>
    %cst_56 = arith.constant dense<0.000000e+00> : vector<2x16x16xf32>
    %142 = tpu.matmul %135, %138, %cst_56 {dimension_numbers = #tpu.dot_dimension_numbers<[2], [2], [1], [1], [0, 0, 0, 1, 1, 1], [0], [0]>} : vector<2x16x32xbf16>, vector<2x16x32xbf16>, vector<2x16x16xf32> -> vector<2x16x16xf32>
    %cst_57 = arith.constant 0.176776692 : f32
    %143 = vector.broadcast %cst_57 : f32 to vector<2x16x16xf32>
    %144 = arith.mulf %142, %143 : vector<2x16x16xf32>
    %cst_58 = arith.constant dense<0xFF800000> : vector<2x16xf32>
    %145 = vector.multi_reduction <maximumf>, %144, %cst_58 [2] : vector<2x16x16xf32> to vector<2x16xf32>
    %146 = vector.shape_cast %145 : vector<2x16xf32> to vector<2x16x1xf32>
    %147 = vector.broadcast %146 : vector<2x16x1xf32> to vector<2x16x16xf32>
    %148 = arith.subf %144, %147 : vector<2x16x16xf32>
    %149 = math.exp %148 : vector<2x16x16xf32>
    %cst_59 = arith.constant dense<0.000000e+00> : vector<2x16xf32>
    %150 = vector.multi_reduction <add>, %149, %cst_59 [2] : vector<2x16x16xf32> to vector<2x16xf32>
    %151 = vector.shape_cast %150 : vector<2x16xf32> to vector<2x16x1xf32>
    %152 = tpu.reciprocal %151 {approx = true} : vector<2x16x1xf32> -> vector<2x16x1xf32>
    %153 = vector.broadcast %152 : vector<2x16x1xf32> to vector<2x16x16xf32>
    %154 = arith.mulf %149, %153 : vector<2x16x16xf32>
    %155 = arith.truncf %154 : vector<2x16x16xf32> to vector<2x16x16xbf16>
    %cst_60 = arith.constant dense<0.000000e+00> : vector<2x16x32xf32>
    %156 = tpu.matmul %155, %141, %cst_60 {dimension_numbers = #tpu.dot_dimension_numbers<[2], [1], [1], [2], [0, 0, 0, 1, 1, 2], [0], [0]>} : vector<2x16x16xbf16>, vector<2x16x32xbf16>, vector<2x16x32xf32> -> vector<2x16x32xf32>
    %157 = vector.shape_cast %156 : vector<2x16x32xf32> to vector<32x32xf32>
    %158 = vector.extract_strided_slice %103 {offsets = [1, 0, 0], sizes = [1, 32, 128], strides = [1, 1, 1]} : vector<4x32x128xbf16> to vector<1x32x128xbf16>
    %159 = vector.shape_cast %158 : vector<1x32x128xbf16> to vector<32x128xbf16>
    %160 = arith.truncf %157 : vector<32x32xf32> to vector<32x32xbf16>
    %cst_61 = arith.constant dense<0.000000e+00> : vector<32x128xf32>
    %161 = tpu.matmul %160, %159, %cst_61 {dimension_numbers = #tpu.dot_dimension_numbers<[1], [0], [0], [1], [0, 0, 1, 1], [], []>} : vector<32x32xbf16>, vector<32x128xbf16>, vector<32x128xf32> -> vector<32x128xf32>
    %162 = arith.addf %132, %161 : vector<32x128xf32>
    %163 = vector.extract_strided_slice %101 {offsets = [0, 64], sizes = [32, 32], strides = [1, 1]} : vector<32x384xf32> to vector<32x32xf32>
    %164 = vector.shape_cast %163 : vector<32x32xf32> to vector<2x16x32xf32>
    %165 = arith.truncf %164 : vector<2x16x32xf32> to vector<2x16x32xbf16>
    %166 = vector.extract_strided_slice %101 {offsets = [0, 192], sizes = [32, 32], strides = [1, 1]} : vector<32x384xf32> to vector<32x32xf32>
    %167 = vector.shape_cast %166 : vector<32x32xf32> to vector<2x16x32xf32>
    %168 = arith.truncf %167 : vector<2x16x32xf32> to vector<2x16x32xbf16>
    %169 = vector.extract_strided_slice %101 {offsets = [0, 320], sizes = [32, 32], strides = [1, 1]} : vector<32x384xf32> to vector<32x32xf32>
    %170 = vector.shape_cast %169 : vector<32x32xf32> to vector<2x16x32xf32>
    %171 = arith.truncf %170 : vector<2x16x32xf32> to vector<2x16x32xbf16>
    %cst_62 = arith.constant dense<0.000000e+00> : vector<2x16x16xf32>
    %172 = tpu.matmul %165, %168, %cst_62 {dimension_numbers = #tpu.dot_dimension_numbers<[2], [2], [1], [1], [0, 0, 0, 1, 1, 1], [0], [0]>} : vector<2x16x32xbf16>, vector<2x16x32xbf16>, vector<2x16x16xf32> -> vector<2x16x16xf32>
    %cst_63 = arith.constant 0.176776692 : f32
    %173 = vector.broadcast %cst_63 : f32 to vector<2x16x16xf32>
    %174 = arith.mulf %172, %173 : vector<2x16x16xf32>
    %cst_64 = arith.constant dense<0xFF800000> : vector<2x16xf32>
    %175 = vector.multi_reduction <maximumf>, %174, %cst_64 [2] : vector<2x16x16xf32> to vector<2x16xf32>
    %176 = vector.shape_cast %175 : vector<2x16xf32> to vector<2x16x1xf32>
    %177 = vector.broadcast %176 : vector<2x16x1xf32> to vector<2x16x16xf32>
    %178 = arith.subf %174, %177 : vector<2x16x16xf32>
    %179 = math.exp %178 : vector<2x16x16xf32>
    %cst_65 = arith.constant dense<0.000000e+00> : vector<2x16xf32>
    %180 = vector.multi_reduction <add>, %179, %cst_65 [2] : vector<2x16x16xf32> to vector<2x16xf32>
    %181 = vector.shape_cast %180 : vector<2x16xf32> to vector<2x16x1xf32>
    %182 = tpu.reciprocal %181 {approx = true} : vector<2x16x1xf32> -> vector<2x16x1xf32>
    %183 = vector.broadcast %182 : vector<2x16x1xf32> to vector<2x16x16xf32>
    %184 = arith.mulf %179, %183 : vector<2x16x16xf32>
    %185 = arith.truncf %184 : vector<2x16x16xf32> to vector<2x16x16xbf16>
    %cst_66 = arith.constant dense<0.000000e+00> : vector<2x16x32xf32>
    %186 = tpu.matmul %185, %171, %cst_66 {dimension_numbers = #tpu.dot_dimension_numbers<[2], [1], [1], [2], [0, 0, 0, 1, 1, 2], [0], [0]>} : vector<2x16x16xbf16>, vector<2x16x32xbf16>, vector<2x16x32xf32> -> vector<2x16x32xf32>
    %187 = vector.shape_cast %186 : vector<2x16x32xf32> to vector<32x32xf32>
    %188 = vector.extract_strided_slice %103 {offsets = [2, 0, 0], sizes = [1, 32, 128], strides = [1, 1, 1]} : vector<4x32x128xbf16> to vector<1x32x128xbf16>
    %189 = vector.shape_cast %188 : vector<1x32x128xbf16> to vector<32x128xbf16>
    %190 = arith.truncf %187 : vector<32x32xf32> to vector<32x32xbf16>
    %cst_67 = arith.constant dense<0.000000e+00> : vector<32x128xf32>
    %191 = tpu.matmul %190, %189, %cst_67 {dimension_numbers = #tpu.dot_dimension_numbers<[1], [0], [0], [1], [0, 0, 1, 1], [], []>} : vector<32x32xbf16>, vector<32x128xbf16>, vector<32x128xf32> -> vector<32x128xf32>
    %192 = arith.addf %162, %191 : vector<32x128xf32>
    %193 = vector.extract_strided_slice %101 {offsets = [0, 96], sizes = [32, 32], strides = [1, 1]} : vector<32x384xf32> to vector<32x32xf32>
    %194 = vector.shape_cast %193 : vector<32x32xf32> to vector<2x16x32xf32>
    %195 = arith.truncf %194 : vector<2x16x32xf32> to vector<2x16x32xbf16>
    %196 = vector.extract_strided_slice %101 {offsets = [0, 224], sizes = [32, 32], strides = [1, 1]} : vector<32x384xf32> to vector<32x32xf32>
    %197 = vector.shape_cast %196 : vector<32x32xf32> to vector<2x16x32xf32>
    %198 = arith.truncf %197 : vector<2x16x32xf32> to vector<2x16x32xbf16>
    %199 = vector.extract_strided_slice %101 {offsets = [0, 352], sizes = [32, 32], strides = [1, 1]} : vector<32x384xf32> to vector<32x32xf32>
    %200 = vector.shape_cast %199 : vector<32x32xf32> to vector<2x16x32xf32>
    %201 = arith.truncf %200 : vector<2x16x32xf32> to vector<2x16x32xbf16>
    %cst_68 = arith.constant dense<0.000000e+00> : vector<2x16x16xf32>
    %202 = tpu.matmul %195, %198, %cst_68 {dimension_numbers = #tpu.dot_dimension_numbers<[2], [2], [1], [1], [0, 0, 0, 1, 1, 1], [0], [0]>} : vector<2x16x32xbf16>, vector<2x16x32xbf16>, vector<2x16x16xf32> -> vector<2x16x16xf32>
    %cst_69 = arith.constant 0.176776692 : f32
    %203 = vector.broadcast %cst_69 : f32 to vector<2x16x16xf32>
    %204 = arith.mulf %202, %203 : vector<2x16x16xf32>
    %cst_70 = arith.constant dense<0xFF800000> : vector<2x16xf32>
    %205 = vector.multi_reduction <maximumf>, %204, %cst_70 [2] : vector<2x16x16xf32> to vector<2x16xf32>
    %206 = vector.shape_cast %205 : vector<2x16xf32> to vector<2x16x1xf32>
    %207 = vector.broadcast %206 : vector<2x16x1xf32> to vector<2x16x16xf32>
    %208 = arith.subf %204, %207 : vector<2x16x16xf32>
    %209 = math.exp %208 : vector<2x16x16xf32>
    %cst_71 = arith.constant dense<0.000000e+00> : vector<2x16xf32>
    %210 = vector.multi_reduction <add>, %209, %cst_71 [2] : vector<2x16x16xf32> to vector<2x16xf32>
    %211 = vector.shape_cast %210 : vector<2x16xf32> to vector<2x16x1xf32>
    %212 = tpu.reciprocal %211 {approx = true} : vector<2x16x1xf32> -> vector<2x16x1xf32>
    %213 = vector.broadcast %212 : vector<2x16x1xf32> to vector<2x16x16xf32>
    %214 = arith.mulf %209, %213 : vector<2x16x16xf32>
    %215 = arith.truncf %214 : vector<2x16x16xf32> to vector<2x16x16xbf16>
    %cst_72 = arith.constant dense<0.000000e+00> : vector<2x16x32xf32>
    %216 = tpu.matmul %215, %201, %cst_72 {dimension_numbers = #tpu.dot_dimension_numbers<[2], [1], [1], [2], [0, 0, 0, 1, 1, 2], [0], [0]>} : vector<2x16x16xbf16>, vector<2x16x32xbf16>, vector<2x16x32xf32> -> vector<2x16x32xf32>
    %217 = vector.shape_cast %216 : vector<2x16x32xf32> to vector<32x32xf32>
    %218 = vector.extract_strided_slice %103 {offsets = [3, 0, 0], sizes = [1, 32, 128], strides = [1, 1, 1]} : vector<4x32x128xbf16> to vector<1x32x128xbf16>
    %219 = vector.shape_cast %218 : vector<1x32x128xbf16> to vector<32x128xbf16>
    %220 = arith.truncf %217 : vector<32x32xf32> to vector<32x32xbf16>
    %cst_73 = arith.constant dense<0.000000e+00> : vector<32x128xf32>
    %221 = tpu.matmul %220, %219, %cst_73 {dimension_numbers = #tpu.dot_dimension_numbers<[1], [0], [0], [1], [0, 0, 1, 1], [], []>} : vector<32x32xbf16>, vector<32x128xbf16>, vector<32x128xf32> -> vector<32x128xf32>
    %222 = arith.addf %192, %221 : vector<32x128xf32>
    %c0_74 = arith.constant 0 : index
    %c0_75 = arith.constant 0 : index
    %c0_76 = arith.constant 0 : index
    %223 = vector.load %arg10[%c0_74, %c0_75, %c0_76] : memref<2x1x128xf32, #tpu.memory_space<vmem>>, vector<1x1x128xf32>
    %224 = vector.shape_cast %223 : vector<1x1x128xf32> to vector<1x128xf32>
    %225 = vector.broadcast %224 : vector<1x128xf32> to vector<32x128xf32>
    %226 = arith.addf %222, %225 : vector<32x128xf32>
    %227 = arith.addf %93, %226 : vector<32x128xf32>
    %c0_77 = arith.constant 0 : index
    %c0_78 = arith.constant 0 : index
    %c0_79 = arith.constant 0 : index
    %228 = vector.load %arg11[%c0_77, %c0_78, %c0_79] : memref<2x1x128xf32, #tpu.memory_space<vmem>>, vector<1x1x128xf32>
    %229 = vector.shape_cast %228 : vector<1x1x128xf32> to vector<1x128xf32>
    %c0_80 = arith.constant 0 : index
    %c0_81 = arith.constant 0 : index
    %c0_82 = arith.constant 0 : index
    %230 = vector.load %arg12[%c0_80, %c0_81, %c0_82] : memref<2x1x128xf32, #tpu.memory_space<vmem>>, vector<1x1x128xf32>
    %231 = vector.shape_cast %230 : vector<1x1x128xf32> to vector<1x128xf32>
    %cst_83 = arith.constant dense<0.000000e+00> : vector<32xf32>
    %232 = vector.multi_reduction <add>, %227, %cst_83 [1] : vector<32x128xf32> to vector<32xf32>
    %233 = vector.shape_cast %232 : vector<32xf32> to vector<32x1xf32>
    %cst_84 = arith.constant 1.280000e+02 : f32
    %234 = vector.broadcast %cst_84 : f32 to vector<32x1xf32>
    %235 = arith.divf %233, %234 : vector<32x1xf32>
    %236 = vector.broadcast %235 : vector<32x1xf32> to vector<32x128xf32>
    %237 = arith.subf %227, %236 : vector<32x128xf32>
    %238 = arith.mulf %237, %237 : vector<32x128xf32>
    %cst_85 = arith.constant dense<0.000000e+00> : vector<32xf32>
    %239 = vector.multi_reduction <add>, %238, %cst_85 [1] : vector<32x128xf32> to vector<32xf32>
    %240 = vector.shape_cast %239 : vector<32xf32> to vector<32x1xf32>
    %cst_86 = arith.constant 1.280000e+02 : f32
    %241 = vector.broadcast %cst_86 : f32 to vector<32x1xf32>
    %242 = arith.divf %240, %241 : vector<32x1xf32>
    %cst_87 = arith.constant 9.99999974E-6 : f32
    %243 = vector.broadcast %cst_87 : f32 to vector<32x1xf32>
    %244 = arith.addf %242, %243 : vector<32x1xf32>
    %245 = math.rsqrt %244 : vector<32x1xf32>
    %246 = vector.broadcast %245 : vector<32x1xf32> to vector<32x128xf32>
    %247 = arith.mulf %237, %246 : vector<32x128xf32>
    %248 = vector.broadcast %229 : vector<1x128xf32> to vector<32x128xf32>
    %249 = arith.mulf %247, %248 : vector<32x128xf32>
    %250 = vector.broadcast %231 : vector<1x128xf32> to vector<32x128xf32>
    %251 = arith.addf %249, %250 : vector<32x128xf32>
    %c0_88 = arith.constant 0 : index
    %c0_89 = arith.constant 0 : index
    %c0_90 = arith.constant 0 : index
    %252 = vector.load %arg13[%c0_88, %c0_89, %c0_90] : memref<2x128x256xbf16, #tpu.memory_space<vmem>>, vector<1x128x256xbf16>
    %253 = vector.shape_cast %252 : vector<1x128x256xbf16> to vector<128x256xbf16>
    %254 = arith.truncf %251 : vector<32x128xf32> to vector<32x128xbf16>
    %cst_91 = arith.constant dense<0.000000e+00> : vector<32x256xf32>
    %255 = tpu.matmul %254, %253, %cst_91 {dimension_numbers = #tpu.dot_dimension_numbers<[1], [0], [0], [1], [0, 0, 1, 1], [], []>} : vector<32x128xbf16>, vector<128x256xbf16>, vector<32x256xf32> -> vector<32x256xf32>
    %c0_92 = arith.constant 0 : index
    %c0_93 = arith.constant 0 : index
    %c0_94 = arith.constant 0 : index
    %256 = vector.load %arg14[%c0_92, %c0_93, %c0_94] : memref<2x1x256xf32, #tpu.memory_space<vmem>>, vector<1x1x256xf32>
    %257 = vector.shape_cast %256 : vector<1x1x256xf32> to vector<1x256xf32>
    %258 = vector.broadcast %257 : vector<1x256xf32> to vector<32x256xf32>
    %259 = arith.addf %255, %258 : vector<32x256xf32>
    %cst_95 = arith.constant 0.000000e+00 : f32
    %260 = vector.broadcast %cst_95 : f32 to vector<32x256xf32>
    %261 = arith.maximumf %259, %260 : vector<32x256xf32>
    %c0_96 = arith.constant 0 : index
    %c0_97 = arith.constant 0 : index
    %c0_98 = arith.constant 0 : index
    %262 = vector.load %arg15[%c0_96, %c0_97, %c0_98] : memref<2x256x128xbf16, #tpu.memory_space<vmem>>, vector<1x256x128xbf16>
    %263 = vector.shape_cast %262 : vector<1x256x128xbf16> to vector<256x128xbf16>
    %264 = arith.truncf %261 : vector<32x256xf32> to vector<32x256xbf16>
    %cst_99 = arith.constant dense<0.000000e+00> : vector<32x128xf32>
    %265 = tpu.matmul %264, %263, %cst_99 {dimension_numbers = #tpu.dot_dimension_numbers<[1], [0], [0], [1], [0, 0, 1, 1], [], []>} : vector<32x256xbf16>, vector<256x128xbf16>, vector<32x128xf32> -> vector<32x128xf32>
    %c0_100 = arith.constant 0 : index
    %c0_101 = arith.constant 0 : index
    %c0_102 = arith.constant 0 : index
    %266 = vector.load %arg16[%c0_100, %c0_101, %c0_102] : memref<2x1x128xf32, #tpu.memory_space<vmem>>, vector<1x1x128xf32>
    %267 = vector.shape_cast %266 : vector<1x1x128xf32> to vector<1x128xf32>
    %268 = vector.broadcast %267 : vector<1x128xf32> to vector<32x128xf32>
    %269 = arith.addf %265, %268 : vector<32x128xf32>
    %270 = arith.addf %251, %269 : vector<32x128xf32>
    %c0_103 = arith.constant 0 : index
    %c0_104 = arith.constant 0 : index
    %c0_105 = arith.constant 0 : index
    %271 = vector.load %arg17[%c0_103, %c0_104, %c0_105] : memref<2x1x128xf32, #tpu.memory_space<vmem>>, vector<1x1x128xf32>
    %272 = vector.shape_cast %271 : vector<1x1x128xf32> to vector<1x128xf32>
    %c0_106 = arith.constant 0 : index
    %c0_107 = arith.constant 0 : index
    %c0_108 = arith.constant 0 : index
    %273 = vector.load %arg18[%c0_106, %c0_107, %c0_108] : memref<2x1x128xf32, #tpu.memory_space<vmem>>, vector<1x1x128xf32>
    %274 = vector.shape_cast %273 : vector<1x1x128xf32> to vector<1x128xf32>
    %cst_109 = arith.constant dense<0.000000e+00> : vector<32xf32>
    %275 = vector.multi_reduction <add>, %270, %cst_109 [1] : vector<32x128xf32> to vector<32xf32>
    %276 = vector.shape_cast %275 : vector<32xf32> to vector<32x1xf32>
    %cst_110 = arith.constant 1.280000e+02 : f32
    %277 = vector.broadcast %cst_110 : f32 to vector<32x1xf32>
    %278 = arith.divf %276, %277 : vector<32x1xf32>
    %279 = vector.broadcast %278 : vector<32x1xf32> to vector<32x128xf32>
    %280 = arith.subf %270, %279 : vector<32x128xf32>
    %281 = arith.mulf %280, %280 : vector<32x128xf32>
    %cst_111 = arith.constant dense<0.000000e+00> : vector<32xf32>
    %282 = vector.multi_reduction <add>, %281, %cst_111 [1] : vector<32x128xf32> to vector<32xf32>
    %283 = vector.shape_cast %282 : vector<32xf32> to vector<32x1xf32>
    %cst_112 = arith.constant 1.280000e+02 : f32
    %284 = vector.broadcast %cst_112 : f32 to vector<32x1xf32>
    %285 = arith.divf %283, %284 : vector<32x1xf32>
    %cst_113 = arith.constant 9.99999974E-6 : f32
    %286 = vector.broadcast %cst_113 : f32 to vector<32x1xf32>
    %287 = arith.addf %285, %286 : vector<32x1xf32>
    %288 = math.rsqrt %287 : vector<32x1xf32>
    %289 = vector.broadcast %288 : vector<32x1xf32> to vector<32x128xf32>
    %290 = arith.mulf %280, %289 : vector<32x128xf32>
    %291 = vector.broadcast %272 : vector<1x128xf32> to vector<32x128xf32>
    %292 = arith.mulf %290, %291 : vector<32x128xf32>
    %293 = vector.broadcast %274 : vector<1x128xf32> to vector<32x128xf32>
    %294 = arith.addf %292, %293 : vector<32x128xf32>
    %c1_114 = arith.constant 1 : index
    %c0_115 = arith.constant 0 : index
    %c0_116 = arith.constant 0 : index
    %295 = vector.load %arg7[%c1_114, %c0_115, %c0_116] : memref<2x128x384xbf16, #tpu.memory_space<vmem>>, vector<1x128x384xbf16>
    %296 = vector.shape_cast %295 : vector<1x128x384xbf16> to vector<128x384xbf16>
    %297 = arith.truncf %294 : vector<32x128xf32> to vector<32x128xbf16>
    %cst_117 = arith.constant dense<0.000000e+00> : vector<32x384xf32>
    %298 = tpu.matmul %297, %296, %cst_117 {dimension_numbers = #tpu.dot_dimension_numbers<[1], [0], [0], [1], [0, 0, 1, 1], [], []>} : vector<32x128xbf16>, vector<128x384xbf16>, vector<32x384xf32> -> vector<32x384xf32>
    %c1_118 = arith.constant 1 : index
    %c0_119 = arith.constant 0 : index
    %c0_120 = arith.constant 0 : index
    %299 = vector.load %arg8[%c1_118, %c0_119, %c0_120] : memref<2x1x384xf32, #tpu.memory_space<vmem>>, vector<1x1x384xf32>
    %300 = vector.shape_cast %299 : vector<1x1x384xf32> to vector<1x384xf32>
    %301 = vector.broadcast %300 : vector<1x384xf32> to vector<32x384xf32>
    %302 = arith.addf %298, %301 : vector<32x384xf32>
    %c1_121 = arith.constant 1 : index
    %c0_122 = arith.constant 0 : index
    %c0_123 = arith.constant 0 : index
    %c0_124 = arith.constant 0 : index
    %303 = vector.load %arg9[%c1_121, %c0_122, %c0_123, %c0_124] : memref<2x4x32x128xbf16, #tpu.memory_space<vmem>>, vector<1x4x32x128xbf16>
    %304 = vector.shape_cast %303 : vector<1x4x32x128xbf16> to vector<4x32x128xbf16>
    %305 = vector.extract_strided_slice %302 {offsets = [0, 0], sizes = [32, 32], strides = [1, 1]} : vector<32x384xf32> to vector<32x32xf32>
    %306 = vector.shape_cast %305 : vector<32x32xf32> to vector<2x16x32xf32>
    %307 = arith.truncf %306 : vector<2x16x32xf32> to vector<2x16x32xbf16>
    %308 = vector.extract_strided_slice %302 {offsets = [0, 128], sizes = [32, 32], strides = [1, 1]} : vector<32x384xf32> to vector<32x32xf32>
    %309 = vector.shape_cast %308 : vector<32x32xf32> to vector<2x16x32xf32>
    %310 = arith.truncf %309 : vector<2x16x32xf32> to vector<2x16x32xbf16>
    %311 = vector.extract_strided_slice %302 {offsets = [0, 256], sizes = [32, 32], strides = [1, 1]} : vector<32x384xf32> to vector<32x32xf32>
    %312 = vector.shape_cast %311 : vector<32x32xf32> to vector<2x16x32xf32>
    %313 = arith.truncf %312 : vector<2x16x32xf32> to vector<2x16x32xbf16>
    %cst_125 = arith.constant dense<0.000000e+00> : vector<2x16x16xf32>
    %314 = tpu.matmul %307, %310, %cst_125 {dimension_numbers = #tpu.dot_dimension_numbers<[2], [2], [1], [1], [0, 0, 0, 1, 1, 1], [0], [0]>} : vector<2x16x32xbf16>, vector<2x16x32xbf16>, vector<2x16x16xf32> -> vector<2x16x16xf32>
    %cst_126 = arith.constant 0.176776692 : f32
    %315 = vector.broadcast %cst_126 : f32 to vector<2x16x16xf32>
    %316 = arith.mulf %314, %315 : vector<2x16x16xf32>
    %cst_127 = arith.constant dense<0xFF800000> : vector<2x16xf32>
    %317 = vector.multi_reduction <maximumf>, %316, %cst_127 [2] : vector<2x16x16xf32> to vector<2x16xf32>
    %318 = vector.shape_cast %317 : vector<2x16xf32> to vector<2x16x1xf32>
    %319 = vector.broadcast %318 : vector<2x16x1xf32> to vector<2x16x16xf32>
    %320 = arith.subf %316, %319 : vector<2x16x16xf32>
    %321 = math.exp %320 : vector<2x16x16xf32>
    %cst_128 = arith.constant dense<0.000000e+00> : vector<2x16xf32>
    %322 = vector.multi_reduction <add>, %321, %cst_128 [2] : vector<2x16x16xf32> to vector<2x16xf32>
    %323 = vector.shape_cast %322 : vector<2x16xf32> to vector<2x16x1xf32>
    %324 = tpu.reciprocal %323 {approx = true} : vector<2x16x1xf32> -> vector<2x16x1xf32>
    %325 = vector.broadcast %324 : vector<2x16x1xf32> to vector<2x16x16xf32>
    %326 = arith.mulf %321, %325 : vector<2x16x16xf32>
    %327 = arith.truncf %326 : vector<2x16x16xf32> to vector<2x16x16xbf16>
    %cst_129 = arith.constant dense<0.000000e+00> : vector<2x16x32xf32>
    %328 = tpu.matmul %327, %313, %cst_129 {dimension_numbers = #tpu.dot_dimension_numbers<[2], [1], [1], [2], [0, 0, 0, 1, 1, 2], [0], [0]>} : vector<2x16x16xbf16>, vector<2x16x32xbf16>, vector<2x16x32xf32> -> vector<2x16x32xf32>
    %329 = vector.shape_cast %328 : vector<2x16x32xf32> to vector<32x32xf32>
    %330 = vector.extract_strided_slice %304 {offsets = [0, 0, 0], sizes = [1, 32, 128], strides = [1, 1, 1]} : vector<4x32x128xbf16> to vector<1x32x128xbf16>
    %331 = vector.shape_cast %330 : vector<1x32x128xbf16> to vector<32x128xbf16>
    %332 = arith.truncf %329 : vector<32x32xf32> to vector<32x32xbf16>
    %cst_130 = arith.constant dense<0.000000e+00> : vector<32x128xf32>
    %333 = tpu.matmul %332, %331, %cst_130 {dimension_numbers = #tpu.dot_dimension_numbers<[1], [0], [0], [1], [0, 0, 1, 1], [], []>} : vector<32x32xbf16>, vector<32x128xbf16>, vector<32x128xf32> -> vector<32x128xf32>
    %334 = vector.extract_strided_slice %302 {offsets = [0, 32], sizes = [32, 32], strides = [1, 1]} : vector<32x384xf32> to vector<32x32xf32>
    %335 = vector.shape_cast %334 : vector<32x32xf32> to vector<2x16x32xf32>
    %336 = arith.truncf %335 : vector<2x16x32xf32> to vector<2x16x32xbf16>
    %337 = vector.extract_strided_slice %302 {offsets = [0, 160], sizes = [32, 32], strides = [1, 1]} : vector<32x384xf32> to vector<32x32xf32>
    %338 = vector.shape_cast %337 : vector<32x32xf32> to vector<2x16x32xf32>
    %339 = arith.truncf %338 : vector<2x16x32xf32> to vector<2x16x32xbf16>
    %340 = vector.extract_strided_slice %302 {offsets = [0, 288], sizes = [32, 32], strides = [1, 1]} : vector<32x384xf32> to vector<32x32xf32>
    %341 = vector.shape_cast %340 : vector<32x32xf32> to vector<2x16x32xf32>
    %342 = arith.truncf %341 : vector<2x16x32xf32> to vector<2x16x32xbf16>
    %cst_131 = arith.constant dense<0.000000e+00> : vector<2x16x16xf32>
    %343 = tpu.matmul %336, %339, %cst_131 {dimension_numbers = #tpu.dot_dimension_numbers<[2], [2], [1], [1], [0, 0, 0, 1, 1, 1], [0], [0]>} : vector<2x16x32xbf16>, vector<2x16x32xbf16>, vector<2x16x16xf32> -> vector<2x16x16xf32>
    %cst_132 = arith.constant 0.176776692 : f32
    %344 = vector.broadcast %cst_132 : f32 to vector<2x16x16xf32>
    %345 = arith.mulf %343, %344 : vector<2x16x16xf32>
    %cst_133 = arith.constant dense<0xFF800000> : vector<2x16xf32>
    %346 = vector.multi_reduction <maximumf>, %345, %cst_133 [2] : vector<2x16x16xf32> to vector<2x16xf32>
    %347 = vector.shape_cast %346 : vector<2x16xf32> to vector<2x16x1xf32>
    %348 = vector.broadcast %347 : vector<2x16x1xf32> to vector<2x16x16xf32>
    %349 = arith.subf %345, %348 : vector<2x16x16xf32>
    %350 = math.exp %349 : vector<2x16x16xf32>
    %cst_134 = arith.constant dense<0.000000e+00> : vector<2x16xf32>
    %351 = vector.multi_reduction <add>, %350, %cst_134 [2] : vector<2x16x16xf32> to vector<2x16xf32>
    %352 = vector.shape_cast %351 : vector<2x16xf32> to vector<2x16x1xf32>
    %353 = tpu.reciprocal %352 {approx = true} : vector<2x16x1xf32> -> vector<2x16x1xf32>
    %354 = vector.broadcast %353 : vector<2x16x1xf32> to vector<2x16x16xf32>
    %355 = arith.mulf %350, %354 : vector<2x16x16xf32>
    %356 = arith.truncf %355 : vector<2x16x16xf32> to vector<2x16x16xbf16>
    %cst_135 = arith.constant dense<0.000000e+00> : vector<2x16x32xf32>
    %357 = tpu.matmul %356, %342, %cst_135 {dimension_numbers = #tpu.dot_dimension_numbers<[2], [1], [1], [2], [0, 0, 0, 1, 1, 2], [0], [0]>} : vector<2x16x16xbf16>, vector<2x16x32xbf16>, vector<2x16x32xf32> -> vector<2x16x32xf32>
    %358 = vector.shape_cast %357 : vector<2x16x32xf32> to vector<32x32xf32>
    %359 = vector.extract_strided_slice %304 {offsets = [1, 0, 0], sizes = [1, 32, 128], strides = [1, 1, 1]} : vector<4x32x128xbf16> to vector<1x32x128xbf16>
    %360 = vector.shape_cast %359 : vector<1x32x128xbf16> to vector<32x128xbf16>
    %361 = arith.truncf %358 : vector<32x32xf32> to vector<32x32xbf16>
    %cst_136 = arith.constant dense<0.000000e+00> : vector<32x128xf32>
    %362 = tpu.matmul %361, %360, %cst_136 {dimension_numbers = #tpu.dot_dimension_numbers<[1], [0], [0], [1], [0, 0, 1, 1], [], []>} : vector<32x32xbf16>, vector<32x128xbf16>, vector<32x128xf32> -> vector<32x128xf32>
    %363 = arith.addf %333, %362 : vector<32x128xf32>
    %364 = vector.extract_strided_slice %302 {offsets = [0, 64], sizes = [32, 32], strides = [1, 1]} : vector<32x384xf32> to vector<32x32xf32>
    %365 = vector.shape_cast %364 : vector<32x32xf32> to vector<2x16x32xf32>
    %366 = arith.truncf %365 : vector<2x16x32xf32> to vector<2x16x32xbf16>
    %367 = vector.extract_strided_slice %302 {offsets = [0, 192], sizes = [32, 32], strides = [1, 1]} : vector<32x384xf32> to vector<32x32xf32>
    %368 = vector.shape_cast %367 : vector<32x32xf32> to vector<2x16x32xf32>
    %369 = arith.truncf %368 : vector<2x16x32xf32> to vector<2x16x32xbf16>
    %370 = vector.extract_strided_slice %302 {offsets = [0, 320], sizes = [32, 32], strides = [1, 1]} : vector<32x384xf32> to vector<32x32xf32>
    %371 = vector.shape_cast %370 : vector<32x32xf32> to vector<2x16x32xf32>
    %372 = arith.truncf %371 : vector<2x16x32xf32> to vector<2x16x32xbf16>
    %cst_137 = arith.constant dense<0.000000e+00> : vector<2x16x16xf32>
    %373 = tpu.matmul %366, %369, %cst_137 {dimension_numbers = #tpu.dot_dimension_numbers<[2], [2], [1], [1], [0, 0, 0, 1, 1, 1], [0], [0]>} : vector<2x16x32xbf16>, vector<2x16x32xbf16>, vector<2x16x16xf32> -> vector<2x16x16xf32>
    %cst_138 = arith.constant 0.176776692 : f32
    %374 = vector.broadcast %cst_138 : f32 to vector<2x16x16xf32>
    %375 = arith.mulf %373, %374 : vector<2x16x16xf32>
    %cst_139 = arith.constant dense<0xFF800000> : vector<2x16xf32>
    %376 = vector.multi_reduction <maximumf>, %375, %cst_139 [2] : vector<2x16x16xf32> to vector<2x16xf32>
    %377 = vector.shape_cast %376 : vector<2x16xf32> to vector<2x16x1xf32>
    %378 = vector.broadcast %377 : vector<2x16x1xf32> to vector<2x16x16xf32>
    %379 = arith.subf %375, %378 : vector<2x16x16xf32>
    %380 = math.exp %379 : vector<2x16x16xf32>
    %cst_140 = arith.constant dense<0.000000e+00> : vector<2x16xf32>
    %381 = vector.multi_reduction <add>, %380, %cst_140 [2] : vector<2x16x16xf32> to vector<2x16xf32>
    %382 = vector.shape_cast %381 : vector<2x16xf32> to vector<2x16x1xf32>
    %383 = tpu.reciprocal %382 {approx = true} : vector<2x16x1xf32> -> vector<2x16x1xf32>
    %384 = vector.broadcast %383 : vector<2x16x1xf32> to vector<2x16x16xf32>
    %385 = arith.mulf %380, %384 : vector<2x16x16xf32>
    %386 = arith.truncf %385 : vector<2x16x16xf32> to vector<2x16x16xbf16>
    %cst_141 = arith.constant dense<0.000000e+00> : vector<2x16x32xf32>
    %387 = tpu.matmul %386, %372, %cst_141 {dimension_numbers = #tpu.dot_dimension_numbers<[2], [1], [1], [2], [0, 0, 0, 1, 1, 2], [0], [0]>} : vector<2x16x16xbf16>, vector<2x16x32xbf16>, vector<2x16x32xf32> -> vector<2x16x32xf32>
    %388 = vector.shape_cast %387 : vector<2x16x32xf32> to vector<32x32xf32>
    %389 = vector.extract_strided_slice %304 {offsets = [2, 0, 0], sizes = [1, 32, 128], strides = [1, 1, 1]} : vector<4x32x128xbf16> to vector<1x32x128xbf16>
    %390 = vector.shape_cast %389 : vector<1x32x128xbf16> to vector<32x128xbf16>
    %391 = arith.truncf %388 : vector<32x32xf32> to vector<32x32xbf16>
    %cst_142 = arith.constant dense<0.000000e+00> : vector<32x128xf32>
    %392 = tpu.matmul %391, %390, %cst_142 {dimension_numbers = #tpu.dot_dimension_numbers<[1], [0], [0], [1], [0, 0, 1, 1], [], []>} : vector<32x32xbf16>, vector<32x128xbf16>, vector<32x128xf32> -> vector<32x128xf32>
    %393 = arith.addf %363, %392 : vector<32x128xf32>
    %394 = vector.extract_strided_slice %302 {offsets = [0, 96], sizes = [32, 32], strides = [1, 1]} : vector<32x384xf32> to vector<32x32xf32>
    %395 = vector.shape_cast %394 : vector<32x32xf32> to vector<2x16x32xf32>
    %396 = arith.truncf %395 : vector<2x16x32xf32> to vector<2x16x32xbf16>
    %397 = vector.extract_strided_slice %302 {offsets = [0, 224], sizes = [32, 32], strides = [1, 1]} : vector<32x384xf32> to vector<32x32xf32>
    %398 = vector.shape_cast %397 : vector<32x32xf32> to vector<2x16x32xf32>
    %399 = arith.truncf %398 : vector<2x16x32xf32> to vector<2x16x32xbf16>
    %400 = vector.extract_strided_slice %302 {offsets = [0, 352], sizes = [32, 32], strides = [1, 1]} : vector<32x384xf32> to vector<32x32xf32>
    %401 = vector.shape_cast %400 : vector<32x32xf32> to vector<2x16x32xf32>
    %402 = arith.truncf %401 : vector<2x16x32xf32> to vector<2x16x32xbf16>
    %cst_143 = arith.constant dense<0.000000e+00> : vector<2x16x16xf32>
    %403 = tpu.matmul %396, %399, %cst_143 {dimension_numbers = #tpu.dot_dimension_numbers<[2], [2], [1], [1], [0, 0, 0, 1, 1, 1], [0], [0]>} : vector<2x16x32xbf16>, vector<2x16x32xbf16>, vector<2x16x16xf32> -> vector<2x16x16xf32>
    %cst_144 = arith.constant 0.176776692 : f32
    %404 = vector.broadcast %cst_144 : f32 to vector<2x16x16xf32>
    %405 = arith.mulf %403, %404 : vector<2x16x16xf32>
    %cst_145 = arith.constant dense<0xFF800000> : vector<2x16xf32>
    %406 = vector.multi_reduction <maximumf>, %405, %cst_145 [2] : vector<2x16x16xf32> to vector<2x16xf32>
    %407 = vector.shape_cast %406 : vector<2x16xf32> to vector<2x16x1xf32>
    %408 = vector.broadcast %407 : vector<2x16x1xf32> to vector<2x16x16xf32>
    %409 = arith.subf %405, %408 : vector<2x16x16xf32>
    %410 = math.exp %409 : vector<2x16x16xf32>
    %cst_146 = arith.constant dense<0.000000e+00> : vector<2x16xf32>
    %411 = vector.multi_reduction <add>, %410, %cst_146 [2] : vector<2x16x16xf32> to vector<2x16xf32>
    %412 = vector.shape_cast %411 : vector<2x16xf32> to vector<2x16x1xf32>
    %413 = tpu.reciprocal %412 {approx = true} : vector<2x16x1xf32> -> vector<2x16x1xf32>
    %414 = vector.broadcast %413 : vector<2x16x1xf32> to vector<2x16x16xf32>
    %415 = arith.mulf %410, %414 : vector<2x16x16xf32>
    %416 = arith.truncf %415 : vector<2x16x16xf32> to vector<2x16x16xbf16>
    %cst_147 = arith.constant dense<0.000000e+00> : vector<2x16x32xf32>
    %417 = tpu.matmul %416, %402, %cst_147 {dimension_numbers = #tpu.dot_dimension_numbers<[2], [1], [1], [2], [0, 0, 0, 1, 1, 2], [0], [0]>} : vector<2x16x16xbf16>, vector<2x16x32xbf16>, vector<2x16x32xf32> -> vector<2x16x32xf32>
    %418 = vector.shape_cast %417 : vector<2x16x32xf32> to vector<32x32xf32>
    %419 = vector.extract_strided_slice %304 {offsets = [3, 0, 0], sizes = [1, 32, 128], strides = [1, 1, 1]} : vector<4x32x128xbf16> to vector<1x32x128xbf16>
    %420 = vector.shape_cast %419 : vector<1x32x128xbf16> to vector<32x128xbf16>
    %421 = arith.truncf %418 : vector<32x32xf32> to vector<32x32xbf16>
    %cst_148 = arith.constant dense<0.000000e+00> : vector<32x128xf32>
    %422 = tpu.matmul %421, %420, %cst_148 {dimension_numbers = #tpu.dot_dimension_numbers<[1], [0], [0], [1], [0, 0, 1, 1], [], []>} : vector<32x32xbf16>, vector<32x128xbf16>, vector<32x128xf32> -> vector<32x128xf32>
    %423 = arith.addf %393, %422 : vector<32x128xf32>
    %c1_149 = arith.constant 1 : index
    %c0_150 = arith.constant 0 : index
    %c0_151 = arith.constant 0 : index
    %424 = vector.load %arg10[%c1_149, %c0_150, %c0_151] : memref<2x1x128xf32, #tpu.memory_space<vmem>>, vector<1x1x128xf32>
    %425 = vector.shape_cast %424 : vector<1x1x128xf32> to vector<1x128xf32>
    %426 = vector.broadcast %425 : vector<1x128xf32> to vector<32x128xf32>
    %427 = arith.addf %423, %426 : vector<32x128xf32>
    %428 = arith.addf %294, %427 : vector<32x128xf32>
    %c1_152 = arith.constant 1 : index
    %c0_153 = arith.constant 0 : index
    %c0_154 = arith.constant 0 : index
    %429 = vector.load %arg11[%c1_152, %c0_153, %c0_154] : memref<2x1x128xf32, #tpu.memory_space<vmem>>, vector<1x1x128xf32>
    %430 = vector.shape_cast %429 : vector<1x1x128xf32> to vector<1x128xf32>
    %c1_155 = arith.constant 1 : index
    %c0_156 = arith.constant 0 : index
    %c0_157 = arith.constant 0 : index
    %431 = vector.load %arg12[%c1_155, %c0_156, %c0_157] : memref<2x1x128xf32, #tpu.memory_space<vmem>>, vector<1x1x128xf32>
    %432 = vector.shape_cast %431 : vector<1x1x128xf32> to vector<1x128xf32>
    %cst_158 = arith.constant dense<0.000000e+00> : vector<32xf32>
    %433 = vector.multi_reduction <add>, %428, %cst_158 [1] : vector<32x128xf32> to vector<32xf32>
    %434 = vector.shape_cast %433 : vector<32xf32> to vector<32x1xf32>
    %cst_159 = arith.constant 1.280000e+02 : f32
    %435 = vector.broadcast %cst_159 : f32 to vector<32x1xf32>
    %436 = arith.divf %434, %435 : vector<32x1xf32>
    %437 = vector.broadcast %436 : vector<32x1xf32> to vector<32x128xf32>
    %438 = arith.subf %428, %437 : vector<32x128xf32>
    %439 = arith.mulf %438, %438 : vector<32x128xf32>
    %cst_160 = arith.constant dense<0.000000e+00> : vector<32xf32>
    %440 = vector.multi_reduction <add>, %439, %cst_160 [1] : vector<32x128xf32> to vector<32xf32>
    %441 = vector.shape_cast %440 : vector<32xf32> to vector<32x1xf32>
    %cst_161 = arith.constant 1.280000e+02 : f32
    %442 = vector.broadcast %cst_161 : f32 to vector<32x1xf32>
    %443 = arith.divf %441, %442 : vector<32x1xf32>
    %cst_162 = arith.constant 9.99999974E-6 : f32
    %444 = vector.broadcast %cst_162 : f32 to vector<32x1xf32>
    %445 = arith.addf %443, %444 : vector<32x1xf32>
    %446 = math.rsqrt %445 : vector<32x1xf32>
    %447 = vector.broadcast %446 : vector<32x1xf32> to vector<32x128xf32>
    %448 = arith.mulf %438, %447 : vector<32x128xf32>
    %449 = vector.broadcast %430 : vector<1x128xf32> to vector<32x128xf32>
    %450 = arith.mulf %448, %449 : vector<32x128xf32>
    %451 = vector.broadcast %432 : vector<1x128xf32> to vector<32x128xf32>
    %452 = arith.addf %450, %451 : vector<32x128xf32>
    %c1_163 = arith.constant 1 : index
    %c0_164 = arith.constant 0 : index
    %c0_165 = arith.constant 0 : index
    %453 = vector.load %arg13[%c1_163, %c0_164, %c0_165] : memref<2x128x256xbf16, #tpu.memory_space<vmem>>, vector<1x128x256xbf16>
    %454 = vector.shape_cast %453 : vector<1x128x256xbf16> to vector<128x256xbf16>
    %455 = arith.truncf %452 : vector<32x128xf32> to vector<32x128xbf16>
    %cst_166 = arith.constant dense<0.000000e+00> : vector<32x256xf32>
    %456 = tpu.matmul %455, %454, %cst_166 {dimension_numbers = #tpu.dot_dimension_numbers<[1], [0], [0], [1], [0, 0, 1, 1], [], []>} : vector<32x128xbf16>, vector<128x256xbf16>, vector<32x256xf32> -> vector<32x256xf32>
    %c1_167 = arith.constant 1 : index
    %c0_168 = arith.constant 0 : index
    %c0_169 = arith.constant 0 : index
    %457 = vector.load %arg14[%c1_167, %c0_168, %c0_169] : memref<2x1x256xf32, #tpu.memory_space<vmem>>, vector<1x1x256xf32>
    %458 = vector.shape_cast %457 : vector<1x1x256xf32> to vector<1x256xf32>
    %459 = vector.broadcast %458 : vector<1x256xf32> to vector<32x256xf32>
    %460 = arith.addf %456, %459 : vector<32x256xf32>
    %cst_170 = arith.constant 0.000000e+00 : f32
    %461 = vector.broadcast %cst_170 : f32 to vector<32x256xf32>
    %462 = arith.maximumf %460, %461 : vector<32x256xf32>
    %c1_171 = arith.constant 1 : index
    %c0_172 = arith.constant 0 : index
    %c0_173 = arith.constant 0 : index
    %463 = vector.load %arg15[%c1_171, %c0_172, %c0_173] : memref<2x256x128xbf16, #tpu.memory_space<vmem>>, vector<1x256x128xbf16>
    %464 = vector.shape_cast %463 : vector<1x256x128xbf16> to vector<256x128xbf16>
    %465 = arith.truncf %462 : vector<32x256xf32> to vector<32x256xbf16>
    %cst_174 = arith.constant dense<0.000000e+00> : vector<32x128xf32>
    %466 = tpu.matmul %465, %464, %cst_174 {dimension_numbers = #tpu.dot_dimension_numbers<[1], [0], [0], [1], [0, 0, 1, 1], [], []>} : vector<32x256xbf16>, vector<256x128xbf16>, vector<32x128xf32> -> vector<32x128xf32>
    %c1_175 = arith.constant 1 : index
    %c0_176 = arith.constant 0 : index
    %c0_177 = arith.constant 0 : index
    %467 = vector.load %arg16[%c1_175, %c0_176, %c0_177] : memref<2x1x128xf32, #tpu.memory_space<vmem>>, vector<1x1x128xf32>
    %468 = vector.shape_cast %467 : vector<1x1x128xf32> to vector<1x128xf32>
    %469 = vector.broadcast %468 : vector<1x128xf32> to vector<32x128xf32>
    %470 = arith.addf %466, %469 : vector<32x128xf32>
    %471 = arith.addf %452, %470 : vector<32x128xf32>
    %c1_178 = arith.constant 1 : index
    %c0_179 = arith.constant 0 : index
    %c0_180 = arith.constant 0 : index
    %472 = vector.load %arg17[%c1_178, %c0_179, %c0_180] : memref<2x1x128xf32, #tpu.memory_space<vmem>>, vector<1x1x128xf32>
    %473 = vector.shape_cast %472 : vector<1x1x128xf32> to vector<1x128xf32>
    %c1_181 = arith.constant 1 : index
    %c0_182 = arith.constant 0 : index
    %c0_183 = arith.constant 0 : index
    %474 = vector.load %arg18[%c1_181, %c0_182, %c0_183] : memref<2x1x128xf32, #tpu.memory_space<vmem>>, vector<1x1x128xf32>
    %475 = vector.shape_cast %474 : vector<1x1x128xf32> to vector<1x128xf32>
    %cst_184 = arith.constant dense<0.000000e+00> : vector<32xf32>
    %476 = vector.multi_reduction <add>, %471, %cst_184 [1] : vector<32x128xf32> to vector<32xf32>
    %477 = vector.shape_cast %476 : vector<32xf32> to vector<32x1xf32>
    %cst_185 = arith.constant 1.280000e+02 : f32
    %478 = vector.broadcast %cst_185 : f32 to vector<32x1xf32>
    %479 = arith.divf %477, %478 : vector<32x1xf32>
    %480 = vector.broadcast %479 : vector<32x1xf32> to vector<32x128xf32>
    %481 = arith.subf %471, %480 : vector<32x128xf32>
    %482 = arith.mulf %481, %481 : vector<32x128xf32>
    %cst_186 = arith.constant dense<0.000000e+00> : vector<32xf32>
    %483 = vector.multi_reduction <add>, %482, %cst_186 [1] : vector<32x128xf32> to vector<32xf32>
    %484 = vector.shape_cast %483 : vector<32xf32> to vector<32x1xf32>
    %cst_187 = arith.constant 1.280000e+02 : f32
    %485 = vector.broadcast %cst_187 : f32 to vector<32x1xf32>
    %486 = arith.divf %484, %485 : vector<32x1xf32>
    %cst_188 = arith.constant 9.99999974E-6 : f32
    %487 = vector.broadcast %cst_188 : f32 to vector<32x1xf32>
    %488 = arith.addf %486, %487 : vector<32x1xf32>
    %489 = math.rsqrt %488 : vector<32x1xf32>
    %490 = vector.broadcast %489 : vector<32x1xf32> to vector<32x128xf32>
    %491 = arith.mulf %481, %490 : vector<32x128xf32>
    %492 = vector.broadcast %473 : vector<1x128xf32> to vector<32x128xf32>
    %493 = arith.mulf %491, %492 : vector<32x128xf32>
    %494 = vector.broadcast %475 : vector<1x128xf32> to vector<32x128xf32>
    %495 = arith.addf %493, %494 : vector<32x128xf32>
    %496 = vector.shape_cast %495 : vector<32x128xf32> to vector<2x16x128xf32>
    %cst_189 = arith.constant dense<0.000000e+00> : vector<2x128xf32>
    %497 = vector.multi_reduction <add>, %496, %cst_189 [1] : vector<2x16x128xf32> to vector<2x128xf32>
    %cst_190 = arith.constant 1.600000e+01 : f32
    %498 = vector.broadcast %cst_190 : f32 to vector<2x128xf32>
    %499 = arith.divf %497, %498 : vector<2x128xf32>
    %c0_191 = arith.constant 0 : index
    %c0_192 = arith.constant 0 : index
    %500 = vector.load %arg19[%c0_191, %c0_192] : memref<1x128xf32, #tpu.memory_space<vmem>>, vector<1x128xf32>
    %c0_193 = arith.constant 0 : index
    %c0_194 = arith.constant 0 : index
    %501 = vector.load %arg20[%c0_193, %c0_194] : memref<1x128xf32, #tpu.memory_space<vmem>>, vector<1x128xf32>
    %cst_195 = arith.constant dense<0.000000e+00> : vector<2xf32>
    %502 = vector.multi_reduction <add>, %499, %cst_195 [1] : vector<2x128xf32> to vector<2xf32>
    %503 = vector.shape_cast %502 : vector<2xf32> to vector<2x1xf32>
    %cst_196 = arith.constant 1.280000e+02 : f32
    %504 = vector.broadcast %cst_196 : f32 to vector<2x1xf32>
    %505 = arith.divf %503, %504 : vector<2x1xf32>
    %506 = vector.broadcast %505 : vector<2x1xf32> to vector<2x128xf32>
    %507 = arith.subf %499, %506 : vector<2x128xf32>
    %508 = arith.mulf %507, %507 : vector<2x128xf32>
    %cst_197 = arith.constant dense<0.000000e+00> : vector<2xf32>
    %509 = vector.multi_reduction <add>, %508, %cst_197 [1] : vector<2x128xf32> to vector<2xf32>
    %510 = vector.shape_cast %509 : vector<2xf32> to vector<2x1xf32>
    %cst_198 = arith.constant 1.280000e+02 : f32
    %511 = vector.broadcast %cst_198 : f32 to vector<2x1xf32>
    %512 = arith.divf %510, %511 : vector<2x1xf32>
    %cst_199 = arith.constant 9.99999974E-6 : f32
    %513 = vector.broadcast %cst_199 : f32 to vector<2x1xf32>
    %514 = arith.addf %512, %513 : vector<2x1xf32>
    %515 = math.rsqrt %514 : vector<2x1xf32>
    %516 = vector.broadcast %515 : vector<2x1xf32> to vector<2x128xf32>
    %517 = arith.mulf %507, %516 : vector<2x128xf32>
    %518 = vector.broadcast %500 : vector<1x128xf32> to vector<2x128xf32>
    %519 = arith.mulf %517, %518 : vector<2x128xf32>
    %520 = vector.broadcast %501 : vector<1x128xf32> to vector<2x128xf32>
    %521 = arith.addf %519, %520 : vector<2x128xf32>
    %c0_200 = arith.constant 0 : index
    %c0_201 = arith.constant 0 : index
    %522 = vector.load %arg21[%c0_200, %c0_201] : memref<128x128xbf16, #tpu.memory_space<vmem>>, vector<128x128xbf16>
    %523 = arith.truncf %521 : vector<2x128xf32> to vector<2x128xbf16>
    %cst_202 = arith.constant dense<0.000000e+00> : vector<2x128xf32>
    %524 = tpu.matmul %523, %522, %cst_202 {dimension_numbers = #tpu.dot_dimension_numbers<[1], [0], [0], [1], [0, 0, 1, 1], [], []>} : vector<2x128xbf16>, vector<128x128xbf16>, vector<2x128xf32> -> vector<2x128xf32>
    %c0_203 = arith.constant 0 : index
    %c0_204 = arith.constant 0 : index
    %525 = vector.load %arg22[%c0_203, %c0_204] : memref<1x128xf32, #tpu.memory_space<vmem>>, vector<1x128xf32>
    %526 = vector.broadcast %525 : vector<1x128xf32> to vector<2x128xf32>
    %527 = arith.addf %524, %526 : vector<2x128xf32>
    %c0_205 = arith.constant 0 : index
    %c0_206 = arith.constant 0 : index
    %c0_207 = arith.constant 0 : index
    %528 = vector.load %arg23[%c0_205, %c0_206, %c0_207] : memref<1x2x128xf32, #tpu.memory_space<vmem>>, vector<1x2x128xf32>
    %529 = vector.shape_cast %528 : vector<1x2x128xf32> to vector<2x128xf32>
    %530 = vector.shape_cast %527 : vector<2x128xf32> to vector<1x2x128xf32>
    tpu.vector_store %arg23[%c0_205, %c0_206, %c0_207], %530 {strides = array<i32>} : memref<1x2x128xf32, #tpu.memory_space<vmem>>, vector<1x2x128xf32>,
    return
  }
  func.func @transform_0(%arg0: i32) -> (i32, i32, i32) {
    %c0_i32 = arith.constant 0 : i32
    %c0_i32_0 = arith.constant 0 : i32
    %c0_i32_1 = arith.constant 0 : i32
    return %arg0, %c0_i32, %c0_i32_0 : i32, i32, i32
  }
  func.func @transform_1(%arg0: i32) -> (i32, i32) {
    %c0_i32 = arith.constant 0 : i32
    %c0_i32_0 = arith.constant 0 : i32
    %c0_i32_1 = arith.constant 0 : i32
    return %c0_i32, %c0_i32_0 : i32, i32
  }
  func.func @transform_2(%arg0: i32) -> (i32, i32) {
    %c0_i32 = arith.constant 0 : i32
    %c0_i32_0 = arith.constant 0 : i32
    %c0_i32_1 = arith.constant 0 : i32
    return %c0_i32, %c0_i32_0 : i32, i32
  }
  func.func @transform_3(%arg0: i32) -> (i32, i32) {
    %c0_i32 = arith.constant 0 : i32
    %c0_i32_0 = arith.constant 0 : i32
    %c0_i32_1 = arith.constant 0 : i32
    return %c0_i32, %c0_i32_0 : i32, i32
  }
  func.func @transform_4(%arg0: i32) -> (i32, i32, i32) {
    %c0_i32 = arith.constant 0 : i32
    %c0_i32_0 = arith.constant 0 : i32
    %c0_i32_1 = arith.constant 0 : i32
    %c0_i32_2 = arith.constant 0 : i32
    return %c0_i32, %c0_i32_0, %c0_i32_1 : i32, i32, i32
  }
  func.func @transform_5(%arg0: i32) -> (i32, i32, i32) {
    %c0_i32 = arith.constant 0 : i32
    %c0_i32_0 = arith.constant 0 : i32
    %c0_i32_1 = arith.constant 0 : i32
    %c0_i32_2 = arith.constant 0 : i32
    return %c0_i32, %c0_i32_0, %c0_i32_1 : i32, i32, i32
  }
  func.func @transform_6(%arg0: i32) -> (i32, i32, i32) {
    %c0_i32 = arith.constant 0 : i32
    %c0_i32_0 = arith.constant 0 : i32
    %c0_i32_1 = arith.constant 0 : i32
    %c0_i32_2 = arith.constant 0 : i32
    return %c0_i32, %c0_i32_0, %c0_i32_1 : i32, i32, i32
  }
  func.func @transform_7(%arg0: i32) -> (i32, i32, i32) {
    %c0_i32 = arith.constant 0 : i32
    %c0_i32_0 = arith.constant 0 : i32
    %c0_i32_1 = arith.constant 0 : i32
    %c0_i32_2 = arith.constant 0 : i32
    return %c0_i32, %c0_i32_0, %c0_i32_1 : i32, i32, i32
  }
  func.func @transform_8(%arg0: i32) -> (i32, i32, i32, i32) {
    %c0_i32 = arith.constant 0 : i32
    %c0_i32_0 = arith.constant 0 : i32
    %c0_i32_1 = arith.constant 0 : i32
    %c0_i32_2 = arith.constant 0 : i32
    %c0_i32_3 = arith.constant 0 : i32
    return %c0_i32, %c0_i32_0, %c0_i32_1, %c0_i32_2 : i32, i32, i32, i32
  }
  func.func @transform_9(%arg0: i32) -> (i32, i32, i32) {
    %c0_i32 = arith.constant 0 : i32
    %c0_i32_0 = arith.constant 0 : i32
    %c0_i32_1 = arith.constant 0 : i32
    %c0_i32_2 = arith.constant 0 : i32
    return %c0_i32, %c0_i32_0, %c0_i32_1 : i32, i32, i32
  }
  func.func @transform_10(%arg0: i32) -> (i32, i32, i32) {
    %c0_i32 = arith.constant 0 : i32
    %c0_i32_0 = arith.constant 0 : i32
    %c0_i32_1 = arith.constant 0 : i32
    %c0_i32_2 = arith.constant 0 : i32
    return %c0_i32, %c0_i32_0, %c0_i32_1 : i32, i32, i32
  }
  func.func @transform_11(%arg0: i32) -> (i32, i32, i32) {
    %c0_i32 = arith.constant 0 : i32
    %c0_i32_0 = arith.constant 0 : i32
    %c0_i32_1 = arith.constant 0 : i32
    %c0_i32_2 = arith.constant 0 : i32
    return %c0_i32, %c0_i32_0, %c0_i32_1 : i32, i32, i32
  }
  func.func @transform_12(%arg0: i32) -> (i32, i32, i32) {
    %c0_i32 = arith.constant 0 : i32
    %c0_i32_0 = arith.constant 0 : i32
    %c0_i32_1 = arith.constant 0 : i32
    %c0_i32_2 = arith.constant 0 : i32
    return %c0_i32, %c0_i32_0, %c0_i32_1 : i32, i32, i32
  }
  func.func @transform_13(%arg0: i32) -> (i32, i32, i32) {
    %c0_i32 = arith.constant 0 : i32
    %c0_i32_0 = arith.constant 0 : i32
    %c0_i32_1 = arith.constant 0 : i32
    %c0_i32_2 = arith.constant 0 : i32
    return %c0_i32, %c0_i32_0, %c0_i32_1 : i32, i32, i32
  }
  func.func @transform_14(%arg0: i32) -> (i32, i32, i32) {
    %c0_i32 = arith.constant 0 : i32
    %c0_i32_0 = arith.constant 0 : i32
    %c0_i32_1 = arith.constant 0 : i32
    %c0_i32_2 = arith.constant 0 : i32
    return %c0_i32, %c0_i32_0, %c0_i32_1 : i32, i32, i32
  }
  func.func @transform_15(%arg0: i32) -> (i32, i32, i32) {
    %c0_i32 = arith.constant 0 : i32
    %c0_i32_0 = arith.constant 0 : i32
    %c0_i32_1 = arith.constant 0 : i32
    %c0_i32_2 = arith.constant 0 : i32
    return %c0_i32, %c0_i32_0, %c0_i32_1 : i32, i32, i32
  }
  func.func @transform_16(%arg0: i32) -> (i32, i32, i32) {
    %c0_i32 = arith.constant 0 : i32
    %c0_i32_0 = arith.constant 0 : i32
    %c0_i32_1 = arith.constant 0 : i32
    %c0_i32_2 = arith.constant 0 : i32
    return %c0_i32, %c0_i32_0, %c0_i32_1 : i32, i32, i32
  }
  func.func @transform_17(%arg0: i32) -> (i32, i32, i32) {
    %c0_i32 = arith.constant 0 : i32
    %c0_i32_0 = arith.constant 0 : i32
    %c0_i32_1 = arith.constant 0 : i32
    %c0_i32_2 = arith.constant 0 : i32
    return %c0_i32, %c0_i32_0, %c0_i32_1 : i32, i32, i32
  }
  func.func @transform_18(%arg0: i32) -> (i32, i32) {
    %c0_i32 = arith.constant 0 : i32
    %c0_i32_0 = arith.constant 0 : i32
    %c0_i32_1 = arith.constant 0 : i32
    return %c0_i32, %c0_i32_0 : i32, i32
  }
  func.func @transform_19(%arg0: i32) -> (i32, i32) {
    %c0_i32 = arith.constant 0 : i32
    %c0_i32_0 = arith.constant 0 : i32
    %c0_i32_1 = arith.constant 0 : i32
    return %c0_i32, %c0_i32_0 : i32, i32
  }
  func.func @transform_20(%arg0: i32) -> (i32, i32) {
    %c0_i32 = arith.constant 0 : i32
    %c0_i32_0 = arith.constant 0 : i32
    %c0_i32_1 = arith.constant 0 : i32
    return %c0_i32, %c0_i32_0 : i32, i32
  }
  func.func @transform_21(%arg0: i32) -> (i32, i32) {
    %c0_i32 = arith.constant 0 : i32
    %c0_i32_0 = arith.constant 0 : i32
    %c0_i32_1 = arith.constant 0 : i32
    return %c0_i32, %c0_i32_0 : i32, i32
  }
  func.func @transform_22(%arg0: i32) -> (i32, i32, i32) {
    %c0_i32 = arith.constant 0 : i32
    %c0_i32_0 = arith.constant 0 : i32
    %c0_i32_1 = arith.constant 0 : i32
    return %arg0, %c0_i32, %c0_i32_0 : i32, i32, i32
  }
}

</mosaic_0001>

<bundles_post_ra>
// kernel: enhanced_transformer_forward.1
= control target key start
LH: loop header
LB: loop body
LE: loop exit
PB: predicated region body
PF: predicated region fallthrough
CT: control target
= control target key end

     0   :  { %s7875_s0 = inlined_call_operand.hbm [shape: f32[2,16,16], index: 0, kind: input, shape index: {}]   ;;  %s7876_s1 = inlined_call_operand.vmem [shape: bf16[16,128], index: 1, kind: input, shape index: {}]   ;;  %s7877_s2 = inlined_call_operand.vmem [shape: f32[1,128], index: 2, kind: input, shape index: {}]   ;;  %s7878_s3 = inlined_call_operand.vmem [shape: f32[16,128], index: 3, kind: input, shape index: {}]   ;;  %s7879_s4 = inlined_call_operand.hbm [shape: bf16[2,384,128], index: 4, kind: input, shape index: {}]   ;;  %s7880_s5 = inlined_call_operand.vmem [shape: f32[2,1,128], index: 5, kind: input, shape index: {}]   ;;  %s7881_s6 = inlined_call_operand.hbm [shape: bf16[2,128,384], index: 6, kind: input, shape index: {}]   ;;  %s7882_s7 = inlined_call_operand.vmem [shape: f32[2,1,384], index: 7, kind: input, shape index: {}]   ;;  %s7883_s8 = inlined_call_operand.hbm [shape: bf16[2,4,32,128], index: 8, kind: input, shape index: {}]   ;;  %s7884_s9 = inlined_call_operand.vmem [shape: f32[2,1,128], index: 9, kind: input, shape index: {}]   ;;  %s7885_s10 = inlined_call_operand.vmem [shape: f32[2,1,128], index: 10, kind: input, shape index: {}]   ;;  %s7886_s11 = inlined_call_operand.vmem [shape: f32[2,1,128], index: 11, kind: input, shape index: {}]   ;;  %s7887_s12 = inlined_call_operand.hbm [shape: bf16[2,128,256], index: 12, kind: input, shape index: {}]   ;;  %s7888_s13 = inlined_call_operand.hbm [shape: f32[2,1,256], index: 13, kind: input, shape index: {}]   ;;  %s7889_s14 = inlined_call_operand.hbm [shape: bf16[2,256,128], index: 14, kind: input, shape index: {}]   ;;  %s7890_s15 = inlined_call_operand.hbm [shape: f32[2,1,128], index: 15, kind: input, shape index: {}]   ;;  %s7891_s16 = inlined_call_operand.vmem [shape: f32[2,1,128], index: 16, kind: input, shape index: {}]   ;;  %s7892_s17 = inlined_call_operand.vmem [shape: f32[2,1,128], index: 17, kind: input, shape index: {}]   ;;  %s7893_s18 = inlined_call_operand.vmem [shape: f32[1,128], index: 18, kind: input, shape index: {}]   ;;  %s7894_s19 = inlined_call_operand.vmem [shape: f32[1,128], index: 19, kind: input, shape index: {}]   ;;  %s7895_s20 = inlined_call_operand.hbm [shape: bf16[128,128], index: 20, kind: input, shape index: {}]   ;;  %s7896_s21 = inlined_call_operand.hbm [shape: f32[1,128], index: 21, kind: input, shape index: {}]   ;;  %s7897_s22 = inlined_call_operand.hbm [shape: f32[1,2,128], index: 22, kind: output, shape index: {}]  }
   0x1   :  { %7902 = sst [smem:[#allocation27_spill]] %s7875_s0 }
   0x2   :  { %7903 = sst [smem:[#allocation28_spill]] %s7876_s1 }
   0x3   :  { %7904 = sst [smem:[#allocation29_spill]] %s7877_s2 }
   0x4   :  { %7905 = sst [smem:[#allocation30_spill]] %s7878_s3 }
   0x5   :  { %7906 = sst [smem:[#allocation31_spill]] %s7879_s4 }
   0x6   :  { %7907 = sst [smem:[#allocation32_spill]] %s7880_s5 }
   0x7   :  { %7908 = sst [smem:[#allocation33_spill]] %s7881_s6 }
   0x8   :  { %27 = vsyncpa [#allocation3], 0 }
   0x9   :  { %28 = vsyncpa [#allocation6], 0 }
   0xa   :  { %29 = vsyncpa [#allocation9], 0 }
   0xb   :  { %30 = vsyncpa [#allocation12], 0 }
   0xc   :  { %31 = vsyncpa [#allocation15], 0 }
   0xd   :  { %32 = vsyncpa [#allocation18], 0 }
   0xe   :  { %33 = vsyncpa [#allocation4], 0  ;;  %s6926_s3 = smov [#allocation5]  }
   0xf   :  { %s57_s28 = sshll.u32 %s6926_s3, 4  ;;  %s58_s28 = int_to_ptr.vmem [resolvable:$true] %s57_s28 }
  0x10   :  { %s6700_s29 = scalar_lea.vmem %s58_s28, 6144  ;;  %p6705_p1 = scmp.lt.s32.totalorder %s58_s28, %s58_s28 }
  0x11   :  { %p6701_p0 = scmp.ne.s32.totalorder %s58_s28, %s6700_s29  ;;  %p6706_p2 = scmp.lt.s32.totalorder %s6700_s29, %s6700_s29 }
  0x13   :  { %p6707_p3 = por %p6706_p2, %p6705_p1 }
  0x15   :  { %p6708_p4 = pnand %p6707_p3, %p6701_p0 }
  0x17   :  { %6711 = shalt.err (!%p6708_p4)
}
  0x18   :  { %s6927_s30 = smov 64   ;;  %s6928_s4 = smov 4  }
  0x19   :  { %s7909_s1 = sld [smem:[#allocation31_spill]]  ;;  %s6929_s5 = smov [#allocation8]  }
  0x1a   :  { %s85_s24 = sshll.u32 %s6929_s5, 4  ;;  %s6930_s6 = smov [#allocation11]   ;;  %s86_s24 = int_to_ptr.vmem [resolvable:$true] %s85_s24 }
  0x1b   :  { %s115_s25 = sshll.u32 %s6930_s6, 4  ;;  %s6720_s26 = scalar_lea.vmem %s86_s24, 2048  ;;  %s116_s25 = int_to_ptr.vmem [resolvable:$true] %s115_s25 }
  0x1c   :  { %p6721_p5 = scmp.ne.s32.totalorder %s86_s24, %s6720_s26  ;;  %p6725_p6 = scmp.lt.s32.totalorder %s86_s24, %s86_s24 }
  0x1d   :  { %p6726_p7 = scmp.lt.s32.totalorder %s6720_s26, %s6720_s26 }
  0x1f   :  { %63 = dma.hbm_to_vmem [thread:$0]  %s7909_s1, 6144, %s58_s28, [#allocation6], %s6927_s30, %s6927_s30, %s6928_s4  }
  0x20   :  { %p6727_p8 = por %p6726_p7, %p6725_p6 }
  0x22   :  { %p6728_p9 = pnand %p6727_p8, %p6721_p5 }
  0x24   :  { %6731 = shalt.err (!%p6728_p9)
}
  0x25   :  { %91 = dma.hbm_to_vmem [thread:$0]  %s7883_s8, 2048, %s86_s24, [#allocation9], %s6927_s30, %s6927_s30, %s6928_s4  }
  0x26   :  { %s6740_s3 = scalar_lea.vmem %s116_s25, 64  ;;  %p6745_p11 = scmp.lt.s32.totalorder %s116_s25, %s116_s25 }
  0x27   :  { %p6741_p10 = scmp.ne.s32.totalorder %s116_s25, %s6740_s3  ;;  %p6746_p12 = scmp.lt.s32.totalorder %s6740_s3, %s6740_s3 }
  0x29   :  { %p6747_p13 = por %p6746_p12, %p6745_p11 }
  0x2b   :  { %p6748_p0 = pnand %p6747_p13, %p6741_p10 }
  0x2d   :  { %6751 = shalt.err (!%p6748_p0)
}
  0x2e   :  { %s7900_s28 = smov 32   ;;  %s6932_s29 = smov 2  }
  0x2f   :  { %121 = dma.hbm_to_vmem [thread:$0]  %s7888_s13, 64, %s116_s25, [#allocation12], %s7900_s28, %s7900_s28, %s6932_s29  }
  0x30   :  { %s6933_s1 = smov [#allocation14]  }
  0x31   :  { %s139_s5 = sshll.u32 %s6933_s1, 4  ;;  %s140_s5 = int_to_ptr.vmem [resolvable:$true] %s139_s5 }
  0x32   :  { %s6760_s8 = scalar_lea.vmem %s140_s5, 32  ;;  %p6765_p2 = scmp.lt.s32.totalorder %s140_s5, %s140_s5 }
  0x33   :  { %p6761_p1 = scmp.ne.s32.totalorder %s140_s5, %s6760_s8  ;;  %p6766_p3 = scmp.lt.s32.totalorder %s6760_s8, %s6760_s8 }
  0x35   :  { %p6767_p4 = por %p6766_p3, %p6765_p2 }
  0x37   :  { %p6768_p5 = pnand %p6767_p4, %p6761_p1 }
  0x39   :  { %6771 = shalt.err (!%p6768_p5)
}
  0x3a   :  { %s6934_s24 = smov 16   ;;  %s6935_s6 = smov 1  }
  0x3b   :  { %145 = dma.hbm_to_vmem [thread:$0]  %s7890_s15, 32, %s140_s5, [#allocation15], %s6934_s24, %s6934_s24, %s6935_s6  }
  0x3c   :  { %s6936_s27 = smov [#allocation2]  }
  0x3d   :  { %s39_s3 = sshll.u32 %s6936_s27, 4  ;;  %s40_s3 = int_to_ptr.vmem [resolvable:$true] %s39_s3 }
  0x3e   :  { %s6780_s13 = scalar_lea.vmem %s40_s3, 512  ;;  %p6785_p7 = scmp.lt.s32.totalorder %s40_s3, %s40_s3 }
  0x3f   :  { %p6781_p6 = scmp.ne.s32.totalorder %s40_s3, %s6780_s13  ;;  %p6786_p8 = scmp.lt.s32.totalorder %s6780_s13, %s6780_s13 }
  0x41   :  { %p6787_p9 = por %p6786_p8, %p6785_p7 }
  0x43   :  { %p6788_p10 = pnand %p6787_p9, %p6781_p6 }
  0x45   :  { %6791 = shalt.err (!%p6788_p10)
}
  0x46   :  { %s6937_s25 = smov 128   ;;  %s6938_s29 = smov 8  }
  0x47   :  { %s7910_s1 = sld [smem:[#allocation27_spill]]  ;;  %s6939_s15 = smov [#allocation7]  }
  0x48   :  { %s71_s5 = sshll.u32 %s6939_s15, 4  ;;  %s72_s5 = int_to_ptr.vmem [resolvable:$true] %s71_s5 }
  0x49   :  { %s6800_s8 = scalar_lea.vmem %s72_s5, 6144  ;;  %p6805_p12 = scmp.lt.s32.totalorder %s72_s5, %s72_s5 }
  0x4a   :  { %p6801_p11 = scmp.ne.s32.totalorder %s72_s5, %s6800_s8  ;;  %p6806_p13 = scmp.lt.s32.totalorder %s6800_s8, %s6800_s8 }
  0x4c   :  { %p6807_p0 = por %p6806_p13, %p6805_p12 }
  0x4d   :  { %45 = dma.hbm_to_vmem [thread:$0]  %s7910_s1, 512, %s40_s3, [#allocation3], %s6937_s25, %s6937_s25, %s6938_s29  }
  0x4e   :  { %p6808_p1 = pnand %p6807_p0, %p6801_p11 }
  0x50   :  { %6811 = shalt.err (!%p6808_p1)
}
  0x51   :  { %s6940_s24 = smov 192   ;;  %s6941_s6 = smov 12  }
  0x52   :  { %s7911_s27 = sld [smem:[#allocation33_spill]]  ;;  %s6942_s13 = smov [#allocation10]  }
  0x53   :  { %s103_s28 = sshll.u32 %s6942_s13, 4  ;;  %s6943_s0 = smov [#allocation13]   ;;  %s104_s28 = int_to_ptr.vmem [resolvable:$true] %s103_s28 }
  0x54   :  { %s127_s3 = sshll.u32 %s6943_s0, 4  ;;  %s6820_s23 = scalar_lea.vmem %s104_s28, 4096  ;;  %s128_s3 = int_to_ptr.vmem [resolvable:$true] %s127_s3 }
  0x55   :  { %p6821_p2 = scmp.ne.s32.totalorder %s104_s28, %s6820_s23  ;;  %p6825_p3 = scmp.lt.s32.totalorder %s104_s28, %s104_s28 }
  0x56   :  { %p6826_p4 = scmp.lt.s32.totalorder %s6820_s23, %s6820_s23 }
  0x58   :  { %77 = dma.hbm_to_vmem [thread:$0]  %s7911_s27, 6144, %s72_s5, [#allocation6], %s6940_s24, %s6940_s24, %s6941_s6  }
  0x59   :  { %p6827_p5 = por %p6826_p4, %p6825_p3 }
  0x5b   :  { %p6828_p6 = pnand %p6827_p5, %p6821_p2 }
  0x5d   :  { %6831 = shalt.err (!%p6828_p6)
}
  0x5e   :  { %109 = dma.hbm_to_vmem [thread:$0]  %s7887_s12, 4096, %s104_s28, [#allocation9], %s6937_s25, %s6937_s25, %s6938_s29  }
  0x5f   :  { %s6840_s5 = scalar_lea.vmem %s128_s3, 4096  ;;  %p6845_p8 = scmp.lt.s32.totalorder %s128_s3, %s128_s3 }
  0x60   :  { %p6841_p7 = scmp.ne.s32.totalorder %s128_s3, %s6840_s5  ;;  %p6846_p9 = scmp.lt.s32.totalorder %s6840_s5, %s6840_s5 }
  0x62   :  { %p6847_p10 = por %p6846_p9, %p6845_p8 }
  0x64   :  { %p6848_p11 = pnand %p6847_p10, %p6841_p7 }
  0x66   :  { %6851 = shalt.err (!%p6848_p11)
}
  0x67   :  { %133 = dma.hbm_to_vmem [thread:$0]  %s7889_s14, 4096, %s128_s3, [#allocation12], %s6927_s30, %s6927_s30, %s6928_s4  }
  0x68   :  { %s6944_s6 = smov [#allocation16]   ;;  %s6945_s2 = smov [#allocation17]  }
  0x69   :  { %s159_s26 = sshll.u32 %s6944_s6, 4  ;;  %s172_s27 = sshll.u32 %s6945_s2, 4  ;;  %s160_s26 = int_to_ptr.vmem [resolvable:$true] %s159_s26  ;;  %s173_s27 = int_to_ptr.vmem [resolvable:$true] %s172_s27 }
  0x6a   :  { %s6860_s12 = scalar_lea.vmem %s160_s26, 1024  ;;  %p6865_p13 = scmp.lt.s32.totalorder %s160_s26, %s160_s26 }
  0x6b   :  { %p6861_p12 = scmp.ne.s32.totalorder %s160_s26, %s6860_s12  ;;  %p6866_p0 = scmp.lt.s32.totalorder %s6860_s12, %s6860_s12 }
  0x6d   :  { %p6867_p1 = por %p6866_p0, %p6865_p13 }
  0x6f   :  { %p6868_p2 = pnand %p6867_p1, %p6861_p12 }
  0x71   :  { %6871 = shalt.err (!%p6868_p2)
}
  0x72   :  { %165 = dma.hbm_to_vmem [thread:$0]  %s7895_s20, 1024, %s160_s26, [#allocation15], %s6927_s30, %s6927_s30, %s6928_s4  }
  0x73   :  { %s6880_s14 = scalar_lea.vmem %s173_s27, 16  ;;  %s6884_s29 = scalar_lea.vmem %s173_s27, 32 }
  0x74   :  { %p6881_p3 = scmp.ne.s32.totalorder %s173_s27, %s6880_s14  ;;  %p6885_p4 = scmp.lt.s32.totalorder %s173_s27, %s173_s27 }
  0x75   :  { %p6886_p5 = scmp.lt.s32.totalorder %s6884_s29, %s6880_s14 }
  0x77   :  { %p6887_p6 = por %p6886_p5, %p6885_p4 }
  0x79   :  { %p6888_p7 = pnand %p6887_p6, %p6881_p3 }
  0x7b   :  { %6891 = shalt.err (!%p6888_p7)
}
  0x7c   :  { %175 = dma.hbm_to_vmem [thread:$0]  %s7896_s21, 16, %s173_s27, [#allocation18]  }
  0x7d   :  { %6912 = dma.done.wait [#allocation3], 512  }
  0x7e   :  { %6913 = vsyncadd [#allocation3], 4294966784 }
  0x7f   :  { %6914 = dma.done.wait [#allocation6], 12288  }
  0x80   :  { %6915 = vsyncadd [#allocation6], 4294955008 }
  0x81   :  { %6916 = dma.done.wait [#allocation9], 6144  }
  0x82   :  { %6917 = vsyncadd [#allocation9], 4294961152 }
  0x83   :  { %6918 = dma.done.wait [#allocation12], 4160  }
  0x84   :  { %6919 = vsyncadd [#allocation12], 4294963136 }
  0x85   :  { %6920 = dma.done.wait [#allocation15], 1056  }
  0x86   :  { %6921 = vsyncadd [#allocation15], 4294966240 }
  0x87   :  { %6922 = dma.done.wait [#allocation18], 16  }
  0x88   :  { %6923 = vsyncadd [#allocation18], 4294967280  ;;  %s7912_s3 = sld [smem:[#allocation28_spill]]  ;;  %v207_v1 = vld [vmem:[#allocation2] sm:$0xff]  ;;  %v208_v2 = vld [vmem:[#allocation2 + $0x8] sm:$0xff]  ;;  %vm228_vm0 = vcmask 130048   ;;  %v290_v33 = vlaneseq }
  0x89   :  { %v209_v3 = vld [vmem:[#allocation2 + $0x10] sm:$0xff]  ;;  %v213_v4 = vpack.c.bf16 %v208_v2, %v207_v1  ;;  %v210_v5 = vld [vmem:[#allocation2 + $0x18] sm:$0xff]  ;;  %v6320_v13 = vld [vmem:[#allocation5 + $0x68] sm:$0xff]   ;;  %s7913_s1 = sld [smem:[#allocation29_spill]]  ;;  %vm6946_vm5 = vmmov 1   ;;  %vm6949_vm14 = vmmov 0  }
  0x8a   :  { %v214_v6 = vpack.c.bf16 %v210_v5, %v209_v3  ;;  %v6314_v7 = vld [vmem:[#allocation5 + $0x78] sm:$0xff]   ;;  %v6317_v10 = vld [vmem:[#allocation5 + $0x70] sm:$0xff]   ;;  %v6321_v14 = vld [vmem:[#allocation5 + $0x28] sm:$0xff]   ;;  %v7122_v34 = vshrl.u32 %v290_v33, 7  ;;  %s7914_s8 = sld [smem:[#allocation30_spill]]  ;;  %vm1312_vm15 = vcmask 261120  }
  0x8b   :  { %5927 = vmatprep.mubr.msk.bf16.mxu0 %vm228_vm0, %v213_v4  ;;  %v6315_v8 = vld [vmem:[#allocation5 + $0x38] sm:$0xff]   ;;  %5668 = vmatprep.subr.bf16.mxu1 %v6314_v7  ;;  %v6318_v11 = vld [vmem:[#allocation5 + $0x30] sm:$0xff]   ;;  %v6322_v15 = vld [vmem:[#allocation5 + $0xa8] sm:$0xff]   ;;  %s7917_s27 = sld [smem:[#allocation32_spill]]  ;;  %s6950_s29 = smov 96  }
  0x8c   :  { %v6316_v9 = vld [vmem:[#allocation5 + $0xb8] sm:$0xff]   ;;  %5669 = vmatpush3.bf16.msra.mxu1 %v6315_v8  ;;  %v6319_v12 = vld [vmem:[#allocation5 + $0xb0] sm:$0xff]   ;;  %v6323_v16 = vld [vmem:[#allocation5 + $0x60] sm:$0xff]   ;;  %v7128_v39 = vadd.s32 8, %v7122_v34  ;;  %v302_v45 = vadd.s32 4294967295, %v7122_v34  ;;  %vm322_vm1 = vcmp.lt.s32.totalorder %v7122_v34, 7 }
  0x8d   :  { %5670 = vmatprep.subr.bf16.mxu1 %v6317_v10  ;;  %v6324_v17 = vld [vmem:[#allocation5 + $0x20] sm:$0xff]   ;;  %v6326_v19 = vld [vmem:[#allocation5 + $0x58] sm:$0xff]   ;;  %v6329_v22 = vld [vmem:[#allocation5 + $0x50] sm:$0xff]   ;;  %vm297_vm3 = vcmp.lt.s32.totalorder %v7122_v34, 1  ;;  %vm679_vm8 = vcmp.lt.s32.totalorder %v7122_v34, 6  ;;  %vm654_vm11 = vcmp.lt.s32.totalorder %v7122_v34, 2 }
  0x8e   :  { %v6313_v0 = vld [vmem:[%s7912_s3] sm:$0xff]   ;;  %v6327_v20 = vld [vmem:[#allocation5 + $0x18] sm:$0xff]   ;;  %v6330_v23 = vld [vmem:[#allocation5 + $0x10] sm:$0xff]   ;;  %v328_v49 = vadd.s32 1, %v7128_v39  ;;  %vm304_vm2 = vcmp.ge.s32.totalorder %v302_v45, 0  ;;  %s7922_s13 = smov 32  }
  0x8f   :  { %5925 = vmatprep.subr.bf16.mxu0 %v6313_v0  ;;  %v6325_v18 = vld [vmem:[#allocation5 + $0xa0] sm:$0xff]   ;;  %v6328_v21 = vld [vmem:[#allocation5 + $0x98] sm:$0xff]   ;;  %v6331_v24 = vld [vmem:[#allocation5 + $0x90] sm:$0xff]  }
  0x90   :  { %5926 = vmatpush3.bf16.msra.mxu0 %v6313_v0  ;;  %5671 = vmatpush3.bf16.msra.mxu1 %v6318_v11  ;;  %v6332_v25 = vld [vmem:[#allocation5 + $0x48] sm:$0xff]   ;;  %v6335_v28 = vld [vmem:[#allocation5 + $0x40] sm:$0xff]   ;;  %v6338_v31 = vld [vmem:[#allocation5 + $0x138] sm:$0xff]   ;;  %vm332_vm4 = vcmp.lt.s32.totalorder %v328_v49, 16 }
  0x91   :  { %5931 = vmatprep.subr.bf16.mxu0 %v6316_v9  ;;  %5672 = vmatprep.subr.bf16.mxu1 %v6320_v13  ;;  %v6333_v26 = vld [vmem:[#allocation5 + $0x8] sm:$0xff]   ;;  %v6336_v29 = vld [vmem:[#allocation5] sm:$0xff]   ;;  %v6339_v32 = vld [vmem:[#allocation5 + $0x178] sm:$0xff]  }
  0x92   :  { %v6334_v27 = vld [vmem:[#allocation5 + $0x88] sm:$0xff]   ;;  %v6337_v30 = vld [vmem:[#allocation5 + $0x80] sm:$0xff]   ;;  %vm7145_vm6 = vmpackc.low %vm6946_vm5, %vm304_vm2 }
  0x93   :  { %5928 = vmatmul.mubr.msk.bf16.vlgmr.msra.gmra.mxu0 %vm228_vm0, %v214_v6  ;;  %v5381_v35 = vld [vmem:[%s7913_s1] ss:$0 sm:$0xff]  ;;  %v285_v43 = vld [vmem:[%s7914_s8 + $0x8] sm:$0xff]  ;;  %vm5416_vm7 = vmpackc.low %vm332_vm4, %vm6946_vm5 }
  0x94   :  { %5932 = vmatpush3.bf16.msra.mxu0 %v6316_v9  ;;  %5673 = vmatpush3.bf16.msra.mxu1 %v6321_v14  ;;  %v284_v40 = vld [vmem:[%s7914_s8] sm:$0xff]  ;;  %v6340_v6 = vld [vmem:[#allocation5 + $0xf8] sm:$0xff]   ;;  %v6341_v13 = vld [vmem:[#allocation5 + $0x130] sm:$0xff]  }
  0x95   :  { %5933 = vmatprep.subr.bf16.mxu0 %v6319_v12  ;;  %5674 = vmatprep.subr.bf16.mxu1 %v6323_v16  ;;  %v6342_v14 = vld [vmem:[#allocation5 + $0x170] sm:$0xff]   ;;  %v6344_v16 = vld [vmem:[#allocation5 + $0x128] sm:$0xff]   ;;  %v6361_v33 = vld [vmem:[#allocation5 + $0xc0] sm:$0xff]  }
  0x98   :  { %5934 = vmatpush3.bf16.msra.mxu0 %v6319_v12  ;;  %5675 = vmatpush3.bf16.msra.mxu1 %v6324_v17  ;;  %v6345_v17 = vld [vmem:[#allocation5 + $0x168] sm:$0xff]  }
  0x99   :  { %5935 = vmatprep.subr.bf16.mxu0 %v6322_v15  ;;  %5676 = vmatprep.subr.bf16.mxu1 %v6326_v19  ;;  %v6347_v19 = vld [vmem:[#allocation5 + $0x120] sm:$0xff]  }
  0x9c   :  { %5936 = vmatpush3.bf16.msra.mxu0 %v6322_v15  ;;  %5677 = vmatpush3.bf16.msra.mxu1 %v6327_v20  ;;  %v6343_v15 = vld [vmem:[#allocation5 + $0xf0] sm:$0xff]   ;;  %v6348_v20 = vld [vmem:[#allocation5 + $0x160] sm:$0xff]  }
  0x9d   :  { %5937 = vmatprep.subr.bf16.mxu0 %v6325_v18  ;;  %5678 = vmatprep.subr.bf16.mxu1 %v6329_v22  ;;  %v6350_v22 = vld [vmem:[#allocation5 + $0x118] sm:$0xff]  }
  0xa0   :  { %5938 = vmatpush3.bf16.msra.mxu0 %v6325_v18  ;;  %5679 = vmatpush3.bf16.msra.mxu1 %v6330_v23  ;;  %v6346_v18 = vld [vmem:[#allocation5 + $0xe8] sm:$0xff]   ;;  %v6351_v23 = vld [vmem:[#allocation5 + $0x158] sm:$0xff]  }
  0xa1   :  { %5939 = vmatprep.subr.bf16.mxu0 %v6328_v21  ;;  %5680 = vmatprep.subr.bf16.mxu1 %v6332_v25  ;;  %v6353_v25 = vld [vmem:[#allocation5 + $0x110] sm:$0xff]  }
  0xa4   :  { %5940 = vmatpush3.bf16.msra.mxu0 %v6328_v21  ;;  %5681 = vmatpush3.bf16.msra.mxu1 %v6333_v26  ;;  %v6349_v21 = vld [vmem:[#allocation5 + $0xe0] sm:$0xff]   ;;  %v6354_v26 = vld [vmem:[#allocation5 + $0x150] sm:$0xff]  }
  0xa5   :  { %5941 = vmatprep.subr.bf16.mxu0 %v6331_v24  ;;  %5682 = vmatprep.subr.bf16.mxu1 %v6335_v28  ;;  %v6356_v28 = vld [vmem:[#allocation5 + $0x108] sm:$0xff]  }
  0xa8   :  { %5942 = vmatpush3.bf16.msra.mxu0 %v6331_v24  ;;  %5683 = vmatpush3.bf16.msra.mxu1 %v6336_v29  ;;  %v6352_v24 = vld [vmem:[#allocation5 + $0xd8] sm:$0xff]   ;;  %v6357_v29 = vld [vmem:[#allocation5 + $0x148] sm:$0xff]  }
  0xa9   :  { %5943 = vmatprep.subr.bf16.mxu0 %v6334_v27  ;;  %5706 = vmatprep.subr.bf16.mxu1 %v6338_v31  ;;  %v6359_v31 = vld [vmem:[#allocation5 + $0x100] sm:$0xff]  }
  0xac   :  { %5944 = vmatpush3.bf16.msra.mxu0 %v6334_v27  ;;  %v6355_v27 = vld [vmem:[#allocation5 + $0xd0] sm:$0xff]  }
  0xad   :  { %5945 = vmatprep.subr.bf16.mxu0 %v6337_v30 }
  0xb0   :  { %5946 = vmatpush3.bf16.msra.mxu0 %v6337_v30  ;;  %v6358_v30 = vld [vmem:[#allocation5 + $0xc8] sm:$0xff]  }
  0xb1   :  { %5951 = vmatprep.subr.bf16.mxu0 %v6339_v32 }
 0x153   :  { %v5929_v36 = vpop.f32.mrf.mxu0 }
 0x154   :  { %v278_v37 = vadd.f32 %v5929_v36, %v5381_v35  ;;  %v7166_v36 = vld [vmem:[#allocation7 + $0xb0] ss:$12 sps:$4 sm:$0xff]  }
 0x155   :  { %v269_v38 = vpop.f32.mrf.mxu0 }
 0x156   :  { %v270_v41 = vadd.f32 %v5381_v35, %v269_v38  ;;  %v288_v46 = vadd.f32 %v284_v40, %v278_v37 }
 0x157   :  { %v5930_v42 = vpop.f32.mrf.mxu0 }
 0x158   :  { %v281_v44 = vadd.f32 %v5930_v42, %v5381_v35  ;;  %v286_v47 = vadd.f32 %v284_v40, %v270_v41  ;;  %v320_v55 = vrot.slane %v288_v46, 1  ;;  %v295_v9 = vrot.slane %v288_v46, 7  ;;  %v5385_v42 = vld [vmem:[%s7917_s27] ss:$0 sm:$0xff] }
 0x159   :  { %v272_v48 = vpop.f32.mrf.mxu0 }
 0x15a   :  { %v289_v50 = vadd.f32 %v285_v43, %v281_v44  ;;  %v273_v51 = vadd.f32 %v5381_v35, %v272_v48  ;;  %v318_v56 = vrot.slane %v286_v47, 1  ;;  %v293_v57 = vrot.slane %v286_v47, 7  ;;  %v6364_v35 = vld [vmem:[#allocation7 + $0xac] ss:$12 sps:$4 sm:$0xff]  }
 0x15c   :  { %v296_v52 = vrot.slane %v289_v50, 7  ;;  %v321_v53 = vrot.slane %v289_v50, 1  ;;  %v287_v54 = vadd.f32 %v285_v43, %v273_v51  ;;  %v395_v7 = vpack.c.bf16 %v289_v50, %v288_v46 }
 0x15e   :  { %v294_v58 = vrot.slane %v287_v54, 7  ;;  %v319_v59 = vrot.slane %v287_v54, 1  ;;  %v323_v60 = vsel %vm322_vm1, %v320_v55, %v321_v53  ;;  %v326_v61 = vsel %vm322_vm1, %v321_v53, %v318_v56 }
 0x15f   :  { %v392_v62 = vpack.c.bf16 %v287_v54, %v286_v47  ;;  %v301_v1 = vsel %vm297_vm3, %v296_v52, %v293_v57  ;;  %v5420_v8 = vpack.c.bf16 %v326_v61, %v323_v60  ;;  %v298_v11 = vsel %vm297_vm3, %v295_v9, %v296_v52 }
 0x160   :  { %v300_v0 = vsel %vm297_vm3, %v293_v57, %v294_v58  ;;  %v324_v2 = vsel %vm322_vm1, %v319_v59, %v320_v55  ;;  %v325_v3 = vsel %vm322_vm1, %v318_v56, %v319_v59  ;;  %v299_v10 = vsel %vm297_vm3, %v294_v58, %v295_v9 }
 0x161   :  { %580 = vmatprep.mubr.bf16.mxu1 %v392_v62  ;;  %v5411_v4 = vpack.c.bf16 %v300_v0, %v301_v1  ;;  %v5417_v5 = vpack.c.bf16 %v324_v2, %v325_v3  ;;  %v5414_v12 = vpack.c.bf16 %v298_v11, %v299_v10  ;;  %v685_v61 = vadd.s32 2, %v7128_v39 }
 0x162   :  { %vm5193_vm1 = vcmask 1041408  }
 0x163   :  { %5412 = vmatmul.mubr.msk.bf16.vlgmr.msra.gmra.mxu1 %vm7145_vm6, %v5411_v4  ;;  %5947 = vmatprep.mubr.msk.bf16.mxu0 %vm5416_vm7, %v5417_v5  ;;  %vm689_vm9 = vcmp.lt.s32.totalorder %v685_v61, 16  ;;  %v659_v4 = vadd.s32 4294967294, %v7122_v34 }
 0x164   :  { %588 = vmatprep.mubr.bf16.mxu1 %v395_v7  ;;  %5948 = vmatmul.mubr.msk.bf16.vlgmr.msra.gmra.mxu0 %vm5416_vm7, %v5420_v8  ;;  %vm7180_vm10 = vmpackc.low %vm689_vm9, %vm6946_vm5 }
 0x165   :  { %5707 = vmatpush3.bf16.msra.mxu1 %v6340_v6  ;;  %5952 = vmatpush3.bf16.msra.mxu0 %v6339_v32  ;;  %v6360_v32 = vld [vmem:[#allocation5 + $0x140] sm:$0xff]   ;;  %vm661_vm12 = vcmp.ge.s32.totalorder %v659_v4, 0 }
 0x166   :  { %5708 = vmatprep.subr.bf16.mxu1 %v6341_v13  ;;  %5953 = vmatprep.subr.bf16.mxu0 %v6342_v14  ;;  %vm7192_vm13 = vmpackc.low %vm6946_vm5, %vm661_vm12 }
 0x169   :  { %5709 = vmatpush3.bf16.msra.mxu1 %v6343_v15  ;;  %5954 = vmatpush3.bf16.msra.mxu0 %v6342_v14 }
 0x16a   :  { %5710 = vmatprep.subr.bf16.mxu1 %v6344_v16  ;;  %5955 = vmatprep.subr.bf16.mxu0 %v6345_v17 }
 0x16b   :  { %5415 = vmatmul.mubr.msk.bf16.gmra.mxu1 %vm7145_vm6, %v5414_v12 }
 0x16d   :  { %5711 = vmatpush3.bf16.msra.mxu1 %v6346_v18  ;;  %5956 = vmatpush3.bf16.msra.mxu0 %v6345_v17 }
 0x16e   :  { %5712 = vmatprep.subr.bf16.mxu1 %v6347_v19  ;;  %5957 = vmatprep.subr.bf16.mxu0 %v6348_v20 }
 0x171   :  { %5713 = vmatpush3.bf16.msra.mxu1 %v6349_v21  ;;  %5958 = vmatpush3.bf16.msra.mxu0 %v6348_v20  ;;  %v6362_v21 = vld [vmem:[#allocation7 + $0xa8] ss:$12 sps:$4 sm:$0xff]  }
 0x172   :  { %5714 = vmatprep.subr.bf16.mxu1 %v6350_v22  ;;  %5959 = vmatprep.subr.bf16.mxu0 %v6351_v23 }
 0x175   :  { %5715 = vmatpush3.bf16.msra.mxu1 %v6352_v24  ;;  %5960 = vmatpush3.bf16.msra.mxu0 %v6351_v23  ;;  %v6367_v24 = vld [vmem:[#allocation7 + $0x94] ss:$12 sps:$4 sm:$0xff]  }
 0x176   :  { %5716 = vmatprep.subr.bf16.mxu1 %v6353_v25  ;;  %5961 = vmatprep.subr.bf16.mxu0 %v6354_v26 }
 0x179   :  { %5717 = vmatpush3.bf16.msra.mxu1 %v6355_v27  ;;  %5962 = vmatpush3.bf16.msra.mxu0 %v6354_v26  ;;  %v6375_v26 = vld [vmem:[#allocation7 + $0x98] ss:$12 sps:$4 sm:$0xff]  }
 0x17a   :  { %5718 = vmatprep.subr.bf16.mxu1 %v6356_v28  ;;  %5963 = vmatprep.subr.bf16.mxu0 %v6357_v29  ;;  %v6365_v28 = vld [vmem:[#allocation7 + $0x90] ss:$12 sps:$4 sm:$0xff]  }
 0x17d   :  { %5719 = vmatpush3.bf16.msra.mxu1 %v6358_v30  ;;  %5964 = vmatpush3.bf16.msra.mxu0 %v6357_v29  ;;  %v6370_v29 = vld [vmem:[#allocation7 + $0x7c] ss:$12 sps:$4 sm:$0xff]  }
 0x17e   :  { %5720 = vmatprep.subr.bf16.mxu1 %v6359_v31  ;;  %5965 = vmatprep.subr.bf16.mxu0 %v6360_v32 }
 0x181   :  { %5721 = vmatpush3.bf16.msra.mxu1 %v6361_v33  ;;  %5966 = vmatpush3.bf16.msra.mxu0 %v6360_v32  ;;  %v6368_v32 = vld [vmem:[#allocation7 + $0x78] ss:$12 sps:$4 sm:$0xff]  }
 0x182   :  { %1188 = vmatprep.subr.bf16.mxu1 %v6364_v35  ;;  %5971 = vmatprep.subr.bf16.mxu0 %v7166_v36  ;;  %v6374_v35 = vld [vmem:[#allocation7 + $0x64] ss:$12 sps:$4 sm:$0xff]  }
 0x223   :  { %v5684_v37 = vpop.f32.mrf.mxu1 }
 0x224   :  { %v5949_v38 = vpop.f32.mrf.mxu0 }
 0x225   :  { %v5685_v40 = vpop.f32.mrf.mxu1 }
 0x226   :  { %v5686_v41 = vadd.f32 %v5685_v40, %v5684_v37  ;;  %v631_v43 = vpop.f32.mrf.mxu0  ;;  %v6372_v37 = vld [vmem:[#allocation7 + $0x60] ss:$12 sps:$4 sm:$0xff]  }
 0x227   :  { %v5687_v44 = vpop.f32.mrf.mxu1  ;;  %v6379_v40 = vld [vmem:[#allocation7 + $0x80] ss:$12 sps:$4 sm:$0xff]  }
 0x228   :  { %v583_v45 = vadd.f32 %v5686_v41, %v5385_v42  ;;  %v5950_v46 = vpop.f32.mrf.mxu0  ;;  %v6382_v41 = vld [vmem:[#allocation7 + $0x34] ss:$12 sps:$4 sm:$0xff]  }
 0x229   :  { %v5688_v47 = vpop.f32.mrf.mxu1 }
 0x22a   :  { %v5689_v48 = vadd.f32 %v5688_v47, %v5687_v44  ;;  %v632_v51 = vadd.f32 %v631_v43, %v583_v45  ;;  %v634_v52 = vpop.f32.mrf.mxu0  ;;  %v6380_v43 = vld [vmem:[#allocation7 + $0x30] ss:$12 sps:$4 sm:$0xff]  }
 0x22b   :  { %v5690_v49 = vpop.f32.mrf.mxu1  ;;  %v6386_v44 = vld [vmem:[#allocation7 + $0x1c] ss:$12 sps:$4 sm:$0xff]   ;;  %v6390_v47 = vld [vmem:[#allocation7 + $0x4] ss:$12 sps:$4 sm:$0xff]  }
 0x22c   :  { %v586_v50 = vadd.f32 %v5689_v48, %v5385_v42  ;;  %v646_v59 = vmax.f32 %v632_v51, 0.0  ;;  %v6387_v45 = vld [vmem:[#allocation7 + $0x50] ss:$12 sps:$4 sm:$0xff]   ;;  %v6391_v48 = vld [vmem:[#allocation7 + $0x38] ss:$12 sps:$4 sm:$0xff]   ;;  %v6947_v51 = vmov 0  }
 0x22d   :  { %v5691_v53 = vpop.f32.mrf.mxu1 }
 0x22e   :  { %v635_v54 = vadd.f32 %v634_v52, %v586_v50  ;;  %v5692_v55 = vadd.f32 %v5691_v53, %v5690_v49  ;;  %v675_v5 = vrot.slane %v646_v59, 2  ;;  %v650_v13 = vrot.slane %v646_v59, 6  ;;  %v6388_v49 = vld [vmem:[#allocation7] ss:$12 sps:$4 sm:$0xff]   ;;  %v6393_v52 = vld [vmem:[#allocation7 + $0x8] ss:$12 sps:$4 sm:$0xff]  }
 0x22f   :  { %v5693_v56 = vpop.f32.mrf.mxu1  ;;  %v6392_v50 = vld [vmem:[#allocation7 + $0x20] ss:$12 sps:$4 sm:$0xff]  }
 0x230   :  { %v647_v57 = vmax.f32 %v635_v54, 0.0  ;;  %v591_v58 = vadd.f32 %v5692_v55, %v5385_v42 }
 0x231   :  { %v5694_v60 = vpop.f32.mrf.mxu1 }
 0x232   :  { %v640_v62 = vadd.f32 %v5949_v38, %v591_v58  ;;  %v5695_v63 = vadd.f32 %v5694_v60, %v5693_v56  ;;  %v750_v0 = vpack.c.bf16 %v647_v57, %v646_v59  ;;  %v676_v1 = vrot.slane %v647_v57, 2  ;;  %v6378_v38 = vld [vmem:[#allocation7 + $0x4c] ss:$12 sps:$4 sm:$0xff]   ;;  %v5423_v56 = vld [vmem:[%s7917_s27 + $0x1] ss:$0 sm:$0xff] }
 0x233   :  { %v651_v8 = vrot.slane %v647_v57, 6 }
 0x234   :  { %v648_v2 = vmax.f32 %v640_v62, 0.0  ;;  %v594_v3 = vadd.f32 %v5695_v63, %v5385_v42  ;;  %939 = vmatprep.mubr.bf16.mxu1 %v750_v0  ;;  %v682_v10 = vsel %vm679_vm8, %v675_v5, %v676_v1  ;;  %v6383_v42 = vld [vmem:[#allocation7 + $0x68] ss:$12 sps:$4 sm:$0xff]  }
 0x235   :  { %v657_v16 = vsel %vm654_vm11, %v650_v13, %v651_v8 }
 0x236   :  { %v677_v6 = vrot.slane %v648_v2, 2  ;;  %v643_v7 = vadd.f32 %v5950_v46, %v594_v3  ;;  %v652_v27 = vrot.slane %v648_v2, 6  ;;  %v6384_v46 = vld [vmem:[#allocation7 + $0x18] ss:$12 sps:$4 sm:$0xff]  }
 0x238   :  { %v649_v9 = vmax.f32 %v643_v7, 0.0  ;;  %v681_v39 = vsel %vm679_vm8, %v676_v1, %v677_v6  ;;  %v656_v31 = vsel %vm654_vm11, %v651_v8, %v652_v27 }
 0x239   :  { %v5455_v12 = vpack.c.bf16 %v681_v39, %v682_v10 }
 0x23a   :  { %v653_v14 = vrot.slane %v649_v9, 6  ;;  %v678_v15 = vrot.slane %v649_v9, 2  ;;  %v753_v25 = vpack.c.bf16 %v649_v9, %v648_v2 }
 0x23b   :  { %5967 = vmatprep.mubr.msk.bf16.mxu0 %vm7180_vm10, %v5455_v12 }
 0x23c   :  { %v658_v17 = vsel %vm654_vm11, %v653_v14, %v650_v13  ;;  %v680_v19 = vsel %vm679_vm8, %v677_v6, %v678_v15  ;;  %v683_v20 = vsel %vm679_vm8, %v678_v15, %v675_v5  ;;  %v655_v30 = vsel %vm654_vm11, %v652_v27, %v653_v14 }
 0x23d   :  { %v5449_v22 = vpack.c.bf16 %v657_v16, %v658_v17  ;;  %v5458_v23 = vpack.c.bf16 %v683_v20, %v680_v19  ;;  %v5452_v33 = vpack.c.bf16 %v655_v30, %v656_v31  ;;  %v6948_v19 = vmov 0.0  }
 0x23e   :  { %v7243_v20 = vsub.s32 1, %v7122_v34 }
 0x23f   :  { %5450 = vmatmul.mubr.msk.bf16.vlgmr.msra.gmra.mxu1 %vm7192_vm13, %v5449_v22  ;;  %5968 = vmatmul.mubr.msk.bf16.vlgmr.msra.gmra.mxu0 %vm7180_vm10, %v5458_v23  ;;  %v1043_v22 = vld [vmem:[%s7882_s7] sm:$0x7] }
 0x240   :  { %947 = vmatprep.mubr.bf16.mxu1 %v753_v25  ;;  %1189 = vmatpush1.bf16.msra.mxu1 %v6362_v21 }
 0x241   :  { %1190 = vmatprep.subr.bf16.mxu1 %v6367_v24  ;;  %5972 = vmatpush3.bf16.msra.mxu0 %v7166_v36  ;;  %v6376_v36 = vld [vmem:[#allocation7 + $0x48] ss:$12 sps:$4 sm:$0xff]   ;;  %v1052_v24 = vrot.slane %v1043_v22, %v7243_v20 }
 0x242   :  { %5973 = vmatprep.subr.bf16.mxu0 %v6375_v26 }
 0x244   :  { %1191 = vmatpush1.bf16.msra.mxu1 %v6365_v28  ;;  %v7251_v28 = vsub.s32 0, %v7122_v34 }
 0x245   :  { %1192 = vmatprep.subr.bf16.mxu1 %v6370_v29  ;;  %5974 = vmatpush3.bf16.msra.mxu0 %v6375_v26  ;;  %v1055_v26 = vsub.s32 2, %v7122_v34 }
 0x246   :  { %5975 = vmatprep.subr.bf16.mxu0 %v6379_v40 }
 0x247   :  { %5453 = vmatmul.mubr.msk.bf16.gmra.mxu1 %vm7192_vm13, %v5452_v33 }
 0x248   :  { %1193 = vmatpush1.bf16.msra.mxu1 %v6368_v32  ;;  %1220 = vmatprep.mubr.bf16.mxu1 %v6947_v51 }
 0x249   :  { %1194 = vmatprep.subr.bf16.mxu1 %v6374_v35  ;;  %5976 = vmatpush3.bf16.msra.mxu0 %v6379_v40  ;;  %v1056_v35 = vrot.slane %v1043_v22, %v1055_v26 }
 0x24a   :  { %5977 = vmatprep.subr.bf16.mxu0 %v6383_v42 }
 0x24c   :  { %1195 = vmatpush1.bf16.msra.mxu1 %v6372_v37 }
 0x24d   :  { %1196 = vmatprep.subr.bf16.mxu1 %v6378_v38  ;;  %5978 = vmatpush3.bf16.msra.mxu0 %v6383_v42  ;;  %v1048_v38 = vrot.slane %v1043_v22, %v7251_v28 }
 0x24e   :  { %5979 = vmatprep.subr.bf16.mxu0 %v6387_v45 }
 0x250   :  { %1197 = vmatpush1.bf16.msra.mxu1 %v6376_v36 }
 0x251   :  { %1198 = vmatprep.subr.bf16.mxu1 %v6382_v41  ;;  %5980 = vmatpush3.bf16.msra.mxu0 %v6387_v45 }
 0x252   :  { %5981 = vmatprep.subr.bf16.mxu0 %v6391_v48 }
 0x254   :  { %1199 = vmatpush1.bf16.msra.mxu1 %v6380_v43 }
 0x255   :  { %1200 = vmatprep.subr.bf16.mxu1 %v6386_v44  ;;  %5982 = vmatpush3.bf16.msra.mxu0 %v6391_v48 }
 0x256   :  { %5983 = vmatprep.subr.bf16.mxu0 %v6392_v50 }
 0x258   :  { %1201 = vmatpush1.bf16.msra.mxu1 %v6384_v46 }
 0x259   :  { %1202 = vmatprep.subr.bf16.mxu1 %v6390_v47  ;;  %5984 = vmatpush3.bf16.msra.mxu0 %v6392_v50 }
 0x25a   :  { %5985 = vmatprep.subr.bf16.mxu0 %v6393_v52 }
 0x25c   :  { %1203 = vmatpush1.bf16.msra.mxu1 %v6388_v49 }
 0x25d   :  { %5986 = vmatpush3.bf16.msra.mxu0 %v6393_v52  ;;  %6009 = vmatprep.subr.bf16.mxu1 %v6948_v19 }
 0x25e   :  { %5991 = vmatprep.subr.bf16.mxu0 %v6948_v19 }
 0x2ff   :  { %v5722_v53 = vpop.f32.mrf.mxu1  ;;  %v5969_v54 = vpop.f32.mrf.mxu0 }
 0x301   :  { %v5723_v55 = vpop.f32.mrf.mxu1  ;;  %v990_v57 = vpop.f32.mrf.mxu0 }
 0x302   :  { %v5724_v58 = vadd.f32 %v5723_v55, %v5722_v53 }
 0x303   :  { %v5725_v59 = vpop.f32.mrf.mxu1  ;;  %v5970_v61 = vpop.f32.mrf.mxu0 }
 0x304   :  { %v942_v60 = vadd.f32 %v5724_v58, %v5423_v56 }
 0x305   :  { %v5726_v62 = vpop.f32.mrf.mxu1  ;;  %v993_v3 = vpop.f32.mrf.mxu0 }
 0x306   :  { %v5727_v63 = vadd.f32 %v5726_v62, %v5725_v59  ;;  %v7215_v1 = vadd.f32 %v990_v57, %v942_v60 }
 0x307   :  { %v5728_v0 = vpop.f32.mrf.mxu1 }
 0x308   :  { %v945_v2 = vadd.f32 %v5727_v63, %v5423_v56  ;;  %v1005_v8 = vmax.f32 %v7215_v1, 0.0 }
 0x309   :  { %v5729_v4 = vpop.f32.mrf.mxu1 }
 0x30a   :  { %v7217_v5 = vadd.f32 %v993_v3, %v945_v2  ;;  %v5730_v6 = vadd.f32 %v5729_v4, %v5728_v0 }
 0x30b   :  { %v5731_v7 = vpop.f32.mrf.mxu1 }
 0x30c   :  { %v1006_v9 = vmax.f32 %v7217_v5, 0.0  ;;  %v950_v39 = vadd.f32 %v5730_v6, %v5423_v56 }
 0x30d   :  { %v5732_v10 = vpop.f32.mrf.mxu1 }
 0x30e   :  { %v1041_v11 = vpack.c.bf16 %v1006_v9, %v1005_v8  ;;  %v5733_v12 = vadd.f32 %v5732_v10, %v5731_v7  ;;  %v7225_v13 = vadd.f32 %v5969_v54, %v950_v39 }
 0x310   :  { %v953_v14 = vadd.f32 %v5733_v12, %v5423_v56  ;;  %1221 = vmatmul.mubr.bf16.vlgmr.msra.gmra.mxu1 %v1041_v11  ;;  %5987 = vmatprep.mubr.bf16.mxu0 %v1041_v11  ;;  %v1007_v16 = vmax.f32 %v7225_v13, 0.0 }
 0x311   :  { %1230 = vmatprep.mubr.bf16.mxu1 %v6947_v51 }
 0x312   :  { %v7228_v15 = vadd.f32 %v5970_v61, %v953_v14 }
 0x314   :  { %v1008_v17 = vmax.f32 %v7228_v15, 0.0 }
 0x316   :  { %v1042_v18 = vpack.c.bf16 %v1008_v17, %v1007_v16 }
 0x318   :  { %1231 = vmatmul.mubr.bf16.gmra.mxu1 %v1042_v18  ;;  %5988 = vmatmul.mubr.bf16.vlgmr.msra.gmra.mxu0 %v1042_v18 }
 0x319   :  { %5993 = vmatprep.mubr.msk.bf16.mxu0 %vm6949_vm14, %v6948_v19  ;;  %6011 = vmatprep.mubr.msk.bf16.mxu1 %vm6949_vm14, %v6948_v19 }
 0x3d0   :  { %v1222_v21 = vpop.f32.mrf.mxu1 }
 0x3d1   :  { %v1223_v47 = vadd.f32 %v1222_v21, %v1048_v38 }
 0x3d2   :  { %v1224_v23 = vpop.f32.mrf.mxu1 }
 0x3d3   :  { %v1225_v29 = vadd.f32 %v1224_v23, %v1052_v24 }
 0x3d4   :  { %v1226_v25 = vpop.f32.mrf.mxu1 }
 0x3d5   :  { %v1227_v43 = vadd.f32 %v1226_v25, %v1048_v38 }
 0x3d6   :  { %v1228_v27 = vpop.f32.mrf.mxu1 }
 0x3d7   :  { %v1229_v30 = vadd.f32 %v1228_v27, %v1052_v24  ;;  %v7263_v52 = vpack.c.bf16 %v1227_v43, %v1223_v47 }
 0x3d8   :  { %v1232_v31 = vpop.f32.mrf.mxu1  ;;  %v5989_v32 = vpop.f32.mrf.mxu0 }
 0x3d9   :  { %v7253_v33 = vpack.c.bf16 %v1229_v30, %v1225_v29  ;;  %v1284_v44 = vadd.f32 %v5989_v32, %v1056_v35  ;;  %v1233_v58 = vadd.f32 %v1232_v31, %v1048_v38 }
 0x3da   :  { %v1234_v37 = vpop.f32.mrf.mxu1  ;;  %v1275_v36 = vpop.f32.mrf.mxu0 }
 0x3db   :  { %v1317_v40 = vsel %vm1312_vm15, %v7253_v33, 0  ;;  %v1235_v48 = vadd.f32 %v1234_v37, %v1052_v24  ;;  %v1276_v59 = vadd.f32 %v1275_v36, %v1056_v35 }
 0x3dc   :  { %v1236_v41 = vpop.f32.mrf.mxu1  ;;  %v5990_v42 = vpop.f32.mrf.mxu0  ;;  %5992 = vmatpush3.bf16.xpose.msra.mxu0 %v1317_v40 }
 0x3dd   :  { %v1287_v45 = vadd.f32 %v5990_v42, %v1056_v35  ;;  %5997 = vmatprep.subr.bf16.mxu0 %v6948_v19  ;;  %v1237_v56 = vadd.f32 %v1236_v41, %v1048_v38 }
 0x3de   :  { %v1238_v46 = vpop.f32.mrf.mxu1  ;;  %v1278_v54 = vpop.f32.mrf.mxu0 }
 0x3df   :  { %v7261_v49 = vpack.c.bf16 %v1287_v45, %v1284_v44  ;;  %v1239_v50 = vadd.f32 %v1238_v46, %v1052_v24  ;;  %v1279_v57 = vadd.f32 %v1278_v54, %v1056_v35  ;;  %v7276_v60 = vpack.c.bf16 %v1237_v56, %v1233_v58 }
 0x3e1   :  { %v7265_v53 = vpack.c.bf16 %v1239_v50, %v1235_v48  ;;  %6010 = vmatpush3.bf16.msra.mxu1 %v7261_v49  ;;  %v7278_v61 = vpack.c.bf16 %v1279_v57, %v1276_v59 }
 0x3e2   :  { %6021 = vmatprep.subr.bf16.mxu1 %v6948_v19 }
 0x3e3   :  { %5994 = vmatmul.mubr.msk.bf16.vlgmr.msra.gmra.mxu0 %vm1312_vm15, %v7263_v52  ;;  %v1364_v55 = vsel %vm1312_vm15, %v7265_v53, 0 }
 0x3e4   :  { %5998 = vmatpush3.bf16.xpose.msra.mxu0 %v1364_v55  ;;  %5999 = vmatprep.mubr.msk.bf16.mxu0 %vm6949_vm14, %v6948_v19 }
 0x3e5   :  { %6003 = vmatprep.subr.bf16.mxu0 %v6948_v19 }
 0x3eb   :  { %6000 = vmatmul.mubr.msk.bf16.vlgmr.msra.gmra.mxu0 %vm1312_vm15, %v7276_v60 }
 0x3ec   :  { %6004 = vmatpush3.bf16.msra.mxu0 %v7278_v61  ;;  %6005 = vmatprep.mubr.msk.bf16.mxu0 %vm6949_vm14, %v6948_v19 }
 0x3ed   :  { %6015 = vmatprep.subr.bf16.mxu0 %v6948_v19 }
 0x4a3   :  { %v1353_v62 = vpop.f32.mrf.mxu0 }
 0x4a4   :  { %v1407_v63 = vmul.f32 0.17677669, %v1353_v62 }
 0x4a5   :  { %v5995_v0 = vpop.f32.mrf.mxu0 }
 0x4a6   :  { %v1411_v2 = vsel %vm228_vm0, %v1407_v63, -inf }
 0x4a7   :  { %1412 = vmax.xlane.f32.xlu0 %v1411_v2  ;;  %v1356_v3 = vpop.f32.mrf.mxu0 }
 0x4a8   :  { %v1408_v4 = vmul.f32 0.17677669, %v1356_v3 }
 0x4a9   :  { %v5996_v6 = vpop.f32.mrf.mxu0 }
 0x4aa   :  { %v1414_v7 = vsel %vm228_vm0, %v1408_v4, -inf }
 0x4ab   :  { %1415 = vmax.xlane.f32.xlu0 %v1414_v7  ;;  %v1400_v39 = vpop.f32.mrf.mxu0 }
 0x4ac   :  { %v1409_v10 = vmul.f32 0.17677669, %v1400_v39 }
 0x4ad   :  { %v6001_v11 = vpop.f32.mrf.mxu0 }
 0x4ae   :  { %v1417_v12 = vsel %vm228_vm0, %v1409_v10, -inf }
 0x4af   :  { %1418 = vmax.xlane.f32.xlu1 %v1417_v12  ;;  %v1403_v14 = vpop.f32.mrf.mxu0 }
 0x4b0   :  { %v1410_v18 = vmul.f32 0.17677669, %v1403_v14 }
 0x4b1   :  { %v6002_v21 = vpop.f32.mrf.mxu0 }
 0x4b2   :  { %v1420_v22 = vsel %vm228_vm0, %v1410_v18, -inf }
 0x4b3   :  { %1421 = vmax.xlane.f32.xlu1 %v1420_v22 }
 0x530   :  { %v1413_v23 = vpop.xlane.xlu0 %1412 }
 0x531   :  { %v1423_v24 = vsub.f32 %v1407_v63, %v1413_v23 }
 0x533   :  { %v1427_v25 = vmul.f32 1.442695, %v1423_v24 }
 0x534   :  { %v1416_v27 = vpop.xlane.xlu0 %1415 }
 0x535   :  { %6530 = vpow2.f32 %v1427_v25  ;;  %v1424_v29 = vsub.f32 %v1408_v4, %v1416_v27 }
 0x537   :  { %v1429_v30 = vmul.f32 1.442695, %v1424_v29 }
 0x538   :  { %v1419_v31 = vpop.xlane.xlu1 %1418 }
 0x539   :  { %6532 = vpow2.f32 %v1429_v30  ;;  %v1425_v32 = vsub.f32 %v1409_v10, %v1419_v31 }
 0x53b   :  { %v1431_v35 = vmul.f32 1.442695, %v1425_v32 }
 0x53c   :  { %v1422_v43 = vpop.xlane.xlu1 %1421 }
 0x53d   :  { %6534 = vpow2.f32 %v1431_v35  ;;  %v1426_v44 = vsub.f32 %v1410_v18, %v1422_v43 }
 0x53f   :  { %v1433_v45 = vmul.f32 1.442695, %v1426_v44 }
 0x541   :  { %6536 = vpow2.f32 %v1433_v45 }
 0x542   :  { %v6531_v37 = vpop.eup %6530 }
 0x543   :  { %v1435_v36 = vsel %vm228_vm0, %v6531_v37, 0.0 }
 0x544   :  { %1436 = vadd.xlane.f32.xlu0 %v1435_v36 }
 0x546   :  { %v6533_v38 = vpop.eup %6532 }
 0x547   :  { %v1438_v40 = vsel %vm228_vm0, %v6533_v38, 0.0 }
 0x548   :  { %1439 = vadd.xlane.f32.xlu1 %v1438_v40 }
 0x54a   :  { %v6535_v41 = vpop.eup %6534 }
 0x54b   :  { %v1441_v42 = vsel %vm228_vm0, %v6535_v41, 0.0 }
 0x54c   :  { %1442 = vadd.xlane.f32.xlu0 %v1441_v42 }
 0x54e   :  { %v6537_v46 = vpop.eup %6536 }
 0x54f   :  { %v1444_v47 = vsel %vm228_vm0, %v6537_v46, 0.0 }
 0x559   :  { %1604 = vrot.lane.b32.xlu1 %v7265_v53, %s6950_s29 }
 0x562   :  { %1551 = vrot.lane.b32.xlu0 %v7253_v33, %s6950_s29 }
 0x57d   :  { %1445 = vadd.xlane.f32.xlu1 %v1444_v47 }
 0x58e   :  { %1548 = vrot.lane.b32.xlu1 %v7263_v52, %s6950_s29 }
 0x592   :  { %1601 = vrot.lane.b32.xlu1 %v7276_v60, %s6950_s29 }
 0x5cd   :  { %v1437_v48 = vpop.xlane.xlu0 %1436 }
 0x5ce   :  { %6538 = vrcp.f32 %v1437_v48 }
 0x5d1   :  { %v1440_v50 = vpop.xlane.xlu1 %1439 }
 0x5d2   :  { %6540 = vrcp.f32 %v1440_v50 }
 0x5d5   :  { %v1443_v54 = vpop.xlane.xlu0 %1442  ;;  %v1605_v0 = vpop.permute.xlu1 %1604 }
 0x5d6   :  { %6542 = vrcp.f32 %v1443_v54  ;;  %v1610_v11 = vsel %vm1312_vm15, %v1605_v0, 0 }
 0x5d9   :  { %v1552_v59 = vpop.permute.xlu0 %1551 }
 0x5da   :  { %v1557_v63 = vsel %vm1312_vm15, %v1552_v59, 0 }
 0x5db   :  { %v6539_v55 = vpop.eup %6538 }
 0x5dc   :  { %v1451_v57 = vmul.f32 %v6539_v55, %v6531_v37 }
 0x5df   :  { %v6541_v56 = vpop.eup %6540 }
 0x5e0   :  { %v1452_v58 = vmul.f32 %v6541_v56, %v6533_v38 }
 0x5e2   :  { %v1455_v62 = vpack.c.bf16 %v1452_v58, %v1451_v57 }
 0x5e3   :  { %v6543_v4 = vpop.eup %6542 }
 0x5e4   :  { %6006 = vmatmul.mubr.msk.bf16.vlgmr.msra.gmra.mxu0 %vm228_vm0, %v1455_v62  ;;  %v1453_v7 = vmul.f32 %v6543_v4, %v6535_v41 }
 0x5e5   :  { %6016 = vmatpush3.bf16.xpose.msra.mxu0 %v1557_v63  ;;  %6017 = vmatprep.mubr.msk.bf16.mxu0 %vm6949_vm14, %v6948_v19 }
 0x5e6   :  { %6027 = vmatprep.subr.bf16.mxu0 %v6948_v19 }
 0x606   :  { %v1446_v2 = vpop.xlane.xlu1 %1445 }
 0x607   :  { %6544 = vrcp.f32 %v1446_v2 }
 0x60a   :  { %v1549_v3 = vpop.permute.xlu1 %1548 }
 0x60b   :  { %6018 = vmatmul.mubr.msk.bf16.vlgmr.msra.gmra.mxu0 %vm1312_vm15, %v1549_v3 }
 0x60c   :  { %6029 = vmatprep.mubr.msk.bf16.mxu0 %vm6949_vm14, %v6948_v19 }
 0x60e   :  { %v1602_v12 = vpop.permute.xlu1 %1601 }
 0x614   :  { %v6545_v6 = vpop.eup %6544 }
 0x615   :  { %v1454_v39 = vmul.f32 %v6545_v6, %v6537_v46 }
 0x617   :  { %v1456_v10 = vpack.c.bf16 %v1454_v39, %v1453_v7 }
 0x619   :  { %6012 = vmatmul.mubr.msk.bf16.vlgmr.msra.gmra.mxu1 %vm228_vm0, %v1456_v10 }
 0x61a   :  { %6022 = vmatpush3.bf16.xpose.msra.mxu1 %v1610_v11  ;;  %6023 = vmatprep.mubr.msk.bf16.mxu1 %vm6949_vm14, %v6948_v19 }
 0x61b   :  { %6033 = vmatprep.subr.bf16.mxu1 %v6948_v19 }
 0x621   :  { %6024 = vmatmul.mubr.msk.bf16.vlgmr.msra.gmra.mxu1 %vm1312_vm15, %v1602_v12 }
 0x622   :  { %6035 = vmatprep.mubr.msk.bf16.mxu1 %vm6949_vm14, %v6948_v19 }
 0x6a4   :  { %v7318_v14 = vpop.f32.mrf.mxu0 }
 0x6a6   :  { %v6007_v18 = vpop.f32.mrf.mxu0 }
 0x6a8   :  { %v7320_v21 = vpop.f32.mrf.mxu0 }
 0x6a9   :  { %v1545_v22 = vpack.c.bf16 %v7320_v21, %v7318_v14  ;;  %v6396_v21 = vld [vmem:[#allocation8 + $0x18] sm:$0xff]  }
 0x6aa   :  { %v6008_v23 = vpop.f32.mrf.mxu0 }
 0x6cb   :  { %v1593_v24 = vpop.f32.mrf.mxu0 }
 0x6cc   :  { %v1653_v25 = vmul.f32 0.17677669, %v1593_v24 }
 0x6cd   :  { %v6019_v27 = vpop.f32.mrf.mxu0 }
 0x6ce   :  { %v1657_v29 = vsel %vm228_vm0, %v1653_v25, -inf }
 0x6cf   :  { %1658 = vmax.xlane.f32.xlu0 %v1657_v29  ;;  %v1596_v30 = vpop.f32.mrf.mxu0 }
 0x6d0   :  { %v1654_v31 = vmul.f32 0.17677669, %v1596_v30 }
 0x6d1   :  { %v6020_v32 = vpop.f32.mrf.mxu0 }
 0x6d2   :  { %v1660_v35 = vsel %vm228_vm0, %v1654_v31, -inf }
 0x6d3   :  { %1661 = vmax.xlane.f32.xlu1 %v1660_v35 }
 0x6d9   :  { %v7326_v37 = vpop.f32.mrf.mxu1 }
 0x6db   :  { %v6013_v36 = vpop.f32.mrf.mxu1 }
 0x6dd   :  { %v7328_v38 = vpop.f32.mrf.mxu1 }
 0x6de   :  { %v1546_v40 = vpack.c.bf16 %v7328_v38, %v7326_v37 }
 0x6df   :  { %v6014_v41 = vpop.f32.mrf.mxu1 }
 0x6e1   :  { %v1646_v42 = vpop.f32.mrf.mxu1 }
 0x6e2   :  { %v1655_v43 = vmul.f32 0.17677669, %v1646_v42  ;;  %v6394_v42 = vld [vmem:[#allocation8 + $0x8] sm:$0xff]  }
 0x6e3   :  { %v6025_v44 = vpop.f32.mrf.mxu1 }
 0x6e4   :  { %v1663_v45 = vsel %vm228_vm0, %v1655_v43, -inf }
 0x6e5   :  { %v1649_v46 = vpop.f32.mrf.mxu1  ;;  %1664 = vmax.xlane.f32.xlu0 %v1663_v45 }
 0x6e6   :  { %v1656_v47 = vmul.f32 0.17677669, %v1649_v46 }
 0x6e7   :  { %v6026_v48 = vpop.f32.mrf.mxu1 }
 0x6e8   :  { %v1666_v50 = vsel %vm228_vm0, %v1656_v47, -inf }
 0x6e9   :  { %1667 = vmax.xlane.f32.xlu0 %v1666_v50  ;;  %v6395_v50 = vld [vmem:[#allocation8] sm:$0xff]  }
 0x758   :  { %v1659_v54 = vpop.xlane.xlu0 %1658 }
 0x759   :  { %v1669_v55 = vsub.f32 %v1653_v25, %v1659_v54 }
 0x75b   :  { %v1673_v56 = vmul.f32 1.442695, %v1669_v55 }
 0x75c   :  { %v1662_v57 = vpop.xlane.xlu1 %1661 }
 0x75d   :  { %6546 = vpow2.f32 %v1673_v56  ;;  %v1670_v58 = vsub.f32 %v1654_v31, %v1662_v57 }
 0x75f   :  { %v1675_v59 = vmul.f32 1.442695, %v1670_v58 }
 0x761   :  { %6548 = vpow2.f32 %v1675_v59 }
 0x76a   :  { %v6547_v62 = vpop.eup %6546 }
 0x76b   :  { %v1681_v63 = vsel %vm228_vm0, %v6547_v62, 0.0 }
 0x76c   :  { %1682 = vadd.xlane.f32.xlu0 %v1681_v63 }
 0x76e   :  { %v6549_v0 = vpop.eup %6548  ;;  %v1665_v2 = vpop.xlane.xlu0 %1664 }
 0x76f   :  { %v1671_v3 = vsub.f32 %v1655_v43, %v1665_v2  ;;  %v1684_v4 = vsel %vm228_vm0, %v6549_v0, 0.0 }
 0x770   :  { %1685 = vadd.xlane.f32.xlu1 %v1684_v4 }
 0x771   :  { %v1677_v6 = vmul.f32 1.442695, %v1671_v3 }
 0x772   :  { %v1668_v7 = vpop.xlane.xlu0 %1667 }
 0x773   :  { %6550 = vpow2.f32 %v1677_v6  ;;  %v1672_v39 = vsub.f32 %v1656_v47, %v1668_v7 }
 0x775   :  { %v1679_v10 = vmul.f32 1.442695, %v1672_v39 }
 0x777   :  { %6552 = vpow2.f32 %v1679_v10 }
 0x780   :  { %v6551_v11 = vpop.eup %6550 }
 0x781   :  { %v1687_v12 = vsel %vm228_vm0, %v6551_v11, 0.0 }
 0x782   :  { %1688 = vadd.xlane.f32.xlu0 %v1687_v12 }
 0x784   :  { %v6553_v18 = vpop.eup %6552 }
 0x785   :  { %v1690_v23 = vsel %vm228_vm0, %v6553_v18, 0.0 }
 0x786   :  { %1691 = vadd.xlane.f32.xlu1 %v1690_v23 }
 0x797   :  { %1752 = vrot.lane.b32.xlu1 %v7261_v49, %s6950_s29 }
 0x798   :  { %1704 = vrot.lane.b32.xlu0 %v7278_v61, %s6950_s29 }
 0x79b   :  { %1937 = vrot.lane.b32.xlu1 %v7253_v33, %s6927_s30 }
 0x79c   :  { %1935 = vrot.lane.b32.xlu0 %v7263_v52, %s6927_s30 }
 0x79f   :  { %1988 = vrot.lane.b32.xlu1 %v7265_v53, %s6927_s30 }
 0x7a3   :  { %1986 = vrot.lane.b32.xlu1 %v7276_v60, %s6927_s30 }
 0x7f5   :  { %v1683_v25 = vpop.xlane.xlu0 %1682 }
 0x7f9   :  { %v1686_v24 = vpop.xlane.xlu1 %1685 }
 0x7fa   :  { %6554 = vrcp.f32 %v1686_v24 }
 0x7fb   :  { %6556 = vrcp.f32 %v1683_v25 }
 0x807   :  { %v6555_v27 = vpop.eup %6554 }
 0x808   :  { %v6557_v30 = vpop.eup %6556  ;;  %v1698_v31 = vmul.f32 %v6555_v27, %v6549_v0 }
 0x809   :  { %v1697_v36 = vmul.f32 %v6557_v30, %v6547_v62 }
 0x80b   :  { %v1689_v29 = vpop.xlane.xlu0 %1688  ;;  %v1701_v41 = vpack.c.bf16 %v1698_v31, %v1697_v36 }
 0x80c   :  { %6558 = vrcp.f32 %v1689_v29 }
 0x80f   :  { %v1705_v32 = vpop.permute.xlu0 %1704  ;;  %v1692_v35 = vpop.xlane.xlu1 %1691 }
 0x810   :  { %6560 = vrcp.f32 %v1692_v35  ;;  %6028 = vmatpush3.bf16.msra.mxu0 %v1705_v32 }
 0x811   :  { %6039 = vmatprep.subr.bf16.mxu0 %v6396_v21 }
 0x813   :  { %6030 = vmatmul.mubr.msk.bf16.vlgmr.msra.gmra.mxu0 %vm228_vm0, %v1701_v41  ;;  %v1753_v43 = vpop.permute.xlu1 %1752  ;;  %v1936_v39 = vpop.permute.xlu0 %1935 }
 0x814   :  { %6034 = vmatpush3.bf16.msra.mxu1 %v1753_v43  ;;  %6040 = vmatpush3.bf16.msra.mxu0 %v6396_v21 }
 0x815   :  { %6047 = vmatprep.subr.bf16.mxu1 %v6394_v42 }
 0x817   :  { %v1938_v54 = vpop.permute.xlu1 %1937 }
 0x818   :  { %v1943_v3 = vsel %vm1312_vm15, %v1938_v54, 0 }
 0x819   :  { %v6559_v44 = vpop.eup %6558 }
 0x81a   :  { %v1699_v46 = vmul.f32 %v6559_v44, %v6551_v11 }
 0x81b   :  { %v1989_v55 = vpop.permute.xlu1 %1988 }
 0x81c   :  { %v1994_v56 = vsel %vm1312_vm15, %v1989_v55, 0 }
 0x81d   :  { %v6561_v45 = vpop.eup %6560 }
 0x81e   :  { %v1700_v47 = vmul.f32 %v6561_v45, %v6553_v18 }
 0x81f   :  { %v1987_v14 = vpop.permute.xlu1 %1986 }
 0x820   :  { %v1702_v48 = vpack.c.bf16 %v1700_v47, %v1699_v46 }
 0x822   :  { %6036 = vmatmul.mubr.msk.bf16.vlgmr.msra.gmra.mxu1 %vm228_vm0, %v1702_v48 }
 0x823   :  { %6048 = vmatpush3.bf16.msra.mxu1 %v6394_v42  ;;  %6051 = vmatprep.mubr.msk.bf16.mxu1 %vm1312_vm15, %v1545_v22  ;;  %v6397_v22 = vld [vmem:[#allocation8 + $0x10] sm:$0xff]  }
 0x824   :  { %6049 = vmatprep.subr.bf16.mxu1 %v6395_v50  ;;  %6041 = vmatprep.subr.bf16.mxu0 %v6397_v22 }
 0x825   :  { %6042 = vmatpush3.bf16.msra.mxu0 %v6397_v22 }
 0x826   :  { %6055 = vmatprep.subr.bf16.mxu0 %v6948_v19 }
 0x827   :  { %6050 = vmatpush3.bf16.msra.mxu1 %v6395_v50 }
 0x828   :  { %6061 = vmatprep.subr.bf16.mxu1 %v6948_v19 }
 0x82a   :  { %6052 = vmatmul.mubr.msk.bf16.vlgmr.msra.gmra.mxu1 %vm1312_vm15, %v1546_v40 }
 0x82b   :  { %6062 = vmatpush3.bf16.xpose.msra.mxu1 %v1994_v56  ;;  %6063 = vmatprep.mubr.msk.bf16.mxu1 %vm6949_vm14, %v6948_v19 }
 0x82c   :  { %6073 = vmatprep.subr.bf16.mxu1 %v6948_v19 }
 0x832   :  { %6064 = vmatmul.mubr.msk.bf16.vlgmr.msra.gmra.mxu1 %vm1312_vm15, %v1987_v14 }
 0x833   :  { %6075 = vmatprep.mubr.msk.bf16.mxu1 %vm6949_vm14, %v6948_v19 }
 0x8d3   :  { %v1744_v37 = vpop.f32.mrf.mxu0 }
 0x8d5   :  { %v6031_v38 = vpop.f32.mrf.mxu0 }
 0x8d7   :  { %v1747_v40 = vpop.f32.mrf.mxu0 }
 0x8d8   :  { %v1799_v57 = vpack.c.bf16 %v1747_v40, %v1744_v37 }
 0x8d9   :  { %v6032_v58 = vpop.f32.mrf.mxu0 }
 0x8da   :  { %6043 = vmatprep.mubr.msk.bf16.mxu0 %vm1312_vm15, %v1799_v57 }
 0x8e2   :  { %v1792_v59 = vpop.f32.mrf.mxu1 }
 0x8e4   :  { %v6037_v62 = vpop.f32.mrf.mxu1 }
 0x8e6   :  { %v1795_v63 = vpop.f32.mrf.mxu1 }
 0x8e7   :  { %v1800_v0 = vpack.c.bf16 %v1795_v63, %v1792_v59 }
 0x8e8   :  { %v6038_v2 = vpop.f32.mrf.mxu1 }
 0x8e9   :  { %6044 = vmatmul.mubr.msk.bf16.vlgmr.msra.gmra.mxu0 %vm1312_vm15, %v1800_v0 }
 0x8ea   :  { %6056 = vmatpush3.bf16.xpose.msra.mxu0 %v1943_v3  ;;  %v7372_v4 = vpop.f32.mrf.mxu1  ;;  %6057 = vmatprep.mubr.msk.bf16.mxu0 %vm6949_vm14, %v6948_v19 }
 0x8eb   :  { %6067 = vmatprep.subr.bf16.mxu0 %v6948_v19 }
 0x8ec   :  { %v7377_v6 = vpop.f32.mrf.mxu1 }
 0x8ee   :  { %v7379_v7 = vpop.f32.mrf.mxu1 }
 0x8f0   :  { %v7381_v10 = vpop.f32.mrf.mxu1 }
 0x8f1   :  { %6058 = vmatmul.mubr.msk.bf16.vlgmr.msra.gmra.mxu0 %vm1312_vm15, %v1936_v39 }
 0x8f2   :  { %v2030_v11 = vpop.f32.mrf.mxu1  ;;  %6069 = vmatprep.mubr.msk.bf16.mxu0 %vm6949_vm14, %v6948_v19 }
 0x8f3   :  { %v2039_v35 = vmul.f32 0.17677669, %v2030_v11 }
 0x8f4   :  { %v6065_v12 = vpop.f32.mrf.mxu1 }
 0x8f5   :  { %v2047_v45 = vsel %vm228_vm0, %v2039_v35, -inf }
 0x8f6   :  { %v2033_v18 = vpop.f32.mrf.mxu1 }
 0x8f7   :  { %v2040_v44 = vmul.f32 0.17677669, %v2033_v18 }
 0x8f8   :  { %v6066_v23 = vpop.f32.mrf.mxu1 }
 0x8f9   :  { %v2050_v47 = vsel %vm228_vm0, %v2040_v44, -inf }
 0x9a9   :  { %v7386_v24 = vpop.f32.mrf.mxu0 }
 0x9ab   :  { %v7388_v25 = vpop.f32.mrf.mxu0 }
 0x9ad   :  { %v7390_v27 = vpop.f32.mrf.mxu0 }
 0x9af   :  { %v7392_v29 = vpop.f32.mrf.mxu0 }
 0x9b1   :  { %v1979_v30 = vpop.f32.mrf.mxu0 }
 0x9b2   :  { %v2037_v31 = vmul.f32 0.17677669, %v1979_v30 }
 0x9b3   :  { %v6059_v32 = vpop.f32.mrf.mxu0 }
 0x9b4   :  { %v2041_v36 = vsel %vm228_vm0, %v2037_v31, -inf }
 0x9b5   :  { %2042 = vmax.xlane.f32.xlu0 %v2041_v36  ;;  %v1982_v41 = vpop.f32.mrf.mxu0 }
 0x9b6   :  { %v2038_v42 = vmul.f32 0.17677669, %v1982_v41 }
 0x9b7   :  { %v6060_v43 = vpop.f32.mrf.mxu0 }
 0x9b8   :  { %v2044_v46 = vsel %vm228_vm0, %v2038_v42, -inf }
 0x9b9   :  { %2048 = vmax.xlane.f32.xlu0 %v2047_v45  ;;  %2045 = vmax.xlane.f32.xlu1 %v2044_v46 }
 0x9bd   :  { %2051 = vmax.xlane.f32.xlu0 %v2050_v47  ;;  %v6398_v47 = vld [vmem:[#allocation8 + $0x28] sm:$0xff]  }
 0xa3e   :  { %v2043_v48 = vpop.xlane.xlu0 %2042 }
 0xa3f   :  { %v2053_v50 = vsub.f32 %v2037_v31, %v2043_v48  ;;  %v6399_v48 = vld [vmem:[#allocation8 + $0x20] sm:$0xff]  }
 0xa41   :  { %v2057_v14 = vmul.f32 1.442695, %v2053_v50 }
 0xa42   :  { %v2049_v54 = vpop.xlane.xlu0 %2048  ;;  %v2046_v55 = vpop.xlane.xlu1 %2045 }
 0xa43   :  { %v2055_v56 = vsub.f32 %v2039_v35, %v2049_v54  ;;  %v2054_v22 = vsub.f32 %v2038_v42, %v2046_v55 }
 0xa45   :  { %v2061_v21 = vmul.f32 1.442695, %v2055_v56  ;;  %v2059_v40 = vmul.f32 1.442695, %v2054_v22 }
 0xa46   :  { %v2052_v37 = vpop.xlane.xlu0 %2051 }
 0xa47   :  { %6562 = vpow2.f32 %v2061_v21  ;;  %v2056_v38 = vsub.f32 %v2040_v44, %v2052_v37 }
 0xa48   :  { %6564 = vpow2.f32 %v2057_v14 }
 0xa49   :  { %v2063_v57 = vmul.f32 1.442695, %v2056_v38 }
 0xa4b   :  { %6566 = vpow2.f32 %v2063_v57 }
 0xa4c   :  { %6568 = vpow2.f32 %v2059_v40 }
 0xa54   :  { %v6563_v58 = vpop.eup %6562 }
 0xa55   :  { %v2071_v59 = vsel %vm228_vm0, %v6563_v58, 0.0  ;;  %v6565_v62 = vpop.eup %6564 }
 0xa56   :  { %2072 = vadd.xlane.f32.xlu0 %v2071_v59  ;;  %v2065_v0 = vsel %vm228_vm0, %v6565_v62, 0.0 }
 0xa58   :  { %v6567_v63 = vpop.eup %6566 }
 0xa59   :  { %v2074_v2 = vsel %vm228_vm0, %v6567_v63, 0.0  ;;  %v6569_v3 = vpop.eup %6568 }
 0xa5a   :  { %2066 = vadd.xlane.f32.xlu0 %v2065_v0  ;;  %2075 = vadd.xlane.f32.xlu1 %v2074_v2  ;;  %v2068_v39 = vsel %vm228_vm0, %v6569_v3, 0.0 }
 0xa5e   :  { %2069 = vadd.xlane.f32.xlu1 %v2068_v39 }
 0xa6f   :  { %2134 = vrot.lane.b32.xlu1 %v7261_v49, %s6927_s30 }
 0xa70   :  { %2087 = vrot.lane.b32.xlu0 %v7278_v61, %s6927_s30 }
 0xa73   :  { %2256 = vrot.lane.b32.xlu1 %v7253_v33, %s7922_s13 }
 0xa74   :  { %2254 = vrot.lane.b32.xlu0 %v7263_v52, %s7922_s13 }
 0xa77   :  { %2307 = vrot.lane.b32.xlu1 %v7265_v53, %s7922_s13 }
 0xa7b   :  { %2305 = vrot.lane.b32.xlu1 %v7276_v60, %s7922_s13 }
 0xadf   :  { %v2073_v11 = vpop.xlane.xlu0 %2072 }
 0xae0   :  { %6570 = vrcp.f32 %v2073_v11 }
 0xae3   :  { %v2067_v12 = vpop.xlane.xlu0 %2066  ;;  %v2076_v18 = vpop.xlane.xlu1 %2075 }
 0xae4   :  { %6572 = vrcp.f32 %v2076_v18 }
 0xae5   :  { %6574 = vrcp.f32 %v2067_v12 }
 0xae7   :  { %v2088_v23 = vpop.permute.xlu0 %2087  ;;  %v2070_v30 = vpop.xlane.xlu1 %2069 }
 0xae8   :  { %6576 = vrcp.f32 %v2070_v30  ;;  %6068 = vmatpush3.bf16.msra.mxu0 %v2088_v23 }
 0xae9   :  { %6079 = vmatprep.subr.bf16.mxu0 %v6398_v47 }
 0xaeb   :  { %v2135_v33 = vpop.permute.xlu1 %2134  ;;  %v2255_v46 = vpop.permute.xlu0 %2254 }
 0xaec   :  { %6074 = vmatpush3.bf16.msra.mxu1 %v2135_v33 }
 0xaed   :  { %6087 = vmatprep.subr.bf16.mxu1 %v6948_v19  ;;  %v6571_v52 = vpop.eup %6570 }
 0xaee   :  { %v2083_v32 = vmul.f32 %v6571_v52, %v6563_v58 }
 0xaef   :  { %v2257_v60 = vpop.permute.xlu1 %2256 }
 0xaf0   :  { %v2262_v44 = vsel %vm1312_vm15, %v2257_v60, 0 }
 0xaf1   :  { %v6573_v31 = vpop.eup %6572 }
 0xaf2   :  { %v6575_v53 = vpop.eup %6574  ;;  %v2084_v35 = vmul.f32 %v6573_v31, %v6567_v63 }
 0xaf3   :  { %v2081_v42 = vmul.f32 %v6575_v53, %v6565_v62  ;;  %v2308_v37 = vpop.permute.xlu1 %2307 }
 0xaf4   :  { %v2086_v41 = vpack.c.bf16 %v2084_v35, %v2083_v32  ;;  %v2313_v63 = vsel %vm1312_vm15, %v2308_v37, 0  ;;  %v1929_v32 = vadd.f32 %v7372_v4, %v7386_v24 }
 0xaf5   :  { %v6577_v36 = vpop.eup %6576 }
 0xaf6   :  { %v2082_v43 = vmul.f32 %v6577_v36, %v6569_v3  ;;  %6076 = vmatmul.mubr.msk.bf16.vlgmr.msra.gmra.mxu1 %vm228_vm0, %v2086_v41  ;;  %v1921_v36 = vadd.f32 %v7377_v6, %v7388_v25 }
 0xaf7   :  { %6088 = vmatpush3.bf16.xpose.msra.mxu1 %v2262_v44  ;;  %6089 = vmatprep.mubr.msk.bf16.mxu1 %vm6949_vm14, %v6948_v19  ;;  %v2306_v12 = vpop.permute.xlu1 %2305 }
 0xaf8   :  { %v2085_v45 = vpack.c.bf16 %v2082_v43, %v2081_v42  ;;  %6099 = vmatprep.subr.bf16.mxu1 %v6948_v19  ;;  %v1932_v43 = vadd.f32 %v7379_v7, %v7390_v27 }
 0xafa   :  { %6070 = vmatmul.mubr.msk.bf16.vlgmr.msra.gmra.mxu0 %vm228_vm0, %v2085_v45 }
 0xafb   :  { %6080 = vmatpush3.bf16.msra.mxu0 %v6398_v47 }
 0xafc   :  { %6081 = vmatprep.subr.bf16.mxu0 %v6399_v48 }
 0xafe   :  { %6090 = vmatmul.mubr.msk.bf16.vlgmr.msra.gmra.mxu1 %vm1312_vm15, %v2255_v46  ;;  %v1924_v46 = vadd.f32 %v7381_v10, %v7392_v29 }
 0xaff   :  { %6101 = vmatprep.mubr.msk.bf16.mxu1 %vm6949_vm14, %v6948_v19  ;;  %6082 = vmatpush3.bf16.msra.mxu0 %v6399_v48 }
 0xb00   :  { %6093 = vmatprep.subr.bf16.mxu0 %v6948_v19 }
 0xbb6   :  { %v2174_v50 = vpop.f32.mrf.mxu1 }
 0xbb8   :  { %v6077_v54 = vpop.f32.mrf.mxu1 }
 0xbba   :  { %v2127_v55 = vpop.f32.mrf.mxu0  ;;  %v2177_v56 = vpop.f32.mrf.mxu1 }
 0xbbb   :  { %v2182_v57 = vpack.c.bf16 %v2177_v56, %v2174_v50 }
 0xbbc   :  { %v6071_v14 = vpop.f32.mrf.mxu0  ;;  %v6078_v21 = vpop.f32.mrf.mxu1 }
 0xbbe   :  { %v2130_v22 = vpop.f32.mrf.mxu0  ;;  %v2298_v40 = vpop.f32.mrf.mxu1 }
 0xbbf   :  { %v2181_v38 = vpack.c.bf16 %v2130_v22, %v2127_v55  ;;  %v2356_v58 = vmul.f32 0.17677669, %v2298_v40 }
 0xbc0   :  { %v6072_v59 = vpop.f32.mrf.mxu0  ;;  %v6091_v62 = vpop.f32.mrf.mxu1 }
 0xbc1   :  { %6083 = vmatprep.mubr.msk.bf16.mxu0 %vm1312_vm15, %v2181_v38  ;;  %v2360_v0 = vsel %vm228_vm0, %v2356_v58, -inf }
 0xbc2   :  { %6084 = vmatmul.mubr.msk.bf16.vlgmr.msra.gmra.mxu0 %vm1312_vm15, %v2182_v57  ;;  %2361 = vmax.xlane.f32.xlu0 %v2360_v0  ;;  %v2301_v2 = vpop.f32.mrf.mxu1 }
 0xbc3   :  { %6094 = vmatpush3.bf16.xpose.msra.mxu0 %v2313_v63  ;;  %v2357_v3 = vmul.f32 0.17677669, %v2301_v2  ;;  %6095 = vmatprep.mubr.msk.bf16.mxu0 %vm6949_vm14, %v6948_v19 }
 0xbc4   :  { %6105 = vmatprep.subr.bf16.mxu0 %v6948_v19  ;;  %v6092_v39 = vpop.f32.mrf.mxu1 }
 0xbc5   :  { %v2363_v11 = vsel %vm228_vm0, %v2357_v3, -inf }
 0xbc6   :  { %2364 = vmax.xlane.f32.xlu1 %v2363_v11 }
 0xbca   :  { %6096 = vmatmul.mubr.msk.bf16.vlgmr.msra.gmra.mxu0 %vm1312_vm15, %v2306_v12 }
 0xbcb   :  { %6107 = vmatprep.mubr.msk.bf16.mxu0 %vm6949_vm14, %v6948_v19 }
 0xc4b   :  { %v2362_v31 = vpop.xlane.xlu0 %2361 }
 0xc4c   :  { %v2372_v53 = vsub.f32 %v2356_v58, %v2362_v31 }
 0xc4e   :  { %v2376_v35 = vmul.f32 1.442695, %v2372_v53 }
 0xc4f   :  { %v2365_v18 = vpop.xlane.xlu1 %2364 }
 0xc50   :  { %v2373_v23 = vsub.f32 %v2357_v3, %v2365_v18 }
 0xc52   :  { %v2378_v30 = vmul.f32 1.442695, %v2373_v23 }
 0xc54   :  { %6578 = vpow2.f32 %v2378_v30 }
 0xc55   :  { %6580 = vpow2.f32 %v2376_v35 }
 0xc61   :  { %v6579_v33 = vpop.eup %6578 }
 0xc62   :  { %v2387_v52 = vsel %vm228_vm0, %v6579_v33, 0.0  ;;  %v6581_v56 = vpop.eup %6580 }
 0xc63   :  { %2388 = vadd.xlane.f32.xlu1 %v2387_v52  ;;  %v2384_v10 = vsel %vm228_vm0, %v6581_v56, 0.0 }
 0xc82   :  { %v6085_v60 = vpop.f32.mrf.mxu0 }
 0xc83   :  { %v7441_v41 = vadd.f32 %v6085_v60, %v1929_v32  ;;  %v6400_v32 = vld [vmem:[#allocation8 + $0x38] sm:$0xff]  }
 0xc84   :  { %v2235_v42 = vpop.f32.mrf.mxu0 }
 0xc85   :  { %v7445_v44 = vadd.f32 %v2235_v42, %v1921_v36 }
 0xc86   :  { %v6086_v45 = vpop.f32.mrf.mxu0 }
 0xc87   :  { %v7449_v47 = vadd.f32 %v6086_v45, %v1932_v43 }
 0xc88   :  { %v2238_v4 = vpop.f32.mrf.mxu0 }
 0xc89   :  { %v7451_v24 = vadd.f32 %v2238_v4, %v1924_v46 }
 0xc8a   :  { %v2349_v48 = vpop.f32.mrf.mxu0 }
 0xc8b   :  { %v2358_v6 = vmul.f32 0.17677669, %v2349_v48 }
 0xc8c   :  { %v6097_v25 = vpop.f32.mrf.mxu0 }
 0xc8d   :  { %v2366_v50 = vsel %vm228_vm0, %v2358_v6, -inf }
 0xc8e   :  { %2367 = vmax.xlane.f32.xlu0 %v2366_v50  ;;  %v2352_v54 = vpop.f32.mrf.mxu0 }
 0xc8f   :  { %v2359_v7 = vmul.f32 0.17677669, %v2352_v54 }
 0xc90   :  { %v6098_v27 = vpop.f32.mrf.mxu0 }
 0xc91   :  { %v2369_v55 = vsel %vm228_vm0, %v2359_v7, -inf }
 0xc92   :  { %2370 = vmax.xlane.f32.xlu0 %v2369_v55 }
 0xc96   :  { %2385 = vadd.xlane.f32.xlu0 %v2384_v10 }
 0xcec   :  { %v2389_v63 = vpop.xlane.xlu1 %2388 }
 0xd17   :  { %v2368_v29 = vpop.xlane.xlu0 %2367 }
 0xd18   :  { %v2374_v14 = vsub.f32 %v2358_v6, %v2368_v29 }
 0xd1a   :  { %v2380_v21 = vmul.f32 1.442695, %v2374_v14 }
 0xd1b   :  { %v2371_v22 = vpop.xlane.xlu0 %2370 }
 0xd1c   :  { %6582 = vpow2.f32 %v2380_v21  ;;  %v2375_v37 = vsub.f32 %v2359_v7, %v2371_v22  ;;  %v5516_v7 = vld [vmem:[%s7884_s9] ss:$0 sm:$0xff] }
 0xd1e   :  { %v2382_v38 = vmul.f32 1.442695, %v2375_v37 }
 0xd1f   :  { %v2386_v62 = vpop.xlane.xlu0 %2385 }
 0xd20   :  { %6584 = vpow2.f32 %v2382_v38 }
 0xd21   :  { %6586 = vrcp.f32 %v2386_v62 }
 0xd22   :  { %6588 = vrcp.f32 %v2389_v63 }
 0xd29   :  { %v6583_v40 = vpop.eup %6582 }
 0xd2a   :  { %v2390_v57 = vsel %vm228_vm0, %v6583_v40, 0.0 }
 0xd2b   :  { %2391 = vadd.xlane.f32.xlu0 %v2390_v57 }
 0xd2d   :  { %v6585_v58 = vpop.eup %6584 }
 0xd2e   :  { %v2393_v59 = vsel %vm228_vm0, %v6585_v58, 0.0  ;;  %v6587_v0 = vpop.eup %6586 }
 0xd2f   :  { %2394 = vadd.xlane.f32.xlu1 %v2393_v59  ;;  %v6589_v3 = vpop.eup %6588  ;;  %v2400_v39 = vmul.f32 %v6587_v0, %v6581_v56 }
 0xd30   :  { %v2401_v18 = vmul.f32 %v6589_v3, %v6579_v33  ;;  %v6401_v33 = vld [vmem:[#allocation8 + $0x30] sm:$0xff]  }
 0xd32   :  { %v2404_v23 = vpack.c.bf16 %v2401_v18, %v2400_v39  ;;  %v6407_v39 = vld [vmem:[#allocation10 + $0x64] ss:$8 sps:$4 sm:$0xff]   ;;  %v6408_v18 = vld [vmem:[#allocation10 + $0x50] ss:$8 sps:$4 sm:$0xff]  }
 0xd40   :  { %2453 = vrot.lane.b32.xlu1 %v7261_v49, %s7922_s13 }
 0xd41   :  { %2406 = vrot.lane.b32.xlu0 %v7278_v61, %s7922_s13 }
 0xdb4   :  { %v2392_v2 = vpop.xlane.xlu0 %2391 }
 0xdb5   :  { %6590 = vrcp.f32 %v2392_v2 }
 0xdb8   :  { %v2395_v11 = vpop.xlane.xlu1 %2394  ;;  %v2407_v12 = vpop.permute.xlu0 %2406 }
 0xdb9   :  { %6592 = vrcp.f32 %v2395_v11  ;;  %6100 = vmatpush3.bf16.msra.mxu1 %v2407_v12  ;;  %v6405_v11 = vld [vmem:[#allocation10 + $0x60] ss:$8 sps:$4 sm:$0xff]   ;;  %v6410_v12 = vld [vmem:[#allocation10 + $0x54] ss:$8 sps:$4 sm:$0xff]  }
 0xdba   :  { %6111 = vmatprep.subr.bf16.mxu1 %v6400_v32 }
 0xdbc   :  { %v2454_v30 = vpop.permute.xlu1 %2453  ;;  %6102 = vmatmul.mubr.msk.bf16.vlgmr.msra.gmra.mxu1 %vm228_vm0, %v2404_v23  ;;  %v6413_v23 = vld [vmem:[#allocation10 + $0x44] ss:$8 sps:$4 sm:$0xff]  }
 0xdbd   :  { %6106 = vmatpush3.bf16.msra.mxu0 %v2454_v30  ;;  %6112 = vmatpush3.bf16.msra.mxu1 %v6400_v32  ;;  %v6411_v30 = vld [vmem:[#allocation10 + $0x40] ss:$8 sps:$4 sm:$0xff]   ;;  %v6420_v32 = vld [vmem:[#allocation10 + $0x10] ss:$8 sps:$4 sm:$0xff]  }
 0xdbe   :  { %6113 = vmatprep.subr.bf16.mxu1 %v6401_v33 }
 0xdc1   :  { %6114 = vmatpush3.bf16.msra.mxu1 %v6401_v33  ;;  %v6425_v33 = vld [vmem:[#allocation10 + $0x4] ss:$8 sps:$4 sm:$0xff]  }
 0xdc2   :  { %v6591_v49 = vpop.eup %6590 }
 0xdc3   :  { %v2402_v52 = vmul.f32 %v6591_v49, %v6583_v40  ;;  %v6414_v49 = vld [vmem:[#allocation10 + $0x30] ss:$8 sps:$4 sm:$0xff]  }
 0xdc6   :  { %v6593_v61 = vpop.eup %6592 }
 0xdc7   :  { %v2403_v31 = vmul.f32 %v6593_v61, %v6585_v58  ;;  %v6416_v61 = vld [vmem:[#allocation10 + $0x34] ss:$8 sps:$4 sm:$0xff]  }
 0xdc9   :  { %v2405_v53 = vpack.c.bf16 %v2403_v31, %v2402_v52  ;;  %v6419_v52 = vld [vmem:[#allocation10 + $0x24] ss:$8 sps:$4 sm:$0xff]   ;;  %v6417_v31 = vld [vmem:[#allocation10 + $0x20] ss:$8 sps:$4 sm:$0xff]  }
 0xdcb   :  { %6108 = vmatmul.mubr.msk.bf16.vlgmr.msra.gmra.mxu0 %vm228_vm0, %v2405_v53  ;;  %v6422_v53 = vld [vmem:[#allocation10 + $0x14] ss:$8 sps:$4 sm:$0xff]  }
 0xdcc   :  { %2797 = vmatprep.mubr.bf16.mxu0 %v6947_v51 }
 0xe7c   :  { %v2446_v35 = vpop.f32.mrf.mxu1 }
 0xe7e   :  { %v6103_v60 = vpop.f32.mrf.mxu1 }
 0xe7f   :  { %v6426_v60 = vld [vmem:[#allocation13 + $0x78] sm:$0xff]  }
 0xe80   :  { %v2449_v36 = vpop.f32.mrf.mxu1  ;;  %5802 = vmatprep.subr.bf16.mxu1 %v6426_v60 }
 0xe81   :  { %v2500_v42 = vpack.c.bf16 %v2449_v36, %v2446_v35  ;;  %v6423_v35 = vld [vmem:[#allocation10] ss:$8 sps:$4 sm:$0xff]  }
 0xe82   :  { %v6104_v43 = vpop.f32.mrf.mxu1  ;;  %v6427_v36 = vld [vmem:[#allocation13 + $0x38] sm:$0xff]  }
 0xe83   :  { %6115 = vmatprep.mubr.msk.bf16.mxu1 %vm1312_vm15, %v2500_v42  ;;  %v6428_v42 = vld [vmem:[#allocation13 + $0x70] sm:$0xff]  }
 0xe84   :  { %v6429_v43 = vld [vmem:[#allocation13 + $0x30] sm:$0xff]  }
 0xe8b   :  { %v2493_v45 = vpop.f32.mrf.mxu0 }
 0xe8d   :  { %v6109_v46 = vpop.f32.mrf.mxu0 }
 0xe8e   :  { %v6431_v46 = vld [vmem:[#allocation13 + $0x28] sm:$0xff]  }
 0xe8f   :  { %v2496_v4 = vpop.f32.mrf.mxu0 }
 0xe90   :  { %v2501_v48 = vpack.c.bf16 %v2496_v4, %v2493_v45  ;;  %v6430_v45 = vld [vmem:[#allocation13 + $0x68] sm:$0xff]   ;;  %v6432_v4 = vld [vmem:[#allocation13 + $0x60] sm:$0xff]  }
 0xe91   :  { %v6110_v6 = vpop.f32.mrf.mxu0 }
 0xe92   :  { %6116 = vmatmul.mubr.msk.bf16.vlgmr.msra.gmra.mxu1 %vm1312_vm15, %v2501_v48  ;;  %v6433_v48 = vld [vmem:[#allocation13 + $0x20] sm:$0xff]   ;;  %v6434_v6 = vld [vmem:[#allocation13 + $0x58] sm:$0xff]  }
 0xe93   :  { %5803 = vmatpush3.bf16.msra.mxu1 %v6427_v36 }
 0xe94   :  { %5804 = vmatprep.subr.bf16.mxu1 %v6428_v42 }
 0xe97   :  { %5805 = vmatpush3.bf16.msra.mxu1 %v6429_v43 }
 0xe98   :  { %5806 = vmatprep.subr.bf16.mxu1 %v6430_v45 }
 0xe9b   :  { %5807 = vmatpush3.bf16.msra.mxu1 %v6431_v46 }
 0xe9c   :  { %5808 = vmatprep.subr.bf16.mxu1 %v6432_v4 }
 0xe9f   :  { %5809 = vmatpush3.bf16.msra.mxu1 %v6433_v48 }
 0xea0   :  { %5810 = vmatprep.subr.bf16.mxu1 %v6434_v6 }
 0xf52   :  { %v6117_v25 = vpop.f32.mrf.mxu1 }
 0xf53   :  { %v2571_v29 = vadd.f32 %v6117_v25, %v7441_v41  ;;  %v6435_v25 = vld [vmem:[#allocation13 + $0x18] sm:$0xff]  }
 0xf54   :  { %v2554_v50 = vpop.f32.mrf.mxu1  ;;  %5811 = vmatpush3.bf16.msra.mxu1 %v6435_v25 }
 0xf55   :  { %v2569_v54 = vadd.f32 %v2554_v50, %v7445_v44  ;;  %v2582_v44 = vadd.f32 %v5516_v7, %v2571_v29 }
 0xf56   :  { %v6118_v27 = vpop.f32.mrf.mxu1 }
 0xf57   :  { %v2580_v55 = vadd.f32 %v5516_v7, %v2569_v54  ;;  %v2572_v56 = vadd.f32 %v6118_v27, %v7449_v47  ;;  %v2586_v41 = vadd.f32 %v2582_v44, %v1007_v16  ;;  %v6402_v47 = vld [vmem:[#allocation10 + $0x70] ss:$8 sps:$4 sm:$0xff]  }
 0xf58   :  { %v2557_v10 = vpop.f32.mrf.mxu1 }
 0xf59   :  { %v2583_v14 = vadd.f32 %v5516_v7, %v2572_v56  ;;  %v2570_v21 = vadd.f32 %v2557_v10, %v7451_v24  ;;  %v2584_v22 = vadd.f32 %v2580_v55, %v1005_v8  ;;  %v6404_v24 = vld [vmem:[#allocation10 + $0x74] ss:$8 sps:$4 sm:$0xff]  }
 0xf5a   :  { %2765 = vmatprep.subr.bf16.mxu0 %v6404_v24 }
 0xf5b   :  { %v2581_v37 = vadd.f32 %v5516_v7, %v2570_v21  ;;  %2590 = vadd.xlane.f32.xlu1 %v2584_v22  ;;  %v2587_v38 = vadd.f32 %v2583_v14, %v1008_v17  ;;  %2766 = vmatpush1.bf16.msra.mxu0 %v6402_v47 }
 0xf5c   :  { %2767 = vmatprep.subr.bf16.mxu0 %v6407_v39  ;;  %v6438_v39 = vld [vmem:[#allocation13 + $0x48] sm:$0xff]  }
 0xf5d   :  { %v2585_v40 = vadd.f32 %v2581_v37, %v1006_v9 }
 0xf5f   :  { %2596 = vadd.xlane.f32.xlu1 %v2587_v38  ;;  %2592 = vadd.xlane.f32.xlu0 %v2585_v40 }
 0xf60   :  { %2768 = vmatpush1.bf16.msra.mxu0 %v6405_v11  ;;  %v6439_v11 = vld [vmem:[#allocation13 + $0x8] sm:$0xff]  }
 0xf61   :  { %2769 = vmatprep.subr.bf16.mxu0 %v6410_v12  ;;  %v6440_v12 = vld [vmem:[#allocation13 + $0x40] sm:$0xff]  }
 0xf63   :  { %2594 = vadd.xlane.f32.xlu0 %v2586_v41 }
 0xf64   :  { %2770 = vmatpush1.bf16.msra.mxu0 %v6408_v18  ;;  %v6441_v18 = vld [vmem:[#allocation13] sm:$0xff]  }
 0xf65   :  { %2771 = vmatprep.subr.bf16.mxu0 %v6413_v23  ;;  %v2673_v23 = vld [vmem:[#allocation11] sm:$0x3] }
 0xf68   :  { %2772 = vmatpush1.bf16.msra.mxu0 %v6411_v30 }
 0xf69   :  { %2773 = vmatprep.subr.bf16.mxu0 %v6416_v61  ;;  %v2678_v61 = vrot.slane %v2673_v23, %v7251_v28 }
 0xf6c   :  { %2774 = vmatpush1.bf16.msra.mxu0 %v6414_v49  ;;  %v2682_v49 = vrot.slane %v2673_v23, %v7243_v20 }
 0xf6d   :  { %2775 = vmatprep.subr.bf16.mxu0 %v6419_v52 }
 0xf70   :  { %2776 = vmatpush1.bf16.msra.mxu0 %v6417_v31 }
 0xf71   :  { %2777 = vmatprep.subr.bf16.mxu0 %v6422_v53 }
 0xf74   :  { %2778 = vmatpush1.bf16.msra.mxu0 %v6420_v32 }
 0xf75   :  { %2779 = vmatprep.subr.bf16.mxu0 %v6425_v33 }
 0xf78   :  { %2780 = vmatpush1.bf16.msra.mxu0 %v6423_v35 }
 0xfe4   :  { %v2591_v1 = vpop.xlane.xlu1 %2590 }
 0xfe5   :  { %v2599_v8 = vmul.f32 0.0078125, %v2591_v1  ;;  %v5518_v1 = vld [vmem:[%s7886_s11] ss:$0 sm:$0xff] }
 0xfe7   :  { %v7482_v57 = vsub.f32 %v2584_v22, %v2599_v8 }
 0xfe8   :  { %v2597_v58 = vpop.xlane.xlu1 %2596  ;;  %v2593_v15 = vpop.xlane.xlu0 %2592 }
 0xfe9   :  { %v2602_v17 = vmul.f32 0.0078125, %v2597_v58  ;;  %v2600_v59 = vmul.f32 0.0078125, %v2593_v15  ;;  %v2607_v5 = vmul.f32 %v7482_v57, %v7482_v57 }
 0xfeb   :  { %v7486_v9 = vsub.f32 %v2585_v40, %v2600_v59  ;;  %2611 = vadd.xlane.f32.xlu0 %v2607_v5  ;;  %v7488_v16 = vsub.f32 %v2587_v38, %v2602_v17  ;;  %v5517_v40 = vld [vmem:[%s7885_s10] ss:$0 sm:$0xff] }
 0xfec   :  { %v2595_v13 = vpop.xlane.xlu0 %2594 }
 0xfed   :  { %v2601_v62 = vmul.f32 0.0078125, %v2595_v13  ;;  %v2608_v63 = vmul.f32 %v7486_v9, %v7486_v9  ;;  %v2610_v2 = vmul.f32 %v7488_v16, %v7488_v16 }
 0xfef   :  { %v7492_v0 = vsub.f32 %v2586_v41, %v2601_v62  ;;  %2613 = vadd.xlane.f32.xlu1 %v2608_v63 }
 0xff1   :  { %v2609_v3 = vmul.f32 %v7492_v0, %v7492_v0 }
 0xff3   :  { %2617 = vadd.xlane.f32.xlu1 %v2610_v2  ;;  %2615 = vadd.xlane.f32.xlu0 %v2609_v3 }
0x1074   :  { %v2612_v50 = vpop.xlane.xlu0 %2611 }
0x1075   :  { %v2619_v54 = vmul.f32 0.0078125, %v2612_v50 }
0x1077   :  { %v2623_v7 = vadd.f32 1e-05, %v2619_v54 }
0x1078   :  { %v2614_v27 = vpop.xlane.xlu1 %2613 }
0x1079   :  { %6594 = vrsqrt.f32 %v2623_v7  ;;  %v2620_v55 = vmul.f32 0.0078125, %v2614_v27 }
0x107b   :  { %v2624_v56 = vadd.f32 1e-05, %v2620_v55 }
0x107c   :  { %v2618_v10 = vpop.xlane.xlu1 %2617  ;;  %v2616_v29 = vpop.xlane.xlu0 %2615 }
0x107d   :  { %6596 = vrsqrt.f32 %v2624_v56  ;;  %v2622_v14 = vmul.f32 0.0078125, %v2618_v10  ;;  %v2621_v21 = vmul.f32 0.0078125, %v2616_v29 }
0x107f   :  { %v2626_v22 = vadd.f32 1e-05, %v2622_v14  ;;  %v2625_v37 = vadd.f32 1e-05, %v2621_v21 }
0x1081   :  { %6598 = vrsqrt.f32 %v2626_v22 }
0x1082   :  { %6600 = vrsqrt.f32 %v2625_v37 }
0x1086   :  { %v6595_v44 = vpop.eup %6594 }
0x1087   :  { %v2631_v38 = vmul.f32 %v6595_v44, %v7482_v57  ;;  %v5535_v44 = vld [vmem:[#allocation14] ss:$0 sm:$0xff] }
0x1089   :  { %v2641_v24 = vmul.f32 %v5517_v40, %v2631_v38 }
0x108a   :  { %v6597_v41 = vpop.eup %6596 }
0x108b   :  { %v2632_v47 = vmul.f32 %v6597_v41, %v7486_v9  ;;  %v7506_v17 = vadd.f32 %v5518_v1, %v2641_v24 }
0x108d   :  { %v2642_v8 = vmul.f32 %v5517_v40, %v2632_v47 }
0x108e   :  { %v6599_v58 = vpop.eup %6598 }
0x108f   :  { %v6601_v15 = vpop.eup %6600  ;;  %v7508_v59 = vadd.f32 %v5518_v1, %v2642_v8  ;;  %v2634_v57 = vmul.f32 %v6599_v58, %v7488_v16  ;;  %v6436_v16 = vld [vmem:[#allocation13 + $0x50] sm:$0xff]  }
0x1090   :  { %v2633_v5 = vmul.f32 %v6601_v15, %v7492_v0  ;;  %v6437_v0 = vld [vmem:[#allocation13 + $0x10] sm:$0xff]   ;;  %5812 = vmatprep.subr.bf16.mxu1 %v6436_v16 }
0x1091   :  { %v2671_v13 = vpack.c.bf16 %v7508_v59, %v7506_v17  ;;  %v2644_v9 = vmul.f32 %v5517_v40, %v2634_v57  ;;  %5813 = vmatpush3.bf16.msra.mxu1 %v6437_v0 }
0x1092   :  { %v2643_v62 = vmul.f32 %v5517_v40, %v2633_v5  ;;  %5814 = vmatprep.subr.bf16.mxu1 %v6438_v39 }
0x1093   :  { %2798 = vmatmul.mubr.bf16.vlgmr.msra.gmra.mxu0 %v2671_v13  ;;  %v7517_v2 = vadd.f32 %v5518_v1, %v2644_v9 }
0x1094   :  { %2807 = vmatprep.mubr.bf16.mxu0 %v6947_v51  ;;  %v7515_v63 = vadd.f32 %v5518_v1, %v2643_v62 }
0x1095   :  { %5815 = vmatpush3.bf16.msra.mxu1 %v6439_v11 }
0x1096   :  { %v2672_v3 = vpack.c.bf16 %v7517_v2, %v7515_v63  ;;  %5816 = vmatprep.subr.bf16.mxu1 %v6440_v12  ;;  %v6444_v12 = vld [vmem:[#allocation7 + $0x16c] ss:$12 sps:$4 sm:$0xff]  }
0x1097   :  { %3265 = vmatprep.subr.bf16.mxu0 %v6444_v12 }
0x1099   :  { %5817 = vmatpush3.bf16.msra.mxu1 %v6441_v18 }
0x109b   :  { %2808 = vmatmul.mubr.bf16.gmra.mxu0 %v2672_v3 }
0x109c   :  { %3297 = vmatprep.mubr.bf16.mxu0 %v6947_v51 }
0x1153   :  { %v2799_v30 = vpop.f32.mrf.mxu0 }
0x1154   :  { %v2800_v33 = vadd.f32 %v2799_v30, %v2678_v61 }
0x1155   :  { %v2801_v52 = vpop.f32.mrf.mxu0 }
0x1156   :  { %v2802_v53 = vadd.f32 %v2801_v52, %v2682_v49  ;;  %v2818_v46 = vmax.f32 %v2800_v33, 0.0 }
0x1157   :  { %v2803_v31 = vpop.f32.mrf.mxu0 }
0x1158   :  { %v2804_v32 = vadd.f32 %v2803_v31, %v2678_v61  ;;  %v2819_v43 = vmax.f32 %v2802_v53, 0.0 }
0x1159   :  { %v2805_v35 = vpop.f32.mrf.mxu0 }
0x115a   :  { %v2806_v60 = vadd.f32 %v2805_v35, %v2682_v49  ;;  %v2820_v36 = vmax.f32 %v2804_v32, 0.0 }
0x115b   :  { %v2809_v42 = vpop.f32.mrf.mxu0 }
0x115c   :  { %v2821_v45 = vmax.f32 %v2806_v60, 0.0  ;;  %v2858_v6 = vpack.c.bf16 %v2820_v36, %v2818_v46  ;;  %v2810_v7 = vadd.f32 %v2809_v42, %v2678_v61  ;;  %v6447_v42 = vld [vmem:[#allocation7 + $0x154] ss:$12 sps:$4 sm:$0xff]   ;;  %v6451_v46 = vld [vmem:[#allocation7 + $0x170] ss:$12 sps:$4 sm:$0xff]  }
0x115d   :  { %v2811_v4 = vpop.f32.mrf.mxu0  ;;  %6119 = vmatprep.subr.bf16.mxu1 %v6451_v46 }
0x115e   :  { %v2859_v48 = vpack.c.bf16 %v2821_v45, %v2819_v43  ;;  %v2812_v50 = vadd.f32 %v2811_v4, %v2682_v49  ;;  %v2822_v14 = vmax.f32 %v2810_v7, 0.0  ;;  %v6445_v43 = vld [vmem:[#allocation7 + $0x150] ss:$12 sps:$4 sm:$0xff]   ;;  %v6448_v4 = vld [vmem:[#allocation7 + $0x138] ss:$12 sps:$4 sm:$0xff]  }
0x115f   :  { %v2813_v25 = vpop.f32.mrf.mxu0  ;;  %v6450_v45 = vld [vmem:[#allocation7 + $0x13c] ss:$12 sps:$4 sm:$0xff]  }
0x1160   :  { %v2814_v54 = vadd.f32 %v2813_v25, %v2678_v61  ;;  %2997 = vmatprep.mubr.bf16.mxu1 %v2859_v48  ;;  %v2823_v10 = vmax.f32 %v2812_v50, 0.0  ;;  %v6454_v48 = vld [vmem:[#allocation7 + $0x124] ss:$12 sps:$4 sm:$0xff]   ;;  %v6452_v25 = vld [vmem:[#allocation7 + $0x120] ss:$12 sps:$4 sm:$0xff]  }
0x1161   :  { %v2815_v27 = vpop.f32.mrf.mxu0  ;;  %2998 = vmatmul.mubr.bf16.vlgmr.msra.gmra.mxu1 %v2858_v6  ;;  %v6455_v6 = vld [vmem:[#allocation7 + $0x158] ss:$12 sps:$4 sm:$0xff]   ;;  %v6456_v7 = vld [vmem:[#allocation7 + $0x108] ss:$12 sps:$4 sm:$0xff]  }
0x1162   :  { %v2816_v55 = vadd.f32 %v2815_v27, %v2682_v49  ;;  %v2824_v56 = vmax.f32 %v2814_v54, 0.0  ;;  %6120 = vmatpush3.bf16.msra.mxu1 %v6451_v46  ;;  %v6458_v50 = vld [vmem:[#allocation7 + $0x10c] ss:$12 sps:$4 sm:$0xff]   ;;  %v6462_v27 = vld [vmem:[#allocation7 + $0xf4] ss:$12 sps:$4 sm:$0xff]  }
0x1163   :  { %6121 = vmatprep.subr.bf16.mxu1 %v6455_v6  ;;  %v6459_v54 = vld [vmem:[#allocation7 + $0x140] ss:$12 sps:$4 sm:$0xff]  }
0x1164   :  { %v2825_v29 = vmax.f32 %v2816_v55, 0.0  ;;  %v2860_v22 = vpack.c.bf16 %v2824_v56, %v2822_v14  ;;  %v6463_v55 = vld [vmem:[#allocation7 + $0x128] ss:$12 sps:$4 sm:$0xff]   ;;  %v6460_v56 = vld [vmem:[#allocation7 + $0xf0] ss:$12 sps:$4 sm:$0xff]  }
0x1165   :  { %v6467_v14 = vld [vmem:[#allocation7 + $0x110] ss:$12 sps:$4 sm:$0xff]  }
0x1166   :  { %v2861_v21 = vpack.c.bf16 %v2825_v29, %v2823_v10  ;;  %6122 = vmatpush3.bf16.msra.mxu1 %v6455_v6  ;;  %v6464_v10 = vld [vmem:[#allocation7 + $0xd8] ss:$12 sps:$4 sm:$0xff]   ;;  %v6466_v29 = vld [vmem:[#allocation7 + $0xdc] ss:$12 sps:$4 sm:$0xff]  }
0x1167   :  { %6123 = vmatprep.subr.bf16.mxu1 %v6459_v54 }
0x1168   :  { %3005 = vmatprep.mubr.bf16.mxu1 %v2861_v21  ;;  %v6470_v21 = vld [vmem:[#allocation7 + $0xc4] ss:$12 sps:$4 sm:$0xff]  }
0x1169   :  { %3006 = vmatmul.mubr.bf16.gmra.mxu1 %v2860_v22  ;;  %v6471_v22 = vld [vmem:[#allocation7 + $0xf8] ss:$12 sps:$4 sm:$0xff]  }
0x116a   :  { %6124 = vmatpush3.bf16.msra.mxu1 %v6459_v54 }
0x116b   :  { %6125 = vmatprep.subr.bf16.mxu1 %v6463_v55 }
0x116e   :  { %6126 = vmatpush3.bf16.msra.mxu1 %v6463_v55 }
0x116f   :  { %6127 = vmatprep.subr.bf16.mxu1 %v6467_v14 }
0x1172   :  { %6128 = vmatpush3.bf16.msra.mxu1 %v6467_v14 }
0x1173   :  { %6129 = vmatprep.subr.bf16.mxu1 %v6471_v22 }
0x1176   :  { %6130 = vmatpush3.bf16.msra.mxu1 %v6471_v22 }
0x1221   :  { %v5818_v37 = vpop.f32.mrf.mxu1 }
0x1223   :  { %v5819_v38 = vpop.f32.mrf.mxu1 }
0x1224   :  { %v5820_v40 = vadd.f32 %v5819_v38, %v5818_v37  ;;  %v6468_v37 = vld [vmem:[#allocation7 + $0xc0] ss:$12 sps:$4 sm:$0xff]   ;;  %v6473_v38 = vld [vmem:[#allocation7 + $0xc8] ss:$12 sps:$4 sm:$0xff]  }
0x1225   :  { %v5821_v41 = vpop.f32.mrf.mxu1 }
0x1226   :  { %v3000_v47 = vadd.f32 %v5820_v40, %v5535_v44 }
0x1227   :  { %v5822_v24 = vpop.f32.mrf.mxu1 }
0x1228   :  { %v5823_v1 = vadd.f32 %v5822_v24, %v5821_v41  ;;  %v3014_v8 = vadd.f32 %v3000_v47, %v7506_v17  ;;  %v6442_v17 = vld [vmem:[#allocation7 + $0x168] ss:$12 sps:$4 sm:$0xff]  }
0x1229   :  { %v5824_v58 = vpop.f32.mrf.mxu1  ;;  %3266 = vmatpush1.bf16.msra.mxu0 %v6442_v17  ;;  %v5553_v17 = vld [vmem:[%s7892_s17] ss:$0 sm:$0xff] }
0x122a   :  { %v3003_v15 = vadd.f32 %v5823_v1, %v5535_v44  ;;  %3020 = vadd.xlane.f32.xlu0 %v3014_v8  ;;  %3267 = vmatprep.subr.bf16.mxu0 %v6447_v42 }
0x122b   :  { %v5825_v57 = vpop.f32.mrf.mxu1 }
0x122c   :  { %v5826_v5 = vadd.f32 %v5825_v57, %v5824_v58  ;;  %v3015_v13 = vadd.f32 %v3003_v15, %v7508_v59 }
0x122d   :  { %v5827_v9 = vpop.f32.mrf.mxu1  ;;  %3268 = vmatpush1.bf16.msra.mxu0 %v6445_v43 }
0x122e   :  { %v3008_v62 = vadd.f32 %v5826_v5, %v5535_v44  ;;  %3022 = vadd.xlane.f32.xlu1 %v3015_v13  ;;  %3269 = vmatprep.subr.bf16.mxu0 %v6450_v45 }
0x122f   :  { %v5828_v3 = vpop.f32.mrf.mxu1 }
0x1230   :  { %v5829_v16 = vadd.f32 %v5828_v3, %v5827_v9  ;;  %v3016_v0 = vadd.f32 %v3008_v62, %v7515_v63 }
0x1231   :  { %3270 = vmatpush1.bf16.msra.mxu0 %v6448_v4 }
0x1232   :  { %v3011_v39 = vadd.f32 %v5829_v16, %v5535_v44  ;;  %3024 = vadd.xlane.f32.xlu0 %v3016_v0  ;;  %3271 = vmatprep.subr.bf16.mxu0 %v6454_v48  ;;  %v6472_v44 = vld [vmem:[#allocation7 + $0xe0] ss:$12 sps:$4 sm:$0xff]  }
0x1233   :  { %6131 = vmatprep.subr.bf16.mxu1 %v6472_v44  ;;  %v5552_v16 = vld [vmem:[%s7891_s16] ss:$0 sm:$0xff] }
0x1234   :  { %v3017_v11 = vadd.f32 %v3011_v39, %v7517_v2  ;;  %6132 = vmatpush3.bf16.msra.mxu1 %v6472_v44 }
0x1235   :  { %3272 = vmatpush1.bf16.msra.mxu0 %v6452_v25  ;;  %6133 = vmatprep.subr.bf16.mxu1 %v6473_v38 }
0x1236   :  { %3026 = vadd.xlane.f32.xlu1 %v3017_v11  ;;  %3273 = vmatprep.subr.bf16.mxu0 %v6458_v50 }
0x1238   :  { %6134 = vmatpush3.bf16.msra.mxu1 %v6473_v38 }
0x1239   :  { %3274 = vmatpush1.bf16.msra.mxu0 %v6456_v7  ;;  %6139 = vmatprep.subr.bf16.mxu1 %v6948_v19 }
0x123a   :  { %3275 = vmatprep.subr.bf16.mxu0 %v6462_v27 }
0x123d   :  { %3276 = vmatpush1.bf16.msra.mxu0 %v6460_v56 }
0x123e   :  { %3277 = vmatprep.subr.bf16.mxu0 %v6466_v29 }
0x1241   :  { %3278 = vmatpush1.bf16.msra.mxu0 %v6464_v10 }
0x1242   :  { %3279 = vmatprep.subr.bf16.mxu0 %v6470_v21 }
0x1245   :  { %3280 = vmatpush1.bf16.msra.mxu0 %v6468_v37 }
0x1246   :  { %6145 = vmatprep.subr.bf16.mxu0 %v6948_v19 }
0x12b3   :  { %v3021_v18 = vpop.xlane.xlu0 %3020 }
0x12b4   :  { %v3028_v23 = vmul.f32 0.0078125, %v3021_v18 }
0x12b6   :  { %v7528_v30 = vsub.f32 %v3014_v8, %v3028_v23 }
0x12b7   :  { %v3023_v59 = vpop.xlane.xlu1 %3022 }
0x12b8   :  { %v3029_v49 = vmul.f32 0.0078125, %v3023_v59  ;;  %v3036_v61 = vmul.f32 %v7528_v30, %v7528_v30 }
0x12ba   :  { %v7532_v52 = vsub.f32 %v3015_v13, %v3029_v49  ;;  %3040 = vadd.xlane.f32.xlu0 %v3036_v61 }
0x12bb   :  { %v3025_v63 = vpop.xlane.xlu0 %3024 }
0x12bc   :  { %v3030_v31 = vmul.f32 0.0078125, %v3025_v63  ;;  %v3037_v2 = vmul.f32 %v7532_v52, %v7532_v52 }
0x12be   :  { %v7536_v53 = vsub.f32 %v3016_v0, %v3030_v31  ;;  %3042 = vadd.xlane.f32.xlu1 %v3037_v2 }
0x12bf   :  { %v3027_v32 = vpop.xlane.xlu1 %3026 }
0x12c0   :  { %v3031_v33 = vmul.f32 0.0078125, %v3027_v32  ;;  %v3038_v35 = vmul.f32 %v7536_v53, %v7536_v53 }
0x12c2   :  { %v7540_v60 = vsub.f32 %v3017_v11, %v3031_v33  ;;  %3044 = vadd.xlane.f32.xlu0 %v3038_v35  ;;  %v5554_v35 = vld [vmem:[%s7882_s7 + $0x3] sm:$0x7] }
0x12c3   :  { %v3125_v25 = vrot.slane %v5554_v35, %v7251_v28  ;;  %v3133_v10 = vrot.slane %v5554_v35, %v1055_v26 }
0x12c4   :  { %v3039_v36 = vmul.f32 %v7540_v60, %v7540_v60 }
0x12c6   :  { %3046 = vadd.xlane.f32.xlu1 %v3039_v36  ;;  %v3129_v36 = vrot.slane %v5554_v35, %v7243_v20 }
0x1343   :  { %v3041_v40 = vpop.xlane.xlu0 %3040 }
0x1344   :  { %v3048_v41 = vmul.f32 0.0078125, %v3041_v40 }
0x1346   :  { %v3052_v47 = vadd.f32 1e-05, %v3048_v41 }
0x1347   :  { %v3043_v24 = vpop.xlane.xlu1 %3042 }
0x1348   :  { %6602 = vrsqrt.f32 %v3052_v47  ;;  %v3049_v1 = vmul.f32 0.0078125, %v3043_v24 }
0x134a   :  { %v3053_v8 = vadd.f32 1e-05, %v3049_v1 }
0x134b   :  { %v3045_v58 = vpop.xlane.xlu0 %3044 }
0x134c   :  { %6604 = vrsqrt.f32 %v3053_v8  ;;  %v3050_v15 = vmul.f32 0.0078125, %v3045_v58 }
0x134e   :  { %v3054_v57 = vadd.f32 1e-05, %v3050_v15 }
0x134f   :  { %v3047_v5 = vpop.xlane.xlu1 %3046 }
0x1350   :  { %6606 = vrsqrt.f32 %v3054_v57  ;;  %v3051_v13 = vmul.f32 0.0078125, %v3047_v5 }
0x1352   :  { %v3055_v9 = vadd.f32 1e-05, %v3051_v13 }
0x1354   :  { %6608 = vrsqrt.f32 %v3055_v9 }
0x1355   :  { %v6603_v62 = vpop.eup %6602 }
0x1356   :  { %v3060_v3 = vmul.f32 %v6603_v62, %v7528_v30 }
0x1358   :  { %v3070_v11 = vmul.f32 %v5552_v16, %v3060_v3 }
0x1359   :  { %v6605_v0 = vpop.eup %6604 }
0x135a   :  { %v3061_v39 = vmul.f32 %v6605_v0, %v7532_v52  ;;  %v7554_v23 = vadd.f32 %v5553_v17, %v3070_v11 }
0x135c   :  { %v3071_v12 = vmul.f32 %v5552_v16, %v3061_v39 }
0x135d   :  { %v6607_v18 = vpop.eup %6606 }
0x135e   :  { %v7556_v59 = vadd.f32 %v5553_v17, %v3071_v12  ;;  %v3062_v30 = vmul.f32 %v6607_v18, %v7536_v53 }
0x1360   :  { %v3117_v49 = vpack.c.bf16 %v7556_v59, %v7554_v23  ;;  %v3072_v63 = vmul.f32 %v5552_v16, %v3062_v30 }
0x1361   :  { %v6609_v61 = vpop.eup %6608 }
0x1362   :  { %3298 = vmatmul.mubr.bf16.vlgmr.msra.gmra.mxu0 %v3117_v49  ;;  %6135 = vmatprep.mubr.bf16.mxu1 %v3117_v49  ;;  %v3063_v52 = vmul.f32 %v6609_v61, %v7540_v60  ;;  %v7563_v2 = vadd.f32 %v5553_v17, %v3072_v63 }
0x1363   :  { %3307 = vmatprep.mubr.bf16.mxu0 %v6947_v51 }
0x1364   :  { %v3073_v31 = vmul.f32 %v5552_v16, %v3063_v52 }
0x1366   :  { %v7565_v32 = vadd.f32 %v5553_v17, %v3073_v31 }
0x1368   :  { %v3118_v33 = vpack.c.bf16 %v7565_v32, %v7563_v2 }
0x136a   :  { %3308 = vmatmul.mubr.bf16.gmra.mxu0 %v3118_v33  ;;  %6136 = vmatmul.mubr.bf16.vlgmr.msra.gmra.mxu1 %v3118_v33 }
0x136b   :  { %6141 = vmatprep.mubr.msk.bf16.mxu1 %vm6949_vm14, %v6948_v19  ;;  %6147 = vmatprep.mubr.msk.bf16.mxu0 %vm6949_vm14, %v6948_v19 }
0x1422   :  { %v3299_v53 = vpop.f32.mrf.mxu0 }
0x1423   :  { %v3300_v29 = vadd.f32 %v3299_v53, %v3125_v25 }
0x1424   :  { %v3301_v60 = vpop.f32.mrf.mxu0 }
0x1425   :  { %v3302_v45 = vadd.f32 %v3301_v60, %v3129_v36 }
0x1426   :  { %v3303_v42 = vpop.f32.mrf.mxu0 }
0x1427   :  { %v3304_v56 = vadd.f32 %v3303_v42, %v3125_v25 }
0x1428   :  { %v3305_v43 = vpop.f32.mrf.mxu0 }
0x1429   :  { %v3306_v46 = vadd.f32 %v3305_v43, %v3129_v36  ;;  %v7585_v40 = vpack.c.bf16 %v3304_v56, %v3300_v29 }
0x142a   :  { %v3309_v4 = vpop.f32.mrf.mxu0  ;;  %v6137_v48 = vpop.f32.mrf.mxu1 }
0x142b   :  { %v7577_v6 = vpack.c.bf16 %v3306_v46, %v3302_v45  ;;  %v3310_v1 = vadd.f32 %v3309_v4, %v3125_v25  ;;  %v3361_v8 = vadd.f32 %v6137_v48, %v3133_v10 }
0x142c   :  { %v3311_v50 = vpop.f32.mrf.mxu0  ;;  %v3352_v54 = vpop.f32.mrf.mxu1 }
0x142d   :  { %v3394_v7 = vsel %vm1312_vm15, %v7577_v6, 0  ;;  %v3312_v22 = vadd.f32 %v3311_v50, %v3129_v36  ;;  %v3353_v37 = vadd.f32 %v3352_v54, %v3133_v10 }
0x142e   :  { %v3313_v27 = vpop.f32.mrf.mxu0  ;;  %v6138_v55 = vpop.f32.mrf.mxu1  ;;  %6140 = vmatpush3.bf16.xpose.msra.mxu1 %v3394_v7 }
0x142f   :  { %6151 = vmatprep.subr.bf16.mxu1 %v6948_v19  ;;  %v3314_v26 = vadd.f32 %v3313_v27, %v3125_v25  ;;  %v3364_v24 = vadd.f32 %v6138_v55, %v3133_v10 }
0x1430   :  { %v3315_v14 = vpop.f32.mrf.mxu0  ;;  %v3355_v21 = vpop.f32.mrf.mxu1 }
0x1431   :  { %v3316_v44 = vadd.f32 %v3315_v14, %v3129_v36  ;;  %v3356_v38 = vadd.f32 %v3355_v21, %v3133_v10  ;;  %v7600_v58 = vpack.c.bf16 %v3314_v26, %v3310_v1  ;;  %v7602_v15 = vpack.c.bf16 %v3364_v24, %v3361_v8 }
0x1433   :  { %v7587_v41 = vpack.c.bf16 %v3316_v44, %v3312_v22  ;;  %v7589_v47 = vpack.c.bf16 %v3356_v38, %v3353_v37 }
0x1435   :  { %6142 = vmatmul.mubr.msk.bf16.vlgmr.msra.gmra.mxu1 %vm1312_vm15, %v7585_v40  ;;  %v3441_v34 = vsel %vm1312_vm15, %v7587_v41, 0 }
0x1436   :  { %6146 = vmatpush3.bf16.xpose.msra.mxu0 %v3441_v34  ;;  %6152 = vmatpush3.bf16.msra.mxu1 %v7589_v47 }
0x1437   :  { %6157 = vmatprep.subr.bf16.mxu0 %v6948_v19  ;;  %6153 = vmatprep.mubr.msk.bf16.mxu1 %vm6949_vm14, %v6948_v19 }
0x1438   :  { %6163 = vmatprep.subr.bf16.mxu1 %v6948_v19 }
0x143d   :  { %6148 = vmatmul.mubr.msk.bf16.vlgmr.msra.gmra.mxu0 %vm1312_vm15, %v7600_v58 }
0x143e   :  { %6158 = vmatpush3.bf16.msra.mxu0 %v7602_v15  ;;  %6159 = vmatprep.mubr.msk.bf16.mxu0 %vm6949_vm14, %v6948_v19 }
0x143f   :  { %6169 = vmatprep.subr.bf16.mxu0 %v6948_v19 }
0x14f5   :  { %v3430_v57 = vpop.f32.mrf.mxu1 }
0x14f6   :  { %v3484_v5 = vmul.f32 0.17677669, %v3430_v57 }
0x14f7   :  { %v6143_v13 = vpop.f32.mrf.mxu1 }
0x14f8   :  { %v3488_v9 = vsel %vm228_vm0, %v3484_v5, -inf }
0x14f9   :  { %3489 = vmax.xlane.f32.xlu0 %v3488_v9  ;;  %v3433_v62 = vpop.f32.mrf.mxu1 }
0x14fa   :  { %v3485_v3 = vmul.f32 0.17677669, %v3433_v62 }
0x14fb   :  { %v6144_v16 = vpop.f32.mrf.mxu1 }
0x14fc   :  { %v3491_v0 = vsel %vm228_vm0, %v3485_v3, -inf }
0x14fd   :  { %3492 = vmax.xlane.f32.xlu1 %v3491_v0  ;;  %v3477_v39 = vpop.f32.mrf.mxu0 }
0x14fe   :  { %v3486_v11 = vmul.f32 0.17677669, %v3477_v39 }
0x14ff   :  { %v6149_v17 = vpop.f32.mrf.mxu0 }
0x1500   :  { %v3494_v12 = vsel %vm228_vm0, %v3486_v11, -inf }
0x1501   :  { %3495 = vmax.xlane.f32.xlu0 %v3494_v12  ;;  %v3480_v18 = vpop.f32.mrf.mxu0 }
0x1502   :  { %v3487_v30 = vmul.f32 0.17677669, %v3480_v18 }
0x1503   :  { %v6150_v49 = vpop.f32.mrf.mxu0 }
0x1504   :  { %v3497_v61 = vsel %vm228_vm0, %v3487_v30, -inf }
0x1505   :  { %3498 = vmax.xlane.f32.xlu1 %v3497_v61 }
0x1582   :  { %v3490_v52 = vpop.xlane.xlu0 %3489 }
0x1583   :  { %v3500_v63 = vsub.f32 %v3484_v5, %v3490_v52 }
0x1585   :  { %v3504_v31 = vmul.f32 1.442695, %v3500_v63 }
0x1586   :  { %v3493_v33 = vpop.xlane.xlu1 %3492 }
0x1587   :  { %6610 = vpow2.f32 %v3504_v31  ;;  %v3501_v53 = vsub.f32 %v3485_v3, %v3493_v33 }
0x1589   :  { %v3506_v35 = vmul.f32 1.442695, %v3501_v53 }
0x158a   :  { %v3496_v60 = vpop.xlane.xlu0 %3495 }
0x158b   :  { %6612 = vpow2.f32 %v3506_v35  ;;  %v3502_v36 = vsub.f32 %v3486_v11, %v3496_v60 }
0x158d   :  { %v3508_v42 = vmul.f32 1.442695, %v3502_v36 }
0x158e   :  { %v3499_v50 = vpop.xlane.xlu1 %3498 }
0x158f   :  { %6614 = vpow2.f32 %v3508_v42  ;;  %v3503_v54 = vsub.f32 %v3487_v30, %v3499_v50 }
0x1591   :  { %v3510_v7 = vmul.f32 1.442695, %v3503_v54 }
0x1593   :  { %6616 = vpow2.f32 %v3510_v7 }
0x1594   :  { %v6611_v43 = vpop.eup %6610 }
0x1595   :  { %v3512_v45 = vsel %vm228_vm0, %v6611_v43, 0.0 }
0x1596   :  { %3513 = vadd.xlane.f32.xlu0 %v3512_v45 }
0x1598   :  { %v6613_v46 = vpop.eup %6612 }
0x1599   :  { %v3515_v4 = vsel %vm228_vm0, %v6613_v46, 0.0 }
0x159a   :  { %3516 = vadd.xlane.f32.xlu1 %v3515_v4 }
0x159c   :  { %v6615_v48 = vpop.eup %6614 }
0x159d   :  { %v3518_v25 = vsel %vm228_vm0, %v6615_v48, 0.0 }
0x159e   :  { %3519 = vadd.xlane.f32.xlu0 %v3518_v25 }
0x15a0   :  { %v6617_v27 = vpop.eup %6616 }
0x15a1   :  { %v3521_v55 = vsel %vm228_vm0, %v6617_v27, 0.0 }
0x15ab   :  { %3681 = vrot.lane.b32.xlu1 %v7587_v41, %s6950_s29 }
0x15b4   :  { %3628 = vrot.lane.b32.xlu0 %v7577_v6, %s6950_s29 }
0x15cf   :  { %3522 = vadd.xlane.f32.xlu1 %v3521_v55 }
0x15e0   :  { %3625 = vrot.lane.b32.xlu1 %v7585_v40, %s6950_s29 }
0x15e4   :  { %3678 = vrot.lane.b32.xlu1 %v7600_v58, %s6950_s29 }
0x161f   :  { %v3514_v56 = vpop.xlane.xlu0 %3513 }
0x1620   :  { %6618 = vrcp.f32 %v3514_v56 }
0x1623   :  { %v3517_v10 = vpop.xlane.xlu1 %3516 }
0x1624   :  { %6620 = vrcp.f32 %v3517_v10 }
0x1627   :  { %v3520_v29 = vpop.xlane.xlu0 %3519  ;;  %v3682_v26 = vpop.permute.xlu1 %3681 }
0x1628   :  { %6622 = vrcp.f32 %v3520_v29  ;;  %v3687_v62 = vsel %vm1312_vm15, %v3682_v26, 0 }
0x162b   :  { %v3629_v44 = vpop.permute.xlu0 %3628 }
0x162c   :  { %v3634_v34 = vsel %vm1312_vm15, %v3629_v44, 0 }
0x162d   :  { %v6619_v14 = vpop.eup %6618 }
0x162e   :  { %v3528_v22 = vmul.f32 %v6619_v14, %v6611_v43 }
0x1631   :  { %v6621_v21 = vpop.eup %6620 }
0x1632   :  { %v3529_v37 = vmul.f32 %v6621_v21, %v6613_v46 }
0x1634   :  { %v3532_v38 = vpack.c.bf16 %v3529_v37, %v3528_v22 }
0x1635   :  { %v6623_v8 = vpop.eup %6622 }
0x1636   :  { %6154 = vmatmul.mubr.msk.bf16.vlgmr.msra.gmra.mxu1 %vm228_vm0, %v3532_v38  ;;  %v3530_v5 = vmul.f32 %v6623_v8, %v6615_v48 }
0x1637   :  { %6164 = vmatpush3.bf16.xpose.msra.mxu1 %v3634_v34  ;;  %6165 = vmatprep.mubr.msk.bf16.mxu1 %vm6949_vm14, %v6948_v19 }
0x1638   :  { %6175 = vmatprep.subr.bf16.mxu1 %v6948_v19 }
0x1658   :  { %v3523_v24 = vpop.xlane.xlu1 %3522 }
0x1659   :  { %6624 = vrcp.f32 %v3523_v24 }
0x165c   :  { %v3626_v1 = vpop.permute.xlu1 %3625 }
0x165d   :  { %6166 = vmatmul.mubr.msk.bf16.vlgmr.msra.gmra.mxu1 %vm1312_vm15, %v3626_v1 }
0x165e   :  { %6177 = vmatprep.mubr.msk.bf16.mxu1 %vm6949_vm14, %v6948_v19 }
0x1660   :  { %v3679_v3 = vpop.permute.xlu1 %3678 }
0x1666   :  { %v6625_v57 = vpop.eup %6624 }
0x1667   :  { %v3531_v13 = vmul.f32 %v6625_v57, %v6617_v27 }
0x1669   :  { %v3533_v9 = vpack.c.bf16 %v3531_v13, %v3530_v5 }
0x166b   :  { %6160 = vmatmul.mubr.msk.bf16.vlgmr.msra.gmra.mxu0 %vm228_vm0, %v3533_v9 }
0x166c   :  { %6170 = vmatpush3.bf16.xpose.msra.mxu0 %v3687_v62  ;;  %6171 = vmatprep.mubr.msk.bf16.mxu0 %vm6949_vm14, %v6948_v19 }
0x166d   :  { %6181 = vmatprep.subr.bf16.mxu0 %v6948_v19 }
0x1673   :  { %6172 = vmatmul.mubr.msk.bf16.vlgmr.msra.gmra.mxu0 %vm1312_vm15, %v3679_v3 }
0x1674   :  { %6183 = vmatprep.mubr.msk.bf16.mxu0 %vm6949_vm14, %v6948_v19 }
0x16f6   :  { %v7642_v16 = vpop.f32.mrf.mxu1 }
0x16f8   :  { %v6155_v0 = vpop.f32.mrf.mxu1 }
0x16fa   :  { %v7644_v39 = vpop.f32.mrf.mxu1 }
0x16fb   :  { %v3622_v11 = vpack.c.bf16 %v7644_v39, %v7642_v16  ;;  %v6476_v39 = vld [vmem:[#allocation8 + $0x58] sm:$0xff]  }
0x16fc   :  { %v6156_v17 = vpop.f32.mrf.mxu1 }
0x171d   :  { %v3670_v12 = vpop.f32.mrf.mxu1 }
0x171e   :  { %v3730_v18 = vmul.f32 0.17677669, %v3670_v12 }
0x171f   :  { %v6167_v30 = vpop.f32.mrf.mxu1 }
0x1720   :  { %v3734_v49 = vsel %vm228_vm0, %v3730_v18, -inf }
0x1721   :  { %3735 = vmax.xlane.f32.xlu0 %v3734_v49  ;;  %v3673_v61 = vpop.f32.mrf.mxu1 }
0x1722   :  { %v3731_v52 = vmul.f32 0.17677669, %v3673_v61  ;;  %v6474_v61 = vld [vmem:[#allocation8 + $0x48] sm:$0xff]  }
0x1723   :  { %v6168_v63 = vpop.f32.mrf.mxu1 }
0x1724   :  { %v3737_v31 = vsel %vm228_vm0, %v3731_v52, -inf }
0x1725   :  { %3738 = vmax.xlane.f32.xlu1 %v3737_v31 }
0x172b   :  { %v7650_v33 = vpop.f32.mrf.mxu0 }
0x172d   :  { %v6161_v53 = vpop.f32.mrf.mxu0 }
0x172f   :  { %v7652_v35 = vpop.f32.mrf.mxu0 }
0x1730   :  { %v3623_v60 = vpack.c.bf16 %v7652_v35, %v7650_v33 }
0x1731   :  { %v6162_v36 = vpop.f32.mrf.mxu0 }
0x1733   :  { %v3723_v42 = vpop.f32.mrf.mxu0 }
0x1734   :  { %v3732_v43 = vmul.f32 0.17677669, %v3723_v42 }
0x1735   :  { %v6173_v45 = vpop.f32.mrf.mxu0 }
0x1736   :  { %v3740_v46 = vsel %vm228_vm0, %v3732_v43, -inf }
0x1737   :  { %3741 = vmax.xlane.f32.xlu0 %v3740_v46  ;;  %v3726_v4 = vpop.f32.mrf.mxu0 }
0x1738   :  { %v3733_v48 = vmul.f32 0.17677669, %v3726_v4 }
0x1739   :  { %v6174_v25 = vpop.f32.mrf.mxu0 }
0x173a   :  { %v3743_v50 = vsel %vm228_vm0, %v3733_v48, -inf }
0x173b   :  { %3744 = vmax.xlane.f32.xlu0 %v3743_v50 }
0x17aa   :  { %v3736_v54 = vpop.xlane.xlu0 %3735 }
0x17ab   :  { %v3746_v7 = vsub.f32 %v3730_v18, %v3736_v54 }
0x17ad   :  { %v3750_v27 = vmul.f32 1.442695, %v3746_v7 }
0x17ae   :  { %v3739_v55 = vpop.xlane.xlu1 %3738 }
0x17af   :  { %6626 = vpow2.f32 %v3750_v27  ;;  %v3747_v56 = vsub.f32 %v3731_v52, %v3739_v55 }
0x17b1   :  { %v3752_v10 = vmul.f32 1.442695, %v3747_v56 }
0x17b3   :  { %6628 = vpow2.f32 %v3752_v10 }
0x17bc   :  { %v6627_v29 = vpop.eup %6626 }
0x17bd   :  { %v3758_v14 = vsel %vm228_vm0, %v6627_v29, 0.0 }
0x17be   :  { %3759 = vadd.xlane.f32.xlu0 %v3758_v14 }
0x17c0   :  { %v6629_v21 = vpop.eup %6628  ;;  %v3742_v22 = vpop.xlane.xlu0 %3741 }
0x17c1   :  { %v3748_v37 = vsub.f32 %v3732_v43, %v3742_v22  ;;  %v3761_v44 = vsel %vm228_vm0, %v6629_v21, 0.0  ;;  %v6475_v43 = vld [vmem:[#allocation8 + $0x40] sm:$0xff]  }
0x17c2   :  { %3762 = vadd.xlane.f32.xlu1 %v3761_v44 }
0x17c3   :  { %v3754_v38 = vmul.f32 1.442695, %v3748_v37 }
0x17c4   :  { %v3745_v34 = vpop.xlane.xlu0 %3744 }
0x17c5   :  { %6630 = vpow2.f32 %v3754_v38  ;;  %v3749_v26 = vsub.f32 %v3733_v48, %v3745_v34 }
0x17c7   :  { %v3756_v24 = vmul.f32 1.442695, %v3749_v26 }
0x17c9   :  { %6632 = vpow2.f32 %v3756_v24 }
0x17d2   :  { %v6631_v1 = vpop.eup %6630 }
0x17d3   :  { %v3764_v8 = vsel %vm228_vm0, %v6631_v1, 0.0 }
0x17d4   :  { %3765 = vadd.xlane.f32.xlu0 %v3764_v8 }
0x17d6   :  { %v6633_v57 = vpop.eup %6632 }
0x17d7   :  { %v3767_v5 = vsel %vm228_vm0, %v6633_v57, 0.0 }
0x17d8   :  { %3768 = vadd.xlane.f32.xlu1 %v3767_v5 }
0x17e9   :  { %3829 = vrot.lane.b32.xlu1 %v7602_v15, %s6950_s29 }
0x17ea   :  { %3781 = vrot.lane.b32.xlu0 %v7589_v47, %s6950_s29 }
0x17ed   :  { %4014 = vrot.lane.b32.xlu1 %v7577_v6, %s6927_s30 }
0x17ee   :  { %4012 = vrot.lane.b32.xlu0 %v7585_v40, %s6927_s30 }
0x17f1   :  { %4065 = vrot.lane.b32.xlu1 %v7587_v41, %s6927_s30 }
0x17f5   :  { %4063 = vrot.lane.b32.xlu1 %v7600_v58, %s6927_s30 }
0x1847   :  { %v3760_v9 = vpop.xlane.xlu0 %3759 }
0x184b   :  { %v3763_v13 = vpop.xlane.xlu1 %3762 }
0x184c   :  { %6634 = vrcp.f32 %v3763_v13 }
0x184d   :  { %6636 = vrcp.f32 %v3760_v9 }
0x1859   :  { %v6635_v62 = vpop.eup %6634 }
0x185a   :  { %v6637_v0 = vpop.eup %6636  ;;  %v3775_v17 = vmul.f32 %v6635_v62, %v6629_v21 }
0x185b   :  { %v3774_v30 = vmul.f32 %v6637_v0, %v6627_v29 }
0x185d   :  { %v3766_v3 = vpop.xlane.xlu0 %3765  ;;  %v3778_v49 = vpack.c.bf16 %v3775_v17, %v3774_v30 }
0x185e   :  { %6638 = vrcp.f32 %v3766_v3 }
0x1861   :  { %v3769_v12 = vpop.xlane.xlu1 %3768  ;;  %v3782_v18 = vpop.permute.xlu0 %3781 }
0x1862   :  { %6640 = vrcp.f32 %v3769_v12  ;;  %6176 = vmatpush3.bf16.msra.mxu1 %v3782_v18 }
0x1863   :  { %6187 = vmatprep.subr.bf16.mxu1 %v6476_v39 }
0x1865   :  { %v3830_v52 = vpop.permute.xlu1 %3829  ;;  %6178 = vmatmul.mubr.msk.bf16.vlgmr.msra.gmra.mxu1 %vm228_vm0, %v3778_v49  ;;  %v4013_v21 = vpop.permute.xlu0 %4012 }
0x1866   :  { %6182 = vmatpush3.bf16.msra.mxu0 %v3830_v52  ;;  %6188 = vmatpush3.bf16.msra.mxu1 %v6476_v39 }
0x1867   :  { %6195 = vmatprep.subr.bf16.mxu0 %v6474_v61 }
0x1869   :  { %v4015_v45 = vpop.permute.xlu1 %4014 }
0x186a   :  { %v4020_v56 = vsel %vm1312_vm15, %v4015_v45, 0 }
0x186b   :  { %v6639_v63 = vpop.eup %6638 }
0x186c   :  { %v3776_v53 = vmul.f32 %v6639_v63, %v6631_v1 }
0x186d   :  { %v4066_v46 = vpop.permute.xlu1 %4065 }
0x186e   :  { %v4071_v4 = vsel %vm1312_vm15, %v4066_v46, 0 }
0x186f   :  { %v6641_v31 = vpop.eup %6640 }
0x1870   :  { %v3777_v36 = vmul.f32 %v6641_v31, %v6633_v57 }
0x1871   :  { %v4064_v16 = vpop.permute.xlu1 %4063 }
0x1872   :  { %v3779_v42 = vpack.c.bf16 %v3777_v36, %v3776_v53 }
0x1874   :  { %6184 = vmatmul.mubr.msk.bf16.vlgmr.msra.gmra.mxu0 %vm228_vm0, %v3779_v42 }
0x1875   :  { %6196 = vmatpush3.bf16.msra.mxu0 %v6474_v61  ;;  %6199 = vmatprep.mubr.msk.bf16.mxu0 %vm1312_vm15, %v3622_v11  ;;  %v6477_v11 = vld [vmem:[#allocation8 + $0x50] sm:$0xff]  }
0x1876   :  { %6197 = vmatprep.subr.bf16.mxu0 %v6475_v43  ;;  %6189 = vmatprep.subr.bf16.mxu1 %v6477_v11 }
0x1877   :  { %6190 = vmatpush3.bf16.msra.mxu1 %v6477_v11 }
0x1878   :  { %6203 = vmatprep.subr.bf16.mxu1 %v6948_v19 }
0x1879   :  { %6198 = vmatpush3.bf16.msra.mxu0 %v6475_v43 }
0x187a   :  { %6209 = vmatprep.subr.bf16.mxu0 %v6948_v19 }
0x187c   :  { %6200 = vmatmul.mubr.msk.bf16.vlgmr.msra.gmra.mxu0 %vm1312_vm15, %v3623_v60 }
0x187d   :  { %6210 = vmatpush3.bf16.xpose.msra.mxu0 %v4071_v4  ;;  %6211 = vmatprep.mubr.msk.bf16.mxu0 %vm6949_vm14, %v6948_v19 }
0x187e   :  { %6221 = vmatprep.subr.bf16.mxu0 %v6948_v19 }
0x1884   :  { %6212 = vmatmul.mubr.msk.bf16.vlgmr.msra.gmra.mxu0 %vm1312_vm15, %v4064_v16 }
0x1885   :  { %6223 = vmatprep.mubr.msk.bf16.mxu0 %vm6949_vm14, %v6948_v19 }
0x1925   :  { %v3821_v33 = vpop.f32.mrf.mxu1 }
0x1927   :  { %v6179_v35 = vpop.f32.mrf.mxu1 }
0x1929   :  { %v3824_v60 = vpop.f32.mrf.mxu1 }
0x192a   :  { %v3876_v48 = vpack.c.bf16 %v3824_v60, %v3821_v33 }
0x192b   :  { %v6180_v25 = vpop.f32.mrf.mxu1 }
0x192c   :  { %6191 = vmatprep.mubr.msk.bf16.mxu1 %vm1312_vm15, %v3876_v48 }
0x1934   :  { %v3869_v50 = vpop.f32.mrf.mxu0 }
0x1936   :  { %v6185_v54 = vpop.f32.mrf.mxu0 }
0x1938   :  { %v3872_v7 = vpop.f32.mrf.mxu0 }
0x1939   :  { %v3877_v27 = vpack.c.bf16 %v3872_v7, %v3869_v50 }
0x193a   :  { %v6186_v55 = vpop.f32.mrf.mxu0 }
0x193b   :  { %6192 = vmatmul.mubr.msk.bf16.vlgmr.msra.gmra.mxu1 %vm1312_vm15, %v3877_v27 }
0x193c   :  { %6204 = vmatpush3.bf16.xpose.msra.mxu1 %v4020_v56  ;;  %v7696_v10 = vpop.f32.mrf.mxu0  ;;  %6205 = vmatprep.mubr.msk.bf16.mxu1 %vm6949_vm14, %v6948_v19 }
0x193d   :  { %6215 = vmatprep.subr.bf16.mxu1 %v6948_v19 }
0x193e   :  { %v7701_v29 = vpop.f32.mrf.mxu0 }
0x1940   :  { %v7703_v14 = vpop.f32.mrf.mxu0 }
0x1942   :  { %v7705_v22 = vpop.f32.mrf.mxu0 }
0x1943   :  { %6206 = vmatmul.mubr.msk.bf16.vlgmr.msra.gmra.mxu1 %vm1312_vm15, %v4013_v21 }
0x1944   :  { %v4107_v37 = vpop.f32.mrf.mxu0  ;;  %6217 = vmatprep.mubr.msk.bf16.mxu1 %vm6949_vm14, %v6948_v19 }
0x1945   :  { %v4116_v9 = vmul.f32 0.17677669, %v4107_v37 }
0x1946   :  { %v6213_v44 = vpop.f32.mrf.mxu0 }
0x1947   :  { %v4124_v30 = vsel %vm228_vm0, %v4116_v9, -inf }
0x1948   :  { %v4110_v38 = vpop.f32.mrf.mxu0 }
0x1949   :  { %v4117_v12 = vmul.f32 0.17677669, %v4110_v38 }
0x194a   :  { %v6214_v34 = vpop.f32.mrf.mxu0 }
0x194b   :  { %v4127_v49 = vsel %vm228_vm0, %v4117_v12, -inf }
0x19fb   :  { %v7710_v26 = vpop.f32.mrf.mxu1 }
0x19fd   :  { %v7712_v24 = vpop.f32.mrf.mxu1 }
0x19ff   :  { %v7714_v1 = vpop.f32.mrf.mxu1 }
0x1a01   :  { %v7716_v8 = vpop.f32.mrf.mxu1 }
0x1a03   :  { %v4056_v57 = vpop.f32.mrf.mxu1 }
0x1a04   :  { %v4114_v5 = vmul.f32 0.17677669, %v4056_v57 }
0x1a05   :  { %v6207_v13 = vpop.f32.mrf.mxu1 }
0x1a06   :  { %v4118_v62 = vsel %vm228_vm0, %v4114_v5, -inf }
0x1a07   :  { %4119 = vmax.xlane.f32.xlu0 %v4118_v62  ;;  %v4059_v3 = vpop.f32.mrf.mxu1 }
0x1a08   :  { %v4115_v0 = vmul.f32 0.17677669, %v4059_v3  ;;  %v6478_v3 = vld [vmem:[#allocation8 + $0x68] sm:$0xff]  }
0x1a09   :  { %v6208_v17 = vpop.f32.mrf.mxu1 }
0x1a0a   :  { %v4121_v18 = vsel %vm228_vm0, %v4115_v0, -inf }
0x1a0b   :  { %4122 = vmax.xlane.f32.xlu1 %v4121_v18  ;;  %4125 = vmax.xlane.f32.xlu0 %v4124_v30 }
0x1a0f   :  { %4128 = vmax.xlane.f32.xlu0 %v4127_v49 }
0x1a90   :  { %v4120_v61 = vpop.xlane.xlu0 %4119 }
0x1a91   :  { %v4130_v52 = vsub.f32 %v4114_v5, %v4120_v61 }
0x1a93   :  { %v4134_v43 = vmul.f32 1.442695, %v4130_v52 }
0x1a94   :  { %v4123_v63 = vpop.xlane.xlu1 %4122  ;;  %v4126_v31 = vpop.xlane.xlu0 %4125 }
0x1a95   :  { %v4132_v53 = vsub.f32 %v4116_v9, %v4126_v31  ;;  %v4131_v36 = vsub.f32 %v4115_v0, %v4123_v63  ;;  %v6479_v0 = vld [vmem:[#allocation8 + $0x60] sm:$0xff]  }
0x1a97   :  { %v4138_v42 = vmul.f32 1.442695, %v4132_v53  ;;  %v4136_v4 = vmul.f32 1.442695, %v4131_v36 }
0x1a98   :  { %v4129_v45 = vpop.xlane.xlu0 %4128 }
0x1a99   :  { %v4133_v46 = vsub.f32 %v4117_v12, %v4129_v45  ;;  %6642 = vpow2.f32 %v4138_v42 }
0x1a9a   :  { %6644 = vpow2.f32 %v4134_v43 }
0x1a9b   :  { %v4140_v16 = vmul.f32 1.442695, %v4133_v46 }
0x1a9d   :  { %6646 = vpow2.f32 %v4140_v16 }
0x1a9e   :  { %6648 = vpow2.f32 %v4136_v4 }
0x1aa6   :  { %v6643_v39 = vpop.eup %6642 }
0x1aa7   :  { %v4148_v11 = vsel %vm228_vm0, %v6643_v39, 0.0  ;;  %v6645_v33 = vpop.eup %6644 }
0x1aa8   :  { %4149 = vadd.xlane.f32.xlu0 %v4148_v11  ;;  %v4142_v25 = vsel %vm228_vm0, %v6645_v33, 0.0 }
0x1aaa   :  { %v6647_v35 = vpop.eup %6646 }
0x1aab   :  { %v4151_v60 = vsel %vm228_vm0, %v6647_v35, 0.0  ;;  %v6649_v48 = vpop.eup %6648 }
0x1aac   :  { %4152 = vadd.xlane.f32.xlu1 %v4151_v60  ;;  %4143 = vadd.xlane.f32.xlu0 %v4142_v25  ;;  %v4145_v50 = vsel %vm228_vm0, %v6649_v48, 0.0 }
0x1ab0   :  { %4146 = vadd.xlane.f32.xlu1 %v4145_v50 }
0x1ac1   :  { %4211 = vrot.lane.b32.xlu1 %v7602_v15, %s6927_s30 }
0x1ac2   :  { %4164 = vrot.lane.b32.xlu0 %v7589_v47, %s6927_s30 }
0x1ac5   :  { %4333 = vrot.lane.b32.xlu1 %v7577_v6, %s7922_s13 }
0x1ac6   :  { %4331 = vrot.lane.b32.xlu0 %v7585_v40, %s7922_s13 }
0x1ac9   :  { %4384 = vrot.lane.b32.xlu1 %v7587_v41, %s7922_s13 }
0x1acd   :  { %4382 = vrot.lane.b32.xlu1 %v7600_v58, %s7922_s13 }
0x1b31   :  { %v4150_v54 = vpop.xlane.xlu0 %4149 }
0x1b32   :  { %6650 = vrcp.f32 %v4150_v54 }
0x1b35   :  { %v4153_v7 = vpop.xlane.xlu1 %4152  ;;  %v4144_v27 = vpop.xlane.xlu0 %4143 }
0x1b36   :  { %6652 = vrcp.f32 %v4153_v7 }
0x1b37   :  { %6654 = vrcp.f32 %v4144_v27 }
0x1b39   :  { %v4147_v55 = vpop.xlane.xlu1 %4146  ;;  %v4165_v56 = vpop.permute.xlu0 %4164 }
0x1b3a   :  { %6656 = vrcp.f32 %v4147_v55  ;;  %6216 = vmatpush3.bf16.msra.mxu1 %v4165_v56  ;;  %v4006_v55 = vadd.f32 %v7696_v10, %v7710_v26 }
0x1b3b   :  { %6227 = vmatprep.subr.bf16.mxu1 %v6478_v3 }
0x1b3d   :  { %v4212_v6 = vpop.permute.xlu1 %4211  ;;  %v4332_v62 = vpop.permute.xlu0 %4331 }
0x1b3e   :  { %6222 = vmatpush3.bf16.msra.mxu0 %v4212_v6 }
0x1b3f   :  { %6235 = vmatprep.subr.bf16.mxu0 %v6948_v19  ;;  %v6651_v40 = vpop.eup %6650 }
0x1b40   :  { %v4160_v41 = vmul.f32 %v6651_v40, %v6643_v39  ;;  %v3998_v40 = vadd.f32 %v7701_v29, %v7712_v24 }
0x1b41   :  { %v4334_v58 = vpop.permute.xlu1 %4333 }
0x1b42   :  { %v4339_v57 = vsel %vm1312_vm15, %v4334_v58, 0 }
0x1b43   :  { %v6653_v21 = vpop.eup %6652 }
0x1b44   :  { %v4161_v37 = vmul.f32 %v6653_v21, %v6647_v35  ;;  %v6655_v44 = vpop.eup %6654 }
0x1b45   :  { %v4158_v5 = vmul.f32 %v6655_v44, %v6645_v33  ;;  %v4385_v31 = vpop.permute.xlu1 %4384 }
0x1b46   :  { %v4163_v38 = vpack.c.bf16 %v4161_v37, %v4160_v41  ;;  %v4390_v4 = vsel %vm1312_vm15, %v4385_v31, 0  ;;  %v4009_v37 = vadd.f32 %v7703_v14, %v7714_v1 }
0x1b47   :  { %v6657_v34 = vpop.eup %6656 }
0x1b48   :  { %6224 = vmatmul.mubr.msk.bf16.vlgmr.msra.gmra.mxu0 %vm228_vm0, %v4163_v38  ;;  %v4159_v13 = vmul.f32 %v6657_v34, %v6649_v48  ;;  %v4001_v38 = vadd.f32 %v7705_v22, %v7716_v8 }
0x1b49   :  { %6236 = vmatpush3.bf16.xpose.msra.mxu0 %v4339_v57  ;;  %6237 = vmatprep.mubr.msk.bf16.mxu0 %vm6949_vm14, %v6948_v19  ;;  %v4383_v35 = vpop.permute.xlu1 %4382 }
0x1b4a   :  { %v4162_v9 = vpack.c.bf16 %v4159_v13, %v4158_v5  ;;  %6247 = vmatprep.subr.bf16.mxu0 %v6948_v19 }
0x1b4c   :  { %6218 = vmatmul.mubr.msk.bf16.vlgmr.msra.gmra.mxu1 %vm228_vm0, %v4162_v9 }
0x1b4d   :  { %6228 = vmatpush3.bf16.msra.mxu1 %v6478_v3 }
0x1b4e   :  { %6229 = vmatprep.subr.bf16.mxu1 %v6479_v0 }
0x1b50   :  { %6238 = vmatmul.mubr.msk.bf16.vlgmr.msra.gmra.mxu0 %vm1312_vm15, %v4332_v62 }
0x1b51   :  { %6249 = vmatprep.mubr.msk.bf16.mxu0 %vm6949_vm14, %v6948_v19  ;;  %6230 = vmatpush3.bf16.msra.mxu1 %v6479_v0 }
0x1b52   :  { %6241 = vmatprep.subr.bf16.mxu1 %v6948_v19 }
0x1c08   :  { %v4251_v17 = vpop.f32.mrf.mxu0 }
0x1c0a   :  { %v6225_v12 = vpop.f32.mrf.mxu0 }
0x1c0c   :  { %v4204_v18 = vpop.f32.mrf.mxu1  ;;  %v4254_v30 = vpop.f32.mrf.mxu0 }
0x1c0d   :  { %v4259_v42 = vpack.c.bf16 %v4254_v30, %v4251_v17 }
0x1c0e   :  { %v6219_v49 = vpop.f32.mrf.mxu1  ;;  %v6226_v61 = vpop.f32.mrf.mxu0 }
0x1c10   :  { %v4207_v52 = vpop.f32.mrf.mxu1  ;;  %v4375_v63 = vpop.f32.mrf.mxu0 }
0x1c11   :  { %v4258_v53 = vpack.c.bf16 %v4207_v52, %v4204_v18  ;;  %v4433_v36 = vmul.f32 0.17677669, %v4375_v63 }
0x1c12   :  { %v6220_v43 = vpop.f32.mrf.mxu1  ;;  %v6239_v45 = vpop.f32.mrf.mxu0 }
0x1c13   :  { %6231 = vmatprep.mubr.msk.bf16.mxu1 %vm1312_vm15, %v4258_v53  ;;  %v4437_v46 = vsel %vm228_vm0, %v4433_v36, -inf }
0x1c14   :  { %6232 = vmatmul.mubr.msk.bf16.vlgmr.msra.gmra.mxu1 %vm1312_vm15, %v4259_v42  ;;  %4438 = vmax.xlane.f32.xlu0 %v4437_v46  ;;  %v4378_v16 = vpop.f32.mrf.mxu0 }
0x1c15   :  { %6242 = vmatpush3.bf16.xpose.msra.mxu1 %v4390_v4  ;;  %v4434_v39 = vmul.f32 0.17677669, %v4378_v16  ;;  %6243 = vmatprep.mubr.msk.bf16.mxu1 %vm6949_vm14, %v6948_v19 }
0x1c16   :  { %v6240_v11 = vpop.f32.mrf.mxu0  ;;  %6253 = vmatprep.subr.bf16.mxu1 %v6948_v19 }
0x1c17   :  { %v4440_v33 = vsel %vm228_vm0, %v4434_v39, -inf }
0x1c18   :  { %4441 = vmax.xlane.f32.xlu1 %v4440_v33 }
0x1c1c   :  { %6244 = vmatmul.mubr.msk.bf16.vlgmr.msra.gmra.mxu1 %vm1312_vm15, %v4383_v35 }
0x1c1d   :  { %6255 = vmatprep.mubr.msk.bf16.mxu1 %vm6949_vm14, %v6948_v19 }
0x1c9d   :  { %v4439_v7 = vpop.xlane.xlu0 %4438 }
0x1c9e   :  { %v4449_v27 = vsub.f32 %v4433_v36, %v4439_v7 }
0x1ca0   :  { %v4453_v56 = vmul.f32 1.442695, %v4449_v27 }
0x1ca1   :  { %v4442_v60 = vpop.xlane.xlu1 %4441 }
0x1ca2   :  { %v4450_v48 = vsub.f32 %v4434_v39, %v4442_v60  ;;  %v6480_v60 = vld [vmem:[#allocation8 + $0x78] sm:$0xff]  }
0x1ca4   :  { %v4455_v25 = vmul.f32 1.442695, %v4450_v48  ;;  %v6481_v48 = vld [vmem:[#allocation8 + $0x70] sm:$0xff]  }
0x1ca6   :  { %6658 = vpow2.f32 %v4455_v25 }
0x1ca7   :  { %6660 = vpow2.f32 %v4453_v56 }
0x1cb3   :  { %v6659_v50 = vpop.eup %6658 }
0x1cb4   :  { %v4464_v54 = vsel %vm228_vm0, %v6659_v50, 0.0  ;;  %v6661_v62 = vpop.eup %6660 }
0x1cb5   :  { %4465 = vadd.xlane.f32.xlu1 %v4464_v54  ;;  %v4461_v22 = vsel %vm228_vm0, %v6661_v62, 0.0 }
0x1cd4   :  { %v6233_v6 = vpop.f32.mrf.mxu1 }
0x1cd5   :  { %v7765_v21 = vadd.f32 %v6233_v6, %v4006_v55 }
0x1cd6   :  { %v4312_v41 = vpop.f32.mrf.mxu1 }
0x1cd7   :  { %v7769_v44 = vadd.f32 %v4312_v41, %v3998_v40 }
0x1cd8   :  { %v6234_v58 = vpop.f32.mrf.mxu1 }
0x1cd9   :  { %v7773_v34 = vadd.f32 %v6234_v58, %v4009_v37 }
0x1cda   :  { %v4315_v10 = vpop.f32.mrf.mxu1 }
0x1cdb   :  { %v7775_v26 = vadd.f32 %v4315_v10, %v4001_v38  ;;  %v5612_v10 = vld [vmem:[%s7884_s9 + $0x1] ss:$0 sm:$0xff] }
0x1cdc   :  { %v4426_v57 = vpop.f32.mrf.mxu1 }
0x1cdd   :  { %v4435_v29 = vmul.f32 0.17677669, %v4426_v57 }
0x1cde   :  { %v6245_v24 = vpop.f32.mrf.mxu1 }
0x1cdf   :  { %v4443_v5 = vsel %vm228_vm0, %v4435_v29, -inf }
0x1ce0   :  { %v4429_v13 = vpop.f32.mrf.mxu1  ;;  %4444 = vmax.xlane.f32.xlu0 %v4443_v5 }
0x1ce1   :  { %v4436_v14 = vmul.f32 0.17677669, %v4429_v13 }
0x1ce2   :  { %v6246_v1 = vpop.f32.mrf.mxu1 }
0x1ce3   :  { %v4446_v9 = vsel %vm228_vm0, %v4436_v14, -inf }
0x1ce4   :  { %4447 = vmax.xlane.f32.xlu0 %v4446_v9 }
0x1ce8   :  { %4462 = vadd.xlane.f32.xlu0 %v4461_v22 }
0x1d3e   :  { %v4466_v31 = vpop.xlane.xlu1 %4465 }
0x1d69   :  { %v4445_v8 = vpop.xlane.xlu0 %4444 }
0x1d6a   :  { %v4451_v3 = vsub.f32 %v4435_v29, %v4445_v8 }
0x1d6c   :  { %v4457_v0 = vmul.f32 1.442695, %v4451_v3 }
0x1d6d   :  { %v4448_v17 = vpop.xlane.xlu0 %4447 }
0x1d6e   :  { %6662 = vpow2.f32 %v4457_v0  ;;  %v4452_v12 = vsub.f32 %v4436_v14, %v4448_v17  ;;  %v6484_v0 = vld [vmem:[#allocation10 + $0xf4] ss:$8 sps:$4 sm:$0xff]  }
0x1d70   :  { %v4459_v18 = vmul.f32 1.442695, %v4452_v12 }
0x1d71   :  { %v4463_v63 = vpop.xlane.xlu0 %4462 }
0x1d72   :  { %6664 = vpow2.f32 %v4459_v18 }
0x1d73   :  { %6666 = vrcp.f32 %v4463_v63 }
0x1d74   :  { %6668 = vrcp.f32 %v4466_v31 }
0x1d7b   :  { %v6663_v30 = vpop.eup %6662 }
0x1d7c   :  { %v4467_v49 = vsel %vm228_vm0, %v6663_v30, 0.0 }
0x1d7d   :  { %4468 = vadd.xlane.f32.xlu0 %v4467_v49 }
0x1d7f   :  { %v6665_v61 = vpop.eup %6664 }
0x1d80   :  { %v4470_v52 = vsel %vm228_vm0, %v6665_v61, 0.0  ;;  %v6667_v53 = vpop.eup %6666 }
0x1d81   :  { %4471 = vadd.xlane.f32.xlu1 %v4470_v52  ;;  %v6669_v42 = vpop.eup %6668  ;;  %v4477_v43 = vmul.f32 %v6667_v53, %v6661_v62 }
0x1d82   :  { %v4478_v4 = vmul.f32 %v6669_v42, %v6659_v50  ;;  %v6485_v42 = vld [vmem:[#allocation10 + $0xe0] ss:$8 sps:$4 sm:$0xff]  }
0x1d84   :  { %v4481_v16 = vpack.c.bf16 %v4478_v4, %v4477_v43  ;;  %v6490_v43 = vld [vmem:[#allocation10 + $0xd4] ss:$8 sps:$4 sm:$0xff]   ;;  %v6491_v4 = vld [vmem:[#allocation10 + $0xc0] ss:$8 sps:$4 sm:$0xff]  }
0x1d92   :  { %4530 = vrot.lane.b32.xlu1 %v7602_v15, %s7922_s13 }
0x1d93   :  { %4483 = vrot.lane.b32.xlu0 %v7589_v47, %s7922_s13 }
0x1e06   :  { %v4469_v36 = vpop.xlane.xlu0 %4468 }
0x1e07   :  { %6670 = vrcp.f32 %v4469_v36  ;;  %v6487_v36 = vld [vmem:[#allocation10 + $0xe4] ss:$8 sps:$4 sm:$0xff]  }
0x1e0a   :  { %v4484_v45 = vpop.permute.xlu0 %4483  ;;  %v4472_v46 = vpop.xlane.xlu1 %4471 }
0x1e0b   :  { %6672 = vrcp.f32 %v4472_v46  ;;  %6248 = vmatpush3.bf16.msra.mxu0 %v4484_v45  ;;  %v6488_v45 = vld [vmem:[#allocation10 + $0xd0] ss:$8 sps:$4 sm:$0xff]   ;;  %v6493_v46 = vld [vmem:[#allocation10 + $0xc4] ss:$8 sps:$4 sm:$0xff]  }
0x1e0c   :  { %6259 = vmatprep.subr.bf16.mxu0 %v6480_v60 }
0x1e0e   :  { %6250 = vmatmul.mubr.msk.bf16.vlgmr.msra.gmra.mxu0 %vm228_vm0, %v4481_v16  ;;  %v4531_v15 = vpop.permute.xlu1 %4530  ;;  %v6496_v16 = vld [vmem:[#allocation10 + $0xb4] ss:$8 sps:$4 sm:$0xff]  }
0x1e0f   :  { %6254 = vmatpush3.bf16.msra.mxu1 %v4531_v15  ;;  %6260 = vmatpush3.bf16.msra.mxu0 %v6480_v60  ;;  %v6494_v15 = vld [vmem:[#allocation10 + $0xb0] ss:$8 sps:$4 sm:$0xff]   ;;  %v6503_v60 = vld [vmem:[#allocation10 + $0x80] ss:$8 sps:$4 sm:$0xff]  }
0x1e10   :  { %6261 = vmatprep.subr.bf16.mxu0 %v6481_v48  ;;  %4846 = vmatprep.subr.bf16.mxu1 %v6484_v0 }
0x1e13   :  { %6262 = vmatpush3.bf16.msra.mxu0 %v6481_v48  ;;  %v6506_v48 = vld [vmem:[#allocation13 + $0xf8] sm:$0xff]  }
0x1e14   :  { %v6671_v47 = vpop.eup %6670  ;;  %5888 = vmatprep.subr.bf16.mxu0 %v6506_v48 }
0x1e15   :  { %v4479_v11 = vmul.f32 %v6671_v47, %v6663_v30  ;;  %v6499_v47 = vld [vmem:[#allocation10 + $0xa4] ss:$8 sps:$4 sm:$0xff]  }
0x1e18   :  { %v6673_v39 = vpop.eup %6672 }
0x1e19   :  { %v4480_v33 = vmul.f32 %v6673_v39, %v6665_v61  ;;  %v6497_v39 = vld [vmem:[#allocation10 + $0xa0] ss:$8 sps:$4 sm:$0xff]  }
0x1e1b   :  { %v4482_v35 = vpack.c.bf16 %v4480_v33, %v4479_v11  ;;  %v6500_v11 = vld [vmem:[#allocation10 + $0x90] ss:$8 sps:$4 sm:$0xff]   ;;  %v6502_v33 = vld [vmem:[#allocation10 + $0x94] ss:$8 sps:$4 sm:$0xff]  }
0x1e1d   :  { %6256 = vmatmul.mubr.msk.bf16.vlgmr.msra.gmra.mxu1 %vm228_vm0, %v4482_v35  ;;  %v6505_v35 = vld [vmem:[#allocation10 + $0x84] ss:$8 sps:$4 sm:$0xff]   ;;  %vm5190_vm0 = vcmask 1041409  }
0x1e1e   :  { %4878 = vmatprep.mubr.bf16.mxu1 %v6947_v51 }
0x1ece   :  { %v4523_v25 = vpop.f32.mrf.mxu0 }
0x1ed0   :  { %v6251_v50 = vpop.f32.mrf.mxu0 }
0x1ed1   :  { %v6508_v50 = vld [vmem:[#allocation13 + $0xf0] sm:$0xff]  }
0x1ed2   :  { %v4526_v54 = vpop.f32.mrf.mxu0 }
0x1ed3   :  { %v4577_v7 = vpack.c.bf16 %v4526_v54, %v4523_v25  ;;  %v6507_v25 = vld [vmem:[#allocation13 + $0xb8] sm:$0xff]   ;;  %v6509_v54 = vld [vmem:[#allocation13 + $0xb0] sm:$0xff]  }
0x1ed4   :  { %v6252_v27 = vpop.f32.mrf.mxu0 }
0x1ed5   :  { %6263 = vmatprep.mubr.msk.bf16.mxu0 %vm1312_vm15, %v4577_v7  ;;  %v6510_v7 = vld [vmem:[#allocation13 + $0xe8] sm:$0xff]  }
0x1ed6   :  { %v6511_v27 = vld [vmem:[#allocation13 + $0xa8] sm:$0xff]  }
0x1edd   :  { %v4570_v55 = vpop.f32.mrf.mxu1 }
0x1edf   :  { %v6257_v56 = vpop.f32.mrf.mxu1 }
0x1ee0   :  { %v6513_v56 = vld [vmem:[#allocation13 + $0xa0] sm:$0xff]  }
0x1ee1   :  { %v4573_v6 = vpop.f32.mrf.mxu1 }
0x1ee2   :  { %v4578_v40 = vpack.c.bf16 %v4573_v6, %v4570_v55  ;;  %v6512_v55 = vld [vmem:[#allocation13 + $0xe0] sm:$0xff]   ;;  %v6514_v6 = vld [vmem:[#allocation13 + $0xd8] sm:$0xff]  }
0x1ee3   :  { %v6258_v41 = vpop.f32.mrf.mxu1 }
0x1ee4   :  { %6264 = vmatmul.mubr.msk.bf16.vlgmr.msra.gmra.mxu0 %vm1312_vm15, %v4578_v40  ;;  %v6515_v40 = vld [vmem:[#allocation13 + $0x98] sm:$0xff]  }
0x1ee5   :  { %5889 = vmatpush3.bf16.msra.mxu0 %v6507_v25 }
0x1ee6   :  { %5890 = vmatprep.subr.bf16.mxu0 %v6508_v50 }
0x1ee9   :  { %5891 = vmatpush3.bf16.msra.mxu0 %v6509_v54 }
0x1eea   :  { %5892 = vmatprep.subr.bf16.mxu0 %v6510_v7 }
0x1eed   :  { %5893 = vmatpush3.bf16.msra.mxu0 %v6511_v27 }
0x1eee   :  { %5894 = vmatprep.subr.bf16.mxu0 %v6512_v55 }
0x1ef1   :  { %5895 = vmatpush3.bf16.msra.mxu0 %v6513_v56 }
0x1ef2   :  { %5896 = vmatprep.subr.bf16.mxu0 %v6514_v6 }
0x1ef5   :  { %5897 = vmatpush3.bf16.msra.mxu0 %v6515_v40 }
0x1fa4   :  { %v6265_v37 = vpop.f32.mrf.mxu0 }
0x1fa5   :  { %v4648_v13 = vadd.f32 %v6265_v37, %v7765_v21 }
0x1fa6   :  { %v4631_v58 = vpop.f32.mrf.mxu0 }
0x1fa7   :  { %v4646_v38 = vadd.f32 %v4631_v58, %v7769_v44  ;;  %v4660_v22 = vadd.f32 %v5612_v10, %v4648_v13 }
0x1fa8   :  { %v6266_v57 = vpop.f32.mrf.mxu0 }
0x1fa9   :  { %v4658_v29 = vadd.f32 %v5612_v10, %v4646_v38  ;;  %v4649_v24 = vadd.f32 %v6266_v57, %v7773_v34  ;;  %v4664_v3 = vadd.f32 %v4660_v22, %v7563_v2  ;;  %v6482_v34 = vld [vmem:[#allocation10 + $0xf0] ss:$8 sps:$4 sm:$0xff]   ;;  %v5615_v22 = vld [vmem:[%s7885_s10 + $0x1] ss:$0 sm:$0xff] }
0x1faa   :  { %v4634_v5 = vpop.f32.mrf.mxu0  ;;  %4847 = vmatpush1.bf16.msra.mxu1 %v6482_v34  ;;  %v5616_v34 = vld [vmem:[%s7886_s11 + $0x1] ss:$0 sm:$0xff] }
0x1fab   :  { %v4661_v14 = vadd.f32 %v5612_v10, %v4649_v24  ;;  %v4647_v1 = vadd.f32 %v4634_v5, %v7775_v26  ;;  %v4662_v9 = vadd.f32 %v4658_v29, %v7554_v23  ;;  %4848 = vmatprep.subr.bf16.mxu1 %v6487_v36  ;;  %v6521_v36 = vld [vmem:[#allocation13 + $0x80] sm:$0xff]  }
0x1fad   :  { %v4659_v62 = vadd.f32 %v5612_v10, %v4647_v1  ;;  %4670 = vadd.xlane.f32.xlu1 %v4662_v9  ;;  %v4665_v8 = vadd.f32 %v4661_v14, %v7565_v32 }
0x1fae   :  { %4849 = vmatpush1.bf16.msra.mxu1 %v6485_v42  ;;  %v4754_v42 = vld [vmem:[#allocation11 + $0x2] sm:$0x3] }
0x1faf   :  { %v4663_v44 = vadd.f32 %v4659_v62, %v7556_v59  ;;  %4850 = vmatprep.subr.bf16.mxu1 %v6490_v43 }
0x1fb1   :  { %4672 = vadd.xlane.f32.xlu0 %v4663_v44  ;;  %4676 = vadd.xlane.f32.xlu1 %v4665_v8 }
0x1fb2   :  { %4851 = vmatpush1.bf16.msra.mxu1 %v6488_v45  ;;  %v4763_v45 = vrot.slane %v4754_v42, %v7243_v20 }
0x1fb3   :  { %4852 = vmatprep.subr.bf16.mxu1 %v6493_v46  ;;  %v4759_v46 = vrot.slane %v4754_v42, %v7251_v28 }
0x1fb5   :  { %4674 = vadd.xlane.f32.xlu0 %v4664_v3 }
0x1fb6   :  { %4853 = vmatpush1.bf16.msra.mxu1 %v6491_v4 }
0x1fb7   :  { %4854 = vmatprep.subr.bf16.mxu1 %v6496_v16 }
0x1fba   :  { %4855 = vmatpush1.bf16.msra.mxu1 %v6494_v15 }
0x1fbb   :  { %4856 = vmatprep.subr.bf16.mxu1 %v6499_v47 }
0x1fbe   :  { %4857 = vmatpush1.bf16.msra.mxu1 %v6497_v39 }
0x1fbf   :  { %4858 = vmatprep.subr.bf16.mxu1 %v6502_v33 }
0x1fc2   :  { %4859 = vmatpush1.bf16.msra.mxu1 %v6500_v11 }
0x1fc3   :  { %4860 = vmatprep.subr.bf16.mxu1 %v6505_v35 }
0x1fc6   :  { %4861 = vmatpush1.bf16.msra.mxu1 %v6503_v60 }
0x1fc7   :  { %6267 = vmatprep.subr.bf16.mxu1 %v6948_v19 }
0x2036   :  { %v4671_v21 = vpop.xlane.xlu1 %4670 }
0x2037   :  { %v4678_v26 = vmul.f32 0.0078125, %v4671_v21 }
0x2039   :  { %v7802_v17 = vsub.f32 %v4662_v9, %v4678_v26 }
0x203a   :  { %v4673_v23 = vpop.xlane.xlu0 %4672  ;;  %v4677_v12 = vpop.xlane.xlu1 %4676 }
0x203b   :  { %v4679_v18 = vmul.f32 0.0078125, %v4673_v23  ;;  %v4681_v30 = vmul.f32 0.0078125, %v4677_v12  ;;  %v4686_v59 = vmul.f32 %v7802_v17, %v7802_v17 }
0x203d   :  { %v7806_v32 = vsub.f32 %v4663_v44, %v4679_v18  ;;  %4690 = vadd.xlane.f32.xlu0 %v4686_v59  ;;  %v7808_v49 = vsub.f32 %v4665_v8, %v4681_v30 }
0x203e   :  { %v4675_v2 = vpop.xlane.xlu0 %4674 }
0x203f   :  { %v4680_v61 = vmul.f32 0.0078125, %v4675_v2  ;;  %v4687_v52 = vmul.f32 %v7806_v32, %v7806_v32  ;;  %v4689_v53 = vmul.f32 %v7808_v49, %v7808_v49 }
0x2041   :  { %v7812_v63 = vsub.f32 %v4664_v3, %v4680_v61  ;;  %4692 = vadd.xlane.f32.xlu1 %v4687_v52 }
0x2043   :  { %v4688_v31 = vmul.f32 %v7812_v63, %v7812_v63 }
0x2045   :  { %4694 = vadd.xlane.f32.xlu0 %v4688_v31  ;;  %4696 = vadd.xlane.f32.xlu1 %v4689_v53  ;;  %v6518_v31 = vld [vmem:[#allocation13 + $0xc8] sm:$0xff]  }
0x2046   :  { %v6519_v53 = vld [vmem:[#allocation13 + $0x88] sm:$0xff]  }
0x20c6   :  { %v4691_v41 = vpop.xlane.xlu0 %4690 }
0x20c7   :  { %v4698_v37 = vmul.f32 0.0078125, %v4691_v41 }
0x20c9   :  { %v4702_v58 = vadd.f32 1e-05, %v4698_v37 }
0x20ca   :  { %v4693_v38 = vpop.xlane.xlu1 %4692 }
0x20cb   :  { %6674 = vrsqrt.f32 %v4702_v58  ;;  %v4699_v10 = vmul.f32 0.0078125, %v4693_v38 }
0x20cd   :  { %v4703_v57 = vadd.f32 1e-05, %v4699_v10 }
0x20ce   :  { %v4695_v29 = vpop.xlane.xlu0 %4694  ;;  %v4697_v24 = vpop.xlane.xlu1 %4696 }
0x20cf   :  { %6676 = vrsqrt.f32 %v4703_v57  ;;  %v4700_v5 = vmul.f32 0.0078125, %v4695_v29  ;;  %v4701_v13 = vmul.f32 0.0078125, %v4697_v24  ;;  %v5633_v24 = vld [vmem:[#allocation14 + $0x1] ss:$0 sm:$0xff] }
0x20d1   :  { %v4704_v14 = vadd.f32 1e-05, %v4700_v5  ;;  %v4705_v1 = vadd.f32 1e-05, %v4701_v13 }
0x20d3   :  { %6678 = vrsqrt.f32 %v4704_v14 }
0x20d4   :  { %6680 = vrsqrt.f32 %v4705_v1 }
0x20d8   :  { %v6675_v9 = vpop.eup %6674 }
0x20d9   :  { %v4710_v62 = vmul.f32 %v6675_v9, %v7802_v17 }
0x20db   :  { %v4720_v3 = vmul.f32 %v5615_v22, %v4710_v62 }
0x20dc   :  { %v6677_v44 = vpop.eup %6676 }
0x20dd   :  { %v4711_v8 = vmul.f32 %v6677_v44, %v7806_v32  ;;  %v7827_v23 = vadd.f32 %v5616_v34, %v4720_v3 }
0x20df   :  { %v4721_v0 = vmul.f32 %v5615_v22, %v4711_v8 }
0x20e0   :  { %v6679_v21 = vpop.eup %6678 }
0x20e1   :  { %v6681_v26 = vpop.eup %6680  ;;  %v7829_v12 = vadd.f32 %v5616_v34, %v4721_v0  ;;  %v4712_v17 = vmul.f32 %v6679_v21, %v7812_v63  ;;  %v6517_v63 = vld [vmem:[#allocation13 + $0x90] sm:$0xff]  }
0x20e2   :  { %v4713_v18 = vmul.f32 %v6681_v26, %v7808_v49  ;;  %v6516_v49 = vld [vmem:[#allocation13 + $0xd0] sm:$0xff]  }
0x20e3   :  { %v4751_v30 = vpack.c.bf16 %v7829_v12, %v7827_v23  ;;  %v4722_v59 = vmul.f32 %v5615_v22, %v4712_v17  ;;  %5898 = vmatprep.subr.bf16.mxu0 %v6516_v49 }
0x20e4   :  { %v4723_v32 = vmul.f32 %v5615_v22, %v4713_v18  ;;  %5899 = vmatpush3.bf16.msra.mxu0 %v6517_v63 }
0x20e5   :  { %4879 = vmatmul.mubr.bf16.vlgmr.msra.gmra.mxu1 %v4751_v30  ;;  %v7836_v2 = vadd.f32 %v5616_v34, %v4722_v59  ;;  %5900 = vmatprep.subr.bf16.mxu0 %v6518_v31 }
0x20e6   :  { %4888 = vmatprep.mubr.bf16.mxu1 %v6947_v51  ;;  %v7838_v61 = vadd.f32 %v5616_v34, %v4723_v32  ;;  %v6520_v51 = vld [vmem:[#allocation13 + $0xc0] sm:$0xff]  }
0x20e8   :  { %v4752_v52 = vpack.c.bf16 %v7838_v61, %v7836_v2  ;;  %5901 = vmatpush3.bf16.msra.mxu0 %v6519_v53 }
0x20e9   :  { %5902 = vmatprep.subr.bf16.mxu0 %v6520_v51 }
0x20ec   :  { %5903 = vmatpush3.bf16.msra.mxu0 %v6521_v36 }
0x20ed   :  { %4889 = vmatmul.mubr.bf16.gmra.mxu1 %v4752_v52 }
0x20ee   :  { %6283 = vmatprep.mubr.msk.bf16.mxu1 %vm6949_vm14, %v6948_v19 }
0x21a5   :  { %v4880_v43 = vpop.f32.mrf.mxu1 }
0x21a6   :  { %v4881_v39 = vadd.f32 %v4880_v43, %v4759_v46 }
0x21a7   :  { %v4882_v4 = vpop.f32.mrf.mxu1 }
0x21a8   :  { %v4883_v15 = vadd.f32 %v4882_v4, %v4763_v45  ;;  %v4899_v50 = vmax.f32 %v4881_v39, 0.0 }
0x21a9   :  { %v4884_v16 = vpop.f32.mrf.mxu1 }
0x21aa   :  { %v4885_v47 = vadd.f32 %v4884_v16, %v4759_v46  ;;  %v4900_v48 = vmax.f32 %v4883_v15, 0.0 }
0x21ab   :  { %v4886_v11 = vpop.f32.mrf.mxu1 }
0x21ac   :  { %v4887_v33 = vadd.f32 %v4886_v11, %v4763_v45  ;;  %v4901_v35 = vmax.f32 %v4885_v47, 0.0 }
0x21ad   :  { %v4890_v60 = vpop.f32.mrf.mxu1 }
0x21ae   :  { %v4902_v25 = vmax.f32 %v4887_v33, 0.0  ;;  %v4940_v27 = vpack.c.bf16 %v4901_v35, %v4899_v50  ;;  %v4891_v28 = vadd.f32 %v4890_v60, %v4759_v46 }
0x21af   :  { %v4892_v54 = vpop.f32.mrf.mxu1 }
0x21b0   :  { %v4941_v7 = vpack.c.bf16 %v4902_v25, %v4900_v48  ;;  %v4893_v56 = vadd.f32 %v4892_v54, %v4763_v45  ;;  %v4903_v38 = vmax.f32 %v4891_v28, 0.0 }
0x21b1   :  { %v4894_v55 = vpop.f32.mrf.mxu1 }
0x21b2   :  { %v4895_v20 = vadd.f32 %v4894_v55, %v4759_v46  ;;  %5080 = vmatprep.mubr.bf16.mxu0 %v4941_v7  ;;  %v4904_v37 = vmax.f32 %v4893_v56, 0.0  ;;  %v5652_v55 = vld [vmem:[%s7891_s16 + $0x1] ss:$0 sm:$0xff] }
0x21b3   :  { %v4896_v6 = vpop.f32.mrf.mxu1  ;;  %5081 = vmatmul.mubr.bf16.vlgmr.msra.gmra.mxu0 %v4940_v27 }
0x21b4   :  { %v4897_v40 = vadd.f32 %v4896_v6, %v4763_v45  ;;  %v4905_v41 = vmax.f32 %v4895_v20, 0.0  ;;  %v5653_v6 = vld [vmem:[%s7892_s17 + $0x1] ss:$0 sm:$0xff] }
0x21b6   :  { %v4906_v58 = vmax.f32 %v4897_v40, 0.0  ;;  %v4942_v57 = vpack.c.bf16 %v4905_v41, %v4903_v38 }
0x21b8   :  { %v4943_v10 = vpack.c.bf16 %v4906_v58, %v4904_v37 }
0x21ba   :  { %5088 = vmatprep.mubr.bf16.mxu0 %v4943_v10 }
0x21bb   :  { %5089 = vmatmul.mubr.bf16.gmra.mxu0 %v4942_v57 }
0x2273   :  { %v5904_v29 = vpop.f32.mrf.mxu0 }
0x2275   :  { %v5905_v5 = vpop.f32.mrf.mxu0 }
0x2276   :  { %v5906_v13 = vadd.f32 %v5905_v5, %v5904_v29 }
0x2277   :  { %v5907_v14 = vpop.f32.mrf.mxu0 }
0x2278   :  { %v5083_v1 = vadd.f32 %v5906_v13, %v5633_v24 }
0x2279   :  { %v5908_v9 = vpop.f32.mrf.mxu0 }
0x227a   :  { %v5909_v62 = vadd.f32 %v5908_v9, %v5907_v14  ;;  %v5097_v22 = vadd.f32 %v5083_v1, %v7827_v23 }
0x227b   :  { %v5910_v44 = vpop.f32.mrf.mxu0 }
0x227c   :  { %v5086_v8 = vadd.f32 %v5909_v62, %v5633_v24  ;;  %5105 = vadd.xlane.f32.xlu0 %v5097_v22 }
0x227d   :  { %v5911_v3 = vpop.f32.mrf.mxu0 }
0x227e   :  { %v5912_v34 = vadd.f32 %v5911_v3, %v5910_v44  ;;  %v5098_v0 = vadd.f32 %v5086_v8, %v7829_v12 }
0x227f   :  { %v5913_v21 = vpop.f32.mrf.mxu0 }
0x2280   :  { %v5091_v26 = vadd.f32 %v5912_v34, %v5633_v24  ;;  %5107 = vadd.xlane.f32.xlu1 %v5098_v0 }
0x2281   :  { %v5914_v17 = vpop.f32.mrf.mxu0 }
0x2282   :  { %v5915_v18 = vadd.f32 %v5914_v17, %v5913_v21  ;;  %v5099_v30 = vadd.f32 %v5091_v26, %v7836_v2 }
0x2284   :  { %v5094_v59 = vadd.f32 %v5915_v18, %v5633_v24  ;;  %5109 = vadd.xlane.f32.xlu0 %v5099_v30 }
0x2286   :  { %v5100_v32 = vadd.f32 %v5094_v59, %v7838_v61 }
0x2288   :  { %5111 = vadd.xlane.f32.xlu1 %v5100_v32 }
0x2305   :  { %v5106_v23 = vpop.xlane.xlu0 %5105 }
0x2306   :  { %v5113_v52 = vmul.f32 0.0078125, %v5106_v23 }
0x2308   :  { %v5117_v49 = vsub.f32 %v5097_v22, %v5113_v52 }
0x2309   :  { %v5108_v63 = vpop.xlane.xlu1 %5107 }
0x230a   :  { %v5114_v31 = vmul.f32 0.0078125, %v5108_v63  ;;  %v5121_v53 = vmul.f32 %v5117_v49, %v5117_v49 }
0x230c   :  { %v5118_v51 = vsub.f32 %v5098_v0, %v5114_v31  ;;  %5125 = vadd.xlane.f32.xlu0 %v5121_v53 }
0x230d   :  { %v5110_v12 = vpop.xlane.xlu0 %5109 }
0x230e   :  { %v5115_v36 = vmul.f32 0.0078125, %v5110_v12  ;;  %v5122_v42 = vmul.f32 %v5118_v51, %v5118_v51 }
0x2310   :  { %v5119_v43 = vsub.f32 %v5099_v30, %v5115_v36  ;;  %5127 = vadd.xlane.f32.xlu1 %v5122_v42 }
0x2311   :  { %v5112_v45 = vpop.xlane.xlu1 %5111 }
0x2312   :  { %v5116_v2 = vmul.f32 0.0078125, %v5112_v45  ;;  %v5123_v46 = vmul.f32 %v5119_v43, %v5119_v43  ;;  %v6522_v45 = vld [vmem:[#allocation16 + $0x38] sm:$0xff]  }
0x2313   :  { %6268 = vmatpush3.bf16.msra.mxu1 %v6522_v45 }
0x2314   :  { %v5120_v4 = vsub.f32 %v5100_v32, %v5116_v2  ;;  %5129 = vadd.xlane.f32.xlu0 %v5123_v46  ;;  %6269 = vmatprep.subr.bf16.mxu1 %v6948_v19  ;;  %v6523_v2 = vld [vmem:[#allocation16 + $0x30] sm:$0xff]   ;;  %v6524_v46 = vld [vmem:[#allocation16 + $0x28] sm:$0xff]  }
0x2316   :  { %v5124_v61 = vmul.f32 %v5120_v4, %v5120_v4 }
0x2317   :  { %6270 = vmatpush3.bf16.msra.mxu1 %v6523_v2 }
0x2318   :  { %5131 = vadd.xlane.f32.xlu1 %v5124_v61  ;;  %6271 = vmatprep.subr.bf16.mxu1 %v6948_v19  ;;  %v6526_v61 = vld [vmem:[#allocation16 + $0x18] sm:$0xff]  }
0x231b   :  { %6272 = vmatpush3.bf16.msra.mxu1 %v6524_v46 }
0x231c   :  { %6273 = vmatprep.subr.bf16.mxu1 %v6948_v19 }
0x2395   :  { %v5126_v16 = vpop.xlane.xlu0 %5125 }
0x2396   :  { %v5133_v15 = vmul.f32 0.0078125, %v5126_v16  ;;  %v6527_v16 = vld [vmem:[#allocation16 + $0x10] sm:$0xff]  }
0x2398   :  { %v5137_v47 = vadd.f32 1e-05, %v5133_v15  ;;  %v6528_v15 = vld [vmem:[#allocation16 + $0x8] sm:$0xff]  }
0x2399   :  { %v5128_v39 = vpop.xlane.xlu1 %5127 }
0x239a   :  { %6682 = vrsqrt.f32 %v5137_v47  ;;  %v5134_v11 = vmul.f32 0.0078125, %v5128_v39  ;;  %v6529_v47 = vld [vmem:[#allocation16] sm:$0xff]  }
0x239c   :  { %v5138_v33 = vadd.f32 1e-05, %v5134_v11 }
0x239d   :  { %v5130_v35 = vpop.xlane.xlu0 %5129 }
0x239e   :  { %6684 = vrsqrt.f32 %v5138_v33  ;;  %v5135_v60 = vmul.f32 0.0078125, %v5130_v35 }
0x23a0   :  { %v5139_v48 = vadd.f32 1e-05, %v5135_v60  ;;  %v5654_v60 = vld [vmem:[%s7893_s18] ss:$0 sm:$0xff]  ;;  %s6951_s18 = smov [#allocation19]  }
0x23a1   :  { %v5132_v25 = vpop.xlane.xlu1 %5131  ;;  %s5367_s29 = sshll.u32 %s6951_s18, 4  ;;  %s5368_s29 = int_to_ptr.vmem [resolvable:$true] %s5367_s29 }
0x23a2   :  { %6686 = vrsqrt.f32 %v5139_v48  ;;  %v5136_v50 = vmul.f32 0.0078125, %v5132_v25  ;;  %p6897_p9 = scmp.lt.s32.totalorder %s5368_s29, %s5368_s29 }
0x23a4   :  { %v5140_v54 = vadd.f32 1e-05, %v5136_v50  ;;  %v5655_v50 = vld [vmem:[%s7894_s19] ss:$0 sm:$0xff]  ;;  %s6892_s19 = scalar_lea.vmem %s5368_s29, 32 }
0x23a5   :  { %p6893_p8 = scmp.ne.s32.totalorder %s5368_s29, %s6892_s19  ;;  %p6898_p10 = scmp.lt.s32.totalorder %s6892_s19, %s6892_s19 }
0x23a6   :  { %6688 = vrsqrt.f32 %v5140_v54 }
0x23a7   :  { %v6683_v7 = vpop.eup %6682  ;;  %p6899_p11 = por %p6898_p10, %p6897_p9 }
0x23a8   :  { %v5145_v27 = vmul.f32 %v6683_v7, %v5117_v49 }
0x23a9   :  { %p6900_p12 = pnand %p6899_p11, %p6893_p8 }
0x23aa   :  { %v5155_v20 = vmul.f32 %v5652_v55, %v5145_v27 }
0x23ab   :  { %v6685_v56 = vpop.eup %6684 }
0x23ac   :  { %v5146_v28 = vmul.f32 %v6685_v56, %v5118_v51  ;;  %v5165_v58 = vadd.f32 %v5653_v6, %v5155_v20 }
0x23ae   :  { %v5156_v40 = vmul.f32 %v5652_v55, %v5146_v28 }
0x23af   :  { %v6687_v41 = vpop.eup %6686 }
0x23b0   :  { %v5147_v37 = vmul.f32 %v6687_v41, %v5119_v43  ;;  %v5166_v38 = vadd.f32 %v5653_v6, %v5156_v40 }
0x23b2   :  { %v5169_v10 = vadd.f32 %v5166_v38, %v5165_v58  ;;  %v5157_v29 = vmul.f32 %v5652_v55, %v5147_v37  ;;  %v5656_v58 = vld [vmem:[#allocation17] ss:$0 sm:$0xff] }
0x23b3   :  { %v6689_v57 = vpop.eup %6688 }
0x23b4   :  { %v5148_v24 = vmul.f32 %v6689_v57, %v5120_v4  ;;  %v5170_v5 = vrot.slane %v5169_v10, 4  ;;  %v5167_v1 = vadd.f32 %v5653_v6, %v5157_v29  ;;  %v6525_v4 = vld [vmem:[#allocation16 + $0x20] sm:$0xff]  }
0x23b5   :  { %6274 = vmatpush3.bf16.msra.mxu1 %v6525_v4 }
0x23b6   :  { %v5158_v13 = vmul.f32 %v5652_v55, %v5148_v24  ;;  %v5171_v14 = vadd.f32 %v5170_v5, %v5169_v10  ;;  %6275 = vmatprep.subr.bf16.mxu1 %v6948_v19 }
0x23b8   :  { %v5168_v9 = vadd.f32 %v5653_v6, %v5158_v13  ;;  %v5172_v62 = vrot.slane %v5171_v14, 2 }
0x23b9   :  { %6276 = vmatpush3.bf16.msra.mxu1 %v6526_v61 }
0x23ba   :  { %v5176_v22 = vadd.f32 %v5168_v9, %v5167_v1  ;;  %v5173_v44 = vadd.f32 %v5172_v62, %v5171_v14  ;;  %6277 = vmatprep.subr.bf16.mxu1 %v6948_v19 }
0x23bc   :  { %v5177_v8 = vrot.slane %v5176_v22, 4  ;;  %v5174_v34 = vrot.slane %v5173_v44, 1 }
0x23bd   :  { %6278 = vmatpush3.bf16.msra.mxu1 %v6527_v16 }
0x23be   :  { %v5178_v3 = vadd.f32 %v5177_v8, %v5176_v22  ;;  %v5175_v26 = vadd.f32 %v5174_v34, %v5173_v44  ;;  %6279 = vmatprep.subr.bf16.mxu1 %v6948_v19 }
0x23c0   :  { %v5179_v0 = vrot.slane %v5178_v3, 2  ;;  %v5184_v30 = vmul.f32 0.0625, %v5175_v26 }
0x23c1   :  { %6280 = vmatpush3.bf16.msra.mxu1 %v6528_v15 }
0x23c2   :  { %v5180_v21 = vadd.f32 %v5179_v0, %v5178_v3  ;;  %6281 = vmatprep.subr.bf16.mxu1 %v6948_v19 }
0x23c4   :  { %v5181_v17 = vrot.slane %v5180_v21, 1 }
0x23c5   :  { %6282 = vmatpush3.bf16.msra.mxu1 %v6529_v47 }
0x23c6   :  { %v5182_v18 = vadd.f32 %v5181_v17, %v5180_v21 }
0x23c8   :  { %v5185_v59 = vmul.f32 0.0625, %v5182_v18 }
0x23ca   :  { %v5191_v32 = vsel %vm5190_vm0, %v5185_v59, %v5184_v30 }
0x23cb   :  { %v5194_v23 = vsel %vm5193_vm1, %v5191_v32, 0.0 }
0x23cc   :  { %5195 = vadd.xlane.f32.xlu0 %v5194_v23 }
0x2455   :  { %v5196_v52 = vpop.xlane.xlu0 %5195 }
0x2456   :  { %v5197_v49 = vmul.f32 0.0078125, %v5196_v52 }
0x2458   :  { %v5199_v63 = vrot.slane %v5197_v49, 1  ;;  %v5202_v31 = vsub.f32 %v5184_v30, %v5197_v49 }
0x245a   :  { %v5203_v53 = vsub.f32 %v5185_v59, %v5199_v63  ;;  %v5204_v12 = vmul.f32 %v5202_v31, %v5202_v31 }
0x245c   :  { %v5205_v51 = vmul.f32 %v5203_v53, %v5203_v53 }
0x245e   :  { %v5208_v36 = vrot.slane %v5205_v51, 7 }
0x2460   :  { %v5209_v42 = vsel %vm5190_vm0, %v5208_v36, %v5204_v12 }
0x2461   :  { %v5211_v43 = vsel %vm5193_vm1, %v5209_v42, 0.0 }
0x2462   :  { %5212 = vadd.xlane.f32.xlu1 %v5211_v43 }
0x24eb   :  { %v5213_v39 = vpop.xlane.xlu1 %5212 }
0x24ec   :  { %v5214_v11 = vmul.f32 0.0078125, %v5213_v39 }
0x24ee   :  { %v5215_v33 = vadd.f32 1e-05, %v5214_v11 }
0x24f0   :  { %6690 = vrsqrt.f32 %v5215_v33 }
0x24fd   :  { %v6691_v35 = vpop.eup %6690 }
0x24fe   :  { %v5218_v48 = vrot.slane %v6691_v35, 1  ;;  %v5221_v25 = vmul.f32 %v6691_v35, %v5202_v31 }
0x2500   :  { %v5222_v54 = vmul.f32 %v5218_v48, %v5203_v53  ;;  %v5229_v7 = vmul.f32 %v5654_v60, %v5221_v25 }
0x2502   :  { %v5230_v27 = vmul.f32 %v5654_v60, %v5222_v54  ;;  %v5237_v19 = vadd.f32 %v5655_v50, %v5229_v7 }
0x2504   :  { %v5238_v55 = vadd.f32 %v5655_v50, %v5230_v27  ;;  %v5255_v56 = vpack.c.bf16 %v5237_v19, %v5237_v19 }
0x2506   :  { %v5256_v20 = vpack.c.bf16 %v5238_v55, %v5238_v55  ;;  %v5266_v6 = vunpack.c.l.b16 %v5255_v56 }
0x2508   :  { %v5267_v28 = vunpack.c.l.b16 %v5256_v20 }
0x250a   :  { %v5268_v40 = vrot.slane %v5267_v28, 7 }
0x250c   :  { %v5269_v41 = vsel %vm5190_vm0, %v5268_v40, %v5266_v6 }
0x250d   :  { %v5270_v37 = vpack.c.b16 %v5269_v41, %v5269_v41 }
0x250f   :  { %6284 = vmatmul.mubr.bf16.vlgmr.msra.gmra.mxu1 %v5270_v37 }
0x25cf   :  { %v5354_v38 = vpop.f32.mrf.mxu1 }
0x25d0   :  { %v5355_v10 = vadd.f32 %v5656_v58, %v5354_v38 }
0x25d1   :  { %v6285_v57 = vpop.f32.mrf.mxu1 }
0x25d2   :  { %5360 = vst [vmem:[#allocation19] sm:$0x3] %v5355_v10 }
0x25d3   :  { %v5357_v29 = vpop.f32.mrf.mxu1 }
0x25d4   :  { %6903 = shalt.err (!%p6900_p12)
}
0x25d5   :  { %5370 = dma.vmem_to_hbm [thread:$0]  %s5368_s29, 32, %s7897_s22, [#allocation4]   ;;  %v6286_v24 = vpop.f32.mrf.mxu1 }
0x25d6   :  { %6924 = dma.done.wait [#allocation4], 32  }
0x25d7   :  { %6925 = vsyncadd [#allocation4], 4294967264 }
0x25d8   :  { %5374 = vsyncpa [#allocation3], 1 }
0x25d9   :  { %5375 = vsyncpa [#allocation6], 1 }
0x25da   :  { %5376 = vsyncpa [#allocation9], 1 }
0x25db   :  { %5377 = vsyncpa [#allocation12], 1 }
0x25dc   :  { %5378 = vsyncpa [#allocation15], 1 }
0x25dd   :  { %5379 = vsyncpa [#allocation18], 1 }
0x25de   :  { %5380 = vsyncpa [#allocation4], 1 }

</bundles_post_ra>
